<compile_context>
chip_gen: v6e
topology: v6e:2x2x1
jax: 0.10.0
libtpu: 0.0.40
codegen_flags: <defaults>
</compile_context>

<pallas_src>
import jax
import jax.numpy as jnp
from jax.experimental import pallas as pl
from jax.experimental.pallas import tpu as pltpu


# ------------------------------ fused kernel --------------------------------

def _make_resblock_kernel(H, W, Cin, Cout, has_proj):
    """Fused ResBlock kernel for one batch element per grid step."""
    HW = H * W

    def kernel(*refs):
        if has_proj:
            (xpad_ref, w1_ref, b1_ref, w2_ref, b2_ref,
             wd_ref, bd_ref, alpha_ref, o_ref, mid_ref) = refs
        else:
            (xpad_ref, w1_ref, b1_ref, w2_ref, b2_ref,
             alpha_ref, o_ref, mid_ref) = refs
            wd_ref = bd_ref = None

        xpad = xpad_ref[0]                                    # (H+2, W+2, Cin) f32

        # ----------- conv1 (3x3, s1, p1) + bias + PReLU, in-kernel im2col ----
        acc1 = jnp.zeros((HW, Cout), jnp.float32)
        for dh in range(3):
            for dw in range(3):
                t = dh * 3 + dw
                tap = xpad[dh:dh + H, dw:dw + W, :].reshape(HW, Cin)
                acc1 = acc1 + jnp.dot(tap.astype(jnp.bfloat16), w1_ref[t],
                                      preferred_element_type=jnp.float32)
        y1 = acc1 + b1_ref[...]                               # (HW, Cout)
        a1 = alpha_ref[0]
        y1 = jnp.where(y1 >= 0.0, y1, a1 * y1)

        # -------- stage conv1 output zero-padded in VMEM scratch (no HBM) ----
        mid_ref[...] = jnp.zeros_like(mid_ref)
        mid_ref[pl.ds(1, H), pl.ds(1, W), :] = y1.reshape(H, W, Cout)
        mid = mid_ref[...]                                    # (H+2, W+2, Cout)

        # -------- conv2 (3x3) + bias + residual + PReLU (fused epilogue) -----
        acc2 = jnp.zeros((HW, Cout), jnp.float32)
        for dh in range(3):
            for dw in range(3):
                t = dh * 3 + dw
                tap = mid[dh:dh + H, dw:dw + W, :].reshape(HW, Cout)
                acc2 = acc2 + jnp.dot(tap.astype(jnp.bfloat16), w2_ref[t],
                                      preferred_element_type=jnp.float32)
        y2 = acc2 + b2_ref[...]

        x_in = xpad[1:H + 1, 1:W + 1, :].reshape(HW, Cin)     # f32 residual source
        if has_proj:
            res = jnp.dot(x_in.astype(jnp.bfloat16), wd_ref[...],
                          preferred_element_type=jnp.float32) + bd_ref[...]
        else:
            res = x_in                                        # identity (Cin == Cout)

        y2 = y2 + res
        a2 = alpha_ref[1]
        o_ref[0] = jnp.where(y2 >= 0.0, y2, a2 * y2)

    return kernel


# ------------------------------ wrapper --------------------------------------

def resblock_pallas(x_nchw, params):
    """ResBlock forward. x_nchw: [B, Cin, H, W] -> [B, Cout, H, W]."""
    w1, b1 = params["w1"], params["b1"]
    w2, b2 = params["w2"], params["b2"]
    alphas = params["alphas"]
    wd, bd = params.get("wd"), params.get("bd")
    has_proj = wd is not None

    B, Cin, H, W = x_nchw.shape
    Cout = w1.shape[-1]
    HW = H * W

    # NCHW -> NHWC, spatial zero-pad on host (cheap, single pass).
    x = jnp.transpose(x_nchw, (0, 2, 3, 1)).astype(jnp.float32)
    xpad = jnp.pad(x, ((0, 0), (1, 1), (1, 1), (0, 0)))

    in_specs = [
        pl.BlockSpec((1, H + 2, W + 2, Cin), lambda b: (b, 0, 0, 0)),
        pl.BlockSpec((9, Cin, Cout), lambda b: (0, 0, 0)),
        pl.BlockSpec((1, Cout), lambda b: (0, 0)),
        pl.BlockSpec((9, Cout, Cout), lambda b: (0, 0, 0)),
        pl.BlockSpec((1, Cout), lambda b: (0, 0)),
    ]
    args = [xpad, w1, b1, w2, b2]
    if has_proj:
        in_specs += [pl.BlockSpec((Cin, Cout), lambda b: (0, 0)),
                     pl.BlockSpec((1, Cout), lambda b: (0, 0))]
        args += [wd, bd]
    # PReLU alphas as scalars in SMEM (no VMEM tile / per-step DMA).
    in_specs.append(pl.BlockSpec(memory_space=pltpu.MemorySpace.SMEM))
    args.append(alphas)

    out = pl.pallas_call(
        _make_resblock_kernel(H, W, Cin, Cout, has_proj),
        out_shape=jax.ShapeDtypeStruct((B, HW, Cout), jnp.float32),
        grid=(B,),
        in_specs=in_specs,
        out_specs=pl.BlockSpec((1, HW, Cout), lambda b: (b, 0, 0)),
        scratch_shapes=[pltpu.VMEM((H + 2, W + 2, Cout), jnp.float32)],
        compiler_params=pltpu.CompilerParams(
            dimension_semantics=("parallel",)),
    )(*args)

    # (B, HW, Cout) -> NCHW
    return jnp.transpose(out.reshape(B, H, W, Cout), (0, 3, 1, 2))


# ------------------------------ parameters -----------------------------------

def init_resblock_params(key, in_ch, out_ch):
    keys = jax.random.split(key, 6)

    def conv_w(k, cin, cout, ksz):
        fan_in = cin * ksz * ksz
        return jax.random.normal(k, (cout, cin, ksz, ksz), jnp.float32) * (fan_in ** -0.5)

    w1 = conv_w(keys[0], in_ch, out_ch, 3)
    b1 = jax.random.normal(keys[1], (out_ch,), jnp.float32) * 0.01
    w2 = conv_w(keys[2], out_ch, out_ch, 3)
    b2 = jax.random.normal(keys[3], (out_ch,), jnp.float32) * 0.01

    params = {
        # torch (Cout,Cin,3,3) -> per-tap (9, Cin, Cout), bf16 for the MXU
        "w1": jnp.transpose(w1, (2, 3, 1, 0)).reshape(9, in_ch, out_ch).astype(jnp.bfloat16),
        "b1": b1.reshape(1, out_ch),
        "w2": jnp.transpose(w2, (2, 3, 1, 0)).reshape(9, out_ch, out_ch).astype(jnp.bfloat16),
        "b2": b2.reshape(1, out_ch),
        "alphas": jnp.array([0.25, 0.25], jnp.float32),  # nn.PReLU() default init
    }
    if in_ch != out_ch:
        wd = conv_w(keys[4], in_ch, out_ch, 1)
        bd = jax.random.normal(keys[5], (out_ch,), jnp.float32) * 0.01
        params["wd"] = jnp.transpose(wd[:, :, 0, 0], (1, 0)).astype(jnp.bfloat16)  # (Cin, Cout)
        params["bd"] = bd.reshape(1, out_ch)
    return params


# ---------------------------------- main --------------------------------------

if __name__ == "__main__":
    B, H, W = 2, 16, 16
    root = jax.random.PRNGKey(0)
    k_p1, k_p2, k_x1, k_x2 = jax.random.split(root, 4)

    # Case 1: in_ch == out_ch -> identity residual path.
    p_same = init_resblock_params(k_p1, 32, 32)
    x_same = jax.random.normal(k_x1, (B, 32, H, W), jnp.float32)
    y_same = jax.block_until_ready(resblock_pallas(x_same, p_same))

    # Case 2: in_ch != out_ch -> 1x1-conv downsample residual path.
    p_proj = init_resblock_params(k_p2, 16, 64)
    x_proj = jax.random.normal(k_x2, (B, 16, H, W), jnp.float32)
    y_proj = jax.block_until_ready(resblock_pallas(x_proj, p_proj))

    assert y_same.shape == (B, 32, H, W), f"bad shape {y_same.shape}"
    assert y_proj.shape == (B, 64, H, W), f"bad shape {y_proj.shape}"
    assert bool(jnp.all(jnp.isfinite(y_same)))
    assert bool(jnp.all(jnp.isfinite(y_proj)))

    print("KERNEL_OK")
</pallas_src>

<mosaic_0001>
module attributes {stable_mosaic.version = 11 : i64} {
  func.func @kernel(%arg0: i32, %arg1: memref<1x18x18x32xf32, #tpu.memory_space<vmem>>, %arg2: memref<9x32x32xbf16, #tpu.memory_space<vmem>>, %arg3: memref<1x32xf32, #tpu.memory_space<vmem>>, %arg4: memref<9x32x32xbf16, #tpu.memory_space<vmem>>, %arg5: memref<1x32xf32, #tpu.memory_space<vmem>>, %arg6: memref<2xf32, #tpu.memory_space<smem>>, %arg7: memref<1x256x32xf32, #tpu.memory_space<vmem>>, %arg8: memref<18x18x32xf32, #tpu.memory_space<vmem>>) attributes {dimension_semantics = [#tpu.dimension_semantics<parallel>], iteration_bounds = array<i64: 2>, scalar_prefetch = 0 : i64, scratch_operands = 1 : i64, tpu.core_type = #tpu.core_type<tc>, window_params = [{transform_indices = @transform_0, window_bounds = array<i64: 1, 18, 18, 32>}, {pipeline_mode = #tpu.pipeline_mode<synchronous>, transform_indices = @transform_1, window_bounds = array<i64: 9, 32, 32>}, {pipeline_mode = #tpu.pipeline_mode<synchronous>, transform_indices = @transform_2, window_bounds = array<i64: 1, 32>}, {pipeline_mode = #tpu.pipeline_mode<synchronous>, transform_indices = @transform_3, window_bounds = array<i64: 9, 32, 32>}, {pipeline_mode = #tpu.pipeline_mode<synchronous>, transform_indices = @transform_4, window_bounds = array<i64: 1, 32>}, {transform_indices = @transform_5, window_bounds = array<i64: 2>}, {transform_indices = @transform_6, window_bounds = array<i64: 1, 256, 32>}]} {
    %c0 = arith.constant 0 : index
    %c0_0 = arith.constant 0 : index
    %c0_1 = arith.constant 0 : index
    %c0_2 = arith.constant 0 : index
    %0 = vector.load %arg1[%c0, %c0_0, %c0_1, %c0_2] : memref<1x18x18x32xf32, #tpu.memory_space<vmem>>, vector<1x18x18x32xf32>
    %1 = vector.shape_cast %0 : vector<1x18x18x32xf32> to vector<18x18x32xf32>
    %cst = arith.constant 0.000000e+00 : f32
    %2 = vector.broadcast %cst : f32 to vector<256x32xf32>
    %3 = vector.extract_strided_slice %1 {offsets = [0, 0, 0], sizes = [16, 16, 32], strides = [1, 1, 1]} : vector<18x18x32xf32> to vector<16x16x32xf32>
    %4 = vector.shape_cast %3 : vector<16x16x32xf32> to vector<256x32xf32>
    %5 = arith.truncf %4 : vector<256x32xf32> to vector<256x32xbf16>
    %c0_3 = arith.constant 0 : index
    %c0_4 = arith.constant 0 : index
    %c0_5 = arith.constant 0 : index
    %6 = vector.load %arg2[%c0_3, %c0_4, %c0_5] : memref<9x32x32xbf16, #tpu.memory_space<vmem>>, vector<1x32x32xbf16>
    %7 = vector.shape_cast %6 : vector<1x32x32xbf16> to vector<32x32xbf16>
    %cst_6 = arith.constant dense<0.000000e+00> : vector<256x32xf32>
    %8 = tpu.matmul %5, %7, %cst_6 {dimension_numbers = #tpu.dot_dimension_numbers<[1], [0], [0], [1], [0, 0, 1, 1], [], []>} : vector<256x32xbf16>, vector<32x32xbf16>, vector<256x32xf32> -> vector<256x32xf32>
    %9 = arith.addf %2, %8 : vector<256x32xf32>
    %10 = vector.extract_strided_slice %1 {offsets = [0, 1, 0], sizes = [16, 16, 32], strides = [1, 1, 1]} : vector<18x18x32xf32> to vector<16x16x32xf32>
    %11 = vector.shape_cast %10 : vector<16x16x32xf32> to vector<256x32xf32>
    %12 = arith.truncf %11 : vector<256x32xf32> to vector<256x32xbf16>
    %c1 = arith.constant 1 : index
    %c0_7 = arith.constant 0 : index
    %c0_8 = arith.constant 0 : index
    %13 = vector.load %arg2[%c1, %c0_7, %c0_8] : memref<9x32x32xbf16, #tpu.memory_space<vmem>>, vector<1x32x32xbf16>
    %14 = vector.shape_cast %13 : vector<1x32x32xbf16> to vector<32x32xbf16>
    %cst_9 = arith.constant dense<0.000000e+00> : vector<256x32xf32>
    %15 = tpu.matmul %12, %14, %cst_9 {dimension_numbers = #tpu.dot_dimension_numbers<[1], [0], [0], [1], [0, 0, 1, 1], [], []>} : vector<256x32xbf16>, vector<32x32xbf16>, vector<256x32xf32> -> vector<256x32xf32>
    %16 = arith.addf %9, %15 : vector<256x32xf32>
    %17 = vector.extract_strided_slice %1 {offsets = [0, 2, 0], sizes = [16, 16, 32], strides = [1, 1, 1]} : vector<18x18x32xf32> to vector<16x16x32xf32>
    %18 = vector.shape_cast %17 : vector<16x16x32xf32> to vector<256x32xf32>
    %19 = arith.truncf %18 : vector<256x32xf32> to vector<256x32xbf16>
    %c2 = arith.constant 2 : index
    %c0_10 = arith.constant 0 : index
    %c0_11 = arith.constant 0 : index
    %20 = vector.load %arg2[%c2, %c0_10, %c0_11] : memref<9x32x32xbf16, #tpu.memory_space<vmem>>, vector<1x32x32xbf16>
    %21 = vector.shape_cast %20 : vector<1x32x32xbf16> to vector<32x32xbf16>
    %cst_12 = arith.constant dense<0.000000e+00> : vector<256x32xf32>
    %22 = tpu.matmul %19, %21, %cst_12 {dimension_numbers = #tpu.dot_dimension_numbers<[1], [0], [0], [1], [0, 0, 1, 1], [], []>} : vector<256x32xbf16>, vector<32x32xbf16>, vector<256x32xf32> -> vector<256x32xf32>
    %23 = arith.addf %16, %22 : vector<256x32xf32>
    %24 = vector.extract_strided_slice %1 {offsets = [1, 0, 0], sizes = [16, 16, 32], strides = [1, 1, 1]} : vector<18x18x32xf32> to vector<16x16x32xf32>
    %25 = vector.shape_cast %24 : vector<16x16x32xf32> to vector<256x32xf32>
    %26 = arith.truncf %25 : vector<256x32xf32> to vector<256x32xbf16>
    %c3 = arith.constant 3 : index
    %c0_13 = arith.constant 0 : index
    %c0_14 = arith.constant 0 : index
    %27 = vector.load %arg2[%c3, %c0_13, %c0_14] : memref<9x32x32xbf16, #tpu.memory_space<vmem>>, vector<1x32x32xbf16>
    %28 = vector.shape_cast %27 : vector<1x32x32xbf16> to vector<32x32xbf16>
    %cst_15 = arith.constant dense<0.000000e+00> : vector<256x32xf32>
    %29 = tpu.matmul %26, %28, %cst_15 {dimension_numbers = #tpu.dot_dimension_numbers<[1], [0], [0], [1], [0, 0, 1, 1], [], []>} : vector<256x32xbf16>, vector<32x32xbf16>, vector<256x32xf32> -> vector<256x32xf32>
    %30 = arith.addf %23, %29 : vector<256x32xf32>
    %31 = vector.extract_strided_slice %1 {offsets = [1, 1, 0], sizes = [16, 16, 32], strides = [1, 1, 1]} : vector<18x18x32xf32> to vector<16x16x32xf32>
    %32 = vector.shape_cast %31 : vector<16x16x32xf32> to vector<256x32xf32>
    %33 = arith.truncf %32 : vector<256x32xf32> to vector<256x32xbf16>
    %c4 = arith.constant 4 : index
    %c0_16 = arith.constant 0 : index
    %c0_17 = arith.constant 0 : index
    %34 = vector.load %arg2[%c4, %c0_16, %c0_17] : memref<9x32x32xbf16, #tpu.memory_space<vmem>>, vector<1x32x32xbf16>
    %35 = vector.shape_cast %34 : vector<1x32x32xbf16> to vector<32x32xbf16>
    %cst_18 = arith.constant dense<0.000000e+00> : vector<256x32xf32>
    %36 = tpu.matmul %33, %35, %cst_18 {dimension_numbers = #tpu.dot_dimension_numbers<[1], [0], [0], [1], [0, 0, 1, 1], [], []>} : vector<256x32xbf16>, vector<32x32xbf16>, vector<256x32xf32> -> vector<256x32xf32>
    %37 = arith.addf %30, %36 : vector<256x32xf32>
    %38 = vector.extract_strided_slice %1 {offsets = [1, 2, 0], sizes = [16, 16, 32], strides = [1, 1, 1]} : vector<18x18x32xf32> to vector<16x16x32xf32>
    %39 = vector.shape_cast %38 : vector<16x16x32xf32> to vector<256x32xf32>
    %40 = arith.truncf %39 : vector<256x32xf32> to vector<256x32xbf16>
    %c5 = arith.constant 5 : index
    %c0_19 = arith.constant 0 : index
    %c0_20 = arith.constant 0 : index
    %41 = vector.load %arg2[%c5, %c0_19, %c0_20] : memref<9x32x32xbf16, #tpu.memory_space<vmem>>, vector<1x32x32xbf16>
    %42 = vector.shape_cast %41 : vector<1x32x32xbf16> to vector<32x32xbf16>
    %cst_21 = arith.constant dense<0.000000e+00> : vector<256x32xf32>
    %43 = tpu.matmul %40, %42, %cst_21 {dimension_numbers = #tpu.dot_dimension_numbers<[1], [0], [0], [1], [0, 0, 1, 1], [], []>} : vector<256x32xbf16>, vector<32x32xbf16>, vector<256x32xf32> -> vector<256x32xf32>
    %44 = arith.addf %37, %43 : vector<256x32xf32>
    %45 = vector.extract_strided_slice %1 {offsets = [2, 0, 0], sizes = [16, 16, 32], strides = [1, 1, 1]} : vector<18x18x32xf32> to vector<16x16x32xf32>
    %46 = vector.shape_cast %45 : vector<16x16x32xf32> to vector<256x32xf32>
    %47 = arith.truncf %46 : vector<256x32xf32> to vector<256x32xbf16>
    %c6 = arith.constant 6 : index
    %c0_22 = arith.constant 0 : index
    %c0_23 = arith.constant 0 : index
    %48 = vector.load %arg2[%c6, %c0_22, %c0_23] : memref<9x32x32xbf16, #tpu.memory_space<vmem>>, vector<1x32x32xbf16>
    %49 = vector.shape_cast %48 : vector<1x32x32xbf16> to vector<32x32xbf16>
    %cst_24 = arith.constant dense<0.000000e+00> : vector<256x32xf32>
    %50 = tpu.matmul %47, %49, %cst_24 {dimension_numbers = #tpu.dot_dimension_numbers<[1], [0], [0], [1], [0, 0, 1, 1], [], []>} : vector<256x32xbf16>, vector<32x32xbf16>, vector<256x32xf32> -> vector<256x32xf32>
    %51 = arith.addf %44, %50 : vector<256x32xf32>
    %52 = vector.extract_strided_slice %1 {offsets = [2, 1, 0], sizes = [16, 16, 32], strides = [1, 1, 1]} : vector<18x18x32xf32> to vector<16x16x32xf32>
    %53 = vector.shape_cast %52 : vector<16x16x32xf32> to vector<256x32xf32>
    %54 = arith.truncf %53 : vector<256x32xf32> to vector<256x32xbf16>
    %c7 = arith.constant 7 : index
    %c0_25 = arith.constant 0 : index
    %c0_26 = arith.constant 0 : index
    %55 = vector.load %arg2[%c7, %c0_25, %c0_26] : memref<9x32x32xbf16, #tpu.memory_space<vmem>>, vector<1x32x32xbf16>
    %56 = vector.shape_cast %55 : vector<1x32x32xbf16> to vector<32x32xbf16>
    %cst_27 = arith.constant dense<0.000000e+00> : vector<256x32xf32>
    %57 = tpu.matmul %54, %56, %cst_27 {dimension_numbers = #tpu.dot_dimension_numbers<[1], [0], [0], [1], [0, 0, 1, 1], [], []>} : vector<256x32xbf16>, vector<32x32xbf16>, vector<256x32xf32> -> vector<256x32xf32>
    %58 = arith.addf %51, %57 : vector<256x32xf32>
    %59 = vector.extract_strided_slice %1 {offsets = [2, 2, 0], sizes = [16, 16, 32], strides = [1, 1, 1]} : vector<18x18x32xf32> to vector<16x16x32xf32>
    %60 = vector.shape_cast %59 : vector<16x16x32xf32> to vector<256x32xf32>
    %61 = arith.truncf %60 : vector<256x32xf32> to vector<256x32xbf16>
    %c8 = arith.constant 8 : index
    %c0_28 = arith.constant 0 : index
    %c0_29 = arith.constant 0 : index
    %62 = vector.load %arg2[%c8, %c0_28, %c0_29] : memref<9x32x32xbf16, #tpu.memory_space<vmem>>, vector<1x32x32xbf16>
    %63 = vector.shape_cast %62 : vector<1x32x32xbf16> to vector<32x32xbf16>
    %cst_30 = arith.constant dense<0.000000e+00> : vector<256x32xf32>
    %64 = tpu.matmul %61, %63, %cst_30 {dimension_numbers = #tpu.dot_dimension_numbers<[1], [0], [0], [1], [0, 0, 1, 1], [], []>} : vector<256x32xbf16>, vector<32x32xbf16>, vector<256x32xf32> -> vector<256x32xf32>
    %65 = arith.addf %58, %64 : vector<256x32xf32>
    %c0_31 = arith.constant 0 : index
    %c0_32 = arith.constant 0 : index
    %66 = vector.load %arg3[%c0_31, %c0_32] : memref<1x32xf32, #tpu.memory_space<vmem>>, vector<1x32xf32>
    %67 = vector.broadcast %66 : vector<1x32xf32> to vector<256x32xf32>
    %68 = arith.addf %65, %67 : vector<256x32xf32>
    %c0_33 = arith.constant 0 : index
    %69 = memref.load %arg6[%c0_33] : memref<2xf32, #tpu.memory_space<smem>>
    %cst_34 = arith.constant 0.000000e+00 : f32
    %70 = vector.broadcast %cst_34 : f32 to vector<256x32xf32>
    %71 = arith.cmpf oge, %68, %70 : vector<256x32xf32>
    %72 = vector.broadcast %69 : f32 to vector<256x32xf32>
    %73 = arith.mulf %72, %68 : vector<256x32xf32>
    %74 = arith.select %71, %68, %73 : vector<256x32xi1>, vector<256x32xf32>
    %cst_35 = arith.constant 0.000000e+00 : f32
    %75 = vector.broadcast %cst_35 : f32 to vector<18x18x32xf32>
    %c0_36 = arith.constant 0 : index
    %c0_37 = arith.constant 0 : index
    %c0_38 = arith.constant 0 : index
    %76 = vector.load %arg8[%c0_36, %c0_37, %c0_38] : memref<18x18x32xf32, #tpu.memory_space<vmem>>, vector<18x18x32xf32>
    tpu.vector_store %arg8[%c0_36, %c0_37, %c0_38], %75 {strides = array<i32>} : memref<18x18x32xf32, #tpu.memory_space<vmem>>, vector<18x18x32xf32>,
    %77 = vector.shape_cast %74 : vector<256x32xf32> to vector<16x16x32xf32>
    %c1_39 = arith.constant 1 : index
    %c1_40 = arith.constant 1 : index
    %c0_41 = arith.constant 0 : index
    %78 = vector.load %arg8[%c1_39, %c1_40, %c0_41] : memref<18x18x32xf32, #tpu.memory_space<vmem>>, vector<16x16x32xf32>
    tpu.vector_store %arg8[%c1_39, %c1_40, %c0_41], %77 {strides = array<i32>} : memref<18x18x32xf32, #tpu.memory_space<vmem>>, vector<16x16x32xf32>,
    %c0_42 = arith.constant 0 : index
    %c0_43 = arith.constant 0 : index
    %c0_44 = arith.constant 0 : index
    %79 = vector.load %arg8[%c0_42, %c0_43, %c0_44] : memref<18x18x32xf32, #tpu.memory_space<vmem>>, vector<18x18x32xf32>
    %cst_45 = arith.constant 0.000000e+00 : f32
    %80 = vector.broadcast %cst_45 : f32 to vector<256x32xf32>
    %81 = vector.extract_strided_slice %79 {offsets = [0, 0, 0], sizes = [16, 16, 32], strides = [1, 1, 1]} : vector<18x18x32xf32> to vector<16x16x32xf32>
    %82 = vector.shape_cast %81 : vector<16x16x32xf32> to vector<256x32xf32>
    %83 = arith.truncf %82 : vector<256x32xf32> to vector<256x32xbf16>
    %c0_46 = arith.constant 0 : index
    %c0_47 = arith.constant 0 : index
    %c0_48 = arith.constant 0 : index
    %84 = vector.load %arg4[%c0_46, %c0_47, %c0_48] : memref<9x32x32xbf16, #tpu.memory_space<vmem>>, vector<1x32x32xbf16>
    %85 = vector.shape_cast %84 : vector<1x32x32xbf16> to vector<32x32xbf16>
    %cst_49 = arith.constant dense<0.000000e+00> : vector<256x32xf32>
    %86 = tpu.matmul %83, %85, %cst_49 {dimension_numbers = #tpu.dot_dimension_numbers<[1], [0], [0], [1], [0, 0, 1, 1], [], []>} : vector<256x32xbf16>, vector<32x32xbf16>, vector<256x32xf32> -> vector<256x32xf32>
    %87 = arith.addf %80, %86 : vector<256x32xf32>
    %88 = vector.extract_strided_slice %79 {offsets = [0, 1, 0], sizes = [16, 16, 32], strides = [1, 1, 1]} : vector<18x18x32xf32> to vector<16x16x32xf32>
    %89 = vector.shape_cast %88 : vector<16x16x32xf32> to vector<256x32xf32>
    %90 = arith.truncf %89 : vector<256x32xf32> to vector<256x32xbf16>
    %c1_50 = arith.constant 1 : index
    %c0_51 = arith.constant 0 : index
    %c0_52 = arith.constant 0 : index
    %91 = vector.load %arg4[%c1_50, %c0_51, %c0_52] : memref<9x32x32xbf16, #tpu.memory_space<vmem>>, vector<1x32x32xbf16>
    %92 = vector.shape_cast %91 : vector<1x32x32xbf16> to vector<32x32xbf16>
    %cst_53 = arith.constant dense<0.000000e+00> : vector<256x32xf32>
    %93 = tpu.matmul %90, %92, %cst_53 {dimension_numbers = #tpu.dot_dimension_numbers<[1], [0], [0], [1], [0, 0, 1, 1], [], []>} : vector<256x32xbf16>, vector<32x32xbf16>, vector<256x32xf32> -> vector<256x32xf32>
    %94 = arith.addf %87, %93 : vector<256x32xf32>
    %95 = vector.extract_strided_slice %79 {offsets = [0, 2, 0], sizes = [16, 16, 32], strides = [1, 1, 1]} : vector<18x18x32xf32> to vector<16x16x32xf32>
    %96 = vector.shape_cast %95 : vector<16x16x32xf32> to vector<256x32xf32>
    %97 = arith.truncf %96 : vector<256x32xf32> to vector<256x32xbf16>
    %c2_54 = arith.constant 2 : index
    %c0_55 = arith.constant 0 : index
    %c0_56 = arith.constant 0 : index
    %98 = vector.load %arg4[%c2_54, %c0_55, %c0_56] : memref<9x32x32xbf16, #tpu.memory_space<vmem>>, vector<1x32x32xbf16>
    %99 = vector.shape_cast %98 : vector<1x32x32xbf16> to vector<32x32xbf16>
    %cst_57 = arith.constant dense<0.000000e+00> : vector<256x32xf32>
    %100 = tpu.matmul %97, %99, %cst_57 {dimension_numbers = #tpu.dot_dimension_numbers<[1], [0], [0], [1], [0, 0, 1, 1], [], []>} : vector<256x32xbf16>, vector<32x32xbf16>, vector<256x32xf32> -> vector<256x32xf32>
    %101 = arith.addf %94, %100 : vector<256x32xf32>
    %102 = vector.extract_strided_slice %79 {offsets = [1, 0, 0], sizes = [16, 16, 32], strides = [1, 1, 1]} : vector<18x18x32xf32> to vector<16x16x32xf32>
    %103 = vector.shape_cast %102 : vector<16x16x32xf32> to vector<256x32xf32>
    %104 = arith.truncf %103 : vector<256x32xf32> to vector<256x32xbf16>
    %c3_58 = arith.constant 3 : index
    %c0_59 = arith.constant 0 : index
    %c0_60 = arith.constant 0 : index
    %105 = vector.load %arg4[%c3_58, %c0_59, %c0_60] : memref<9x32x32xbf16, #tpu.memory_space<vmem>>, vector<1x32x32xbf16>
    %106 = vector.shape_cast %105 : vector<1x32x32xbf16> to vector<32x32xbf16>
    %cst_61 = arith.constant dense<0.000000e+00> : vector<256x32xf32>
    %107 = tpu.matmul %104, %106, %cst_61 {dimension_numbers = #tpu.dot_dimension_numbers<[1], [0], [0], [1], [0, 0, 1, 1], [], []>} : vector<256x32xbf16>, vector<32x32xbf16>, vector<256x32xf32> -> vector<256x32xf32>
    %108 = arith.addf %101, %107 : vector<256x32xf32>
    %109 = vector.extract_strided_slice %79 {offsets = [1, 1, 0], sizes = [16, 16, 32], strides = [1, 1, 1]} : vector<18x18x32xf32> to vector<16x16x32xf32>
    %110 = vector.shape_cast %109 : vector<16x16x32xf32> to vector<256x32xf32>
    %111 = arith.truncf %110 : vector<256x32xf32> to vector<256x32xbf16>
    %c4_62 = arith.constant 4 : index
    %c0_63 = arith.constant 0 : index
    %c0_64 = arith.constant 0 : index
    %112 = vector.load %arg4[%c4_62, %c0_63, %c0_64] : memref<9x32x32xbf16, #tpu.memory_space<vmem>>, vector<1x32x32xbf16>
    %113 = vector.shape_cast %112 : vector<1x32x32xbf16> to vector<32x32xbf16>
    %cst_65 = arith.constant dense<0.000000e+00> : vector<256x32xf32>
    %114 = tpu.matmul %111, %113, %cst_65 {dimension_numbers = #tpu.dot_dimension_numbers<[1], [0], [0], [1], [0, 0, 1, 1], [], []>} : vector<256x32xbf16>, vector<32x32xbf16>, vector<256x32xf32> -> vector<256x32xf32>
    %115 = arith.addf %108, %114 : vector<256x32xf32>
    %116 = vector.extract_strided_slice %79 {offsets = [1, 2, 0], sizes = [16, 16, 32], strides = [1, 1, 1]} : vector<18x18x32xf32> to vector<16x16x32xf32>
    %117 = vector.shape_cast %116 : vector<16x16x32xf32> to vector<256x32xf32>
    %118 = arith.truncf %117 : vector<256x32xf32> to vector<256x32xbf16>
    %c5_66 = arith.constant 5 : index
    %c0_67 = arith.constant 0 : index
    %c0_68 = arith.constant 0 : index
    %119 = vector.load %arg4[%c5_66, %c0_67, %c0_68] : memref<9x32x32xbf16, #tpu.memory_space<vmem>>, vector<1x32x32xbf16>
    %120 = vector.shape_cast %119 : vector<1x32x32xbf16> to vector<32x32xbf16>
    %cst_69 = arith.constant dense<0.000000e+00> : vector<256x32xf32>
    %121 = tpu.matmul %118, %120, %cst_69 {dimension_numbers = #tpu.dot_dimension_numbers<[1], [0], [0], [1], [0, 0, 1, 1], [], []>} : vector<256x32xbf16>, vector<32x32xbf16>, vector<256x32xf32> -> vector<256x32xf32>
    %122 = arith.addf %115, %121 : vector<256x32xf32>
    %123 = vector.extract_strided_slice %79 {offsets = [2, 0, 0], sizes = [16, 16, 32], strides = [1, 1, 1]} : vector<18x18x32xf32> to vector<16x16x32xf32>
    %124 = vector.shape_cast %123 : vector<16x16x32xf32> to vector<256x32xf32>
    %125 = arith.truncf %124 : vector<256x32xf32> to vector<256x32xbf16>
    %c6_70 = arith.constant 6 : index
    %c0_71 = arith.constant 0 : index
    %c0_72 = arith.constant 0 : index
    %126 = vector.load %arg4[%c6_70, %c0_71, %c0_72] : memref<9x32x32xbf16, #tpu.memory_space<vmem>>, vector<1x32x32xbf16>
    %127 = vector.shape_cast %126 : vector<1x32x32xbf16> to vector<32x32xbf16>
    %cst_73 = arith.constant dense<0.000000e+00> : vector<256x32xf32>
    %128 = tpu.matmul %125, %127, %cst_73 {dimension_numbers = #tpu.dot_dimension_numbers<[1], [0], [0], [1], [0, 0, 1, 1], [], []>} : vector<256x32xbf16>, vector<32x32xbf16>, vector<256x32xf32> -> vector<256x32xf32>
    %129 = arith.addf %122, %128 : vector<256x32xf32>
    %130 = vector.extract_strided_slice %79 {offsets = [2, 1, 0], sizes = [16, 16, 32], strides = [1, 1, 1]} : vector<18x18x32xf32> to vector<16x16x32xf32>
    %131 = vector.shape_cast %130 : vector<16x16x32xf32> to vector<256x32xf32>
    %132 = arith.truncf %131 : vector<256x32xf32> to vector<256x32xbf16>
    %c7_74 = arith.constant 7 : index
    %c0_75 = arith.constant 0 : index
    %c0_76 = arith.constant 0 : index
    %133 = vector.load %arg4[%c7_74, %c0_75, %c0_76] : memref<9x32x32xbf16, #tpu.memory_space<vmem>>, vector<1x32x32xbf16>
    %134 = vector.shape_cast %133 : vector<1x32x32xbf16> to vector<32x32xbf16>
    %cst_77 = arith.constant dense<0.000000e+00> : vector<256x32xf32>
    %135 = tpu.matmul %132, %134, %cst_77 {dimension_numbers = #tpu.dot_dimension_numbers<[1], [0], [0], [1], [0, 0, 1, 1], [], []>} : vector<256x32xbf16>, vector<32x32xbf16>, vector<256x32xf32> -> vector<256x32xf32>
    %136 = arith.addf %129, %135 : vector<256x32xf32>
    %137 = vector.extract_strided_slice %79 {offsets = [2, 2, 0], sizes = [16, 16, 32], strides = [1, 1, 1]} : vector<18x18x32xf32> to vector<16x16x32xf32>
    %138 = vector.shape_cast %137 : vector<16x16x32xf32> to vector<256x32xf32>
    %139 = arith.truncf %138 : vector<256x32xf32> to vector<256x32xbf16>
    %c8_78 = arith.constant 8 : index
    %c0_79 = arith.constant 0 : index
    %c0_80 = arith.constant 0 : index
    %140 = vector.load %arg4[%c8_78, %c0_79, %c0_80] : memref<9x32x32xbf16, #tpu.memory_space<vmem>>, vector<1x32x32xbf16>
    %141 = vector.shape_cast %140 : vector<1x32x32xbf16> to vector<32x32xbf16>
    %cst_81 = arith.constant dense<0.000000e+00> : vector<256x32xf32>
    %142 = tpu.matmul %139, %141, %cst_81 {dimension_numbers = #tpu.dot_dimension_numbers<[1], [0], [0], [1], [0, 0, 1, 1], [], []>} : vector<256x32xbf16>, vector<32x32xbf16>, vector<256x32xf32> -> vector<256x32xf32>
    %143 = arith.addf %136, %142 : vector<256x32xf32>
    %c0_82 = arith.constant 0 : index
    %c0_83 = arith.constant 0 : index
    %144 = vector.load %arg5[%c0_82, %c0_83] : memref<1x32xf32, #tpu.memory_space<vmem>>, vector<1x32xf32>
    %145 = vector.broadcast %144 : vector<1x32xf32> to vector<256x32xf32>
    %146 = arith.addf %143, %145 : vector<256x32xf32>
    %147 = vector.extract_strided_slice %1 {offsets = [1, 1, 0], sizes = [16, 16, 32], strides = [1, 1, 1]} : vector<18x18x32xf32> to vector<16x16x32xf32>
    %148 = vector.shape_cast %147 : vector<16x16x32xf32> to vector<256x32xf32>
    %149 = arith.addf %146, %148 : vector<256x32xf32>
    %c1_84 = arith.constant 1 : index
    %150 = memref.load %arg6[%c1_84] : memref<2xf32, #tpu.memory_space<smem>>
    %cst_85 = arith.constant 0.000000e+00 : f32
    %151 = vector.broadcast %cst_85 : f32 to vector<256x32xf32>
    %152 = arith.cmpf oge, %149, %151 : vector<256x32xf32>
    %153 = vector.broadcast %150 : f32 to vector<256x32xf32>
    %154 = arith.mulf %153, %149 : vector<256x32xf32>
    %155 = arith.select %152, %149, %154 : vector<256x32xi1>, vector<256x32xf32>
    %c0_86 = arith.constant 0 : index
    %c0_87 = arith.constant 0 : index
    %c0_88 = arith.constant 0 : index
    %156 = vector.load %arg7[%c0_86, %c0_87, %c0_88] : memref<1x256x32xf32, #tpu.memory_space<vmem>>, vector<1x256x32xf32>
    %157 = vector.shape_cast %156 : vector<1x256x32xf32> to vector<256x32xf32>
    %158 = vector.shape_cast %155 : vector<256x32xf32> to vector<1x256x32xf32>
    tpu.vector_store %arg7[%c0_86, %c0_87, %c0_88], %158 {strides = array<i32>} : memref<1x256x32xf32, #tpu.memory_space<vmem>>, vector<1x256x32xf32>,
    return
  }
  func.func @transform_0(%arg0: i32) -> (i32, i32, i32, i32) {
    %c0_i32 = arith.constant 0 : i32
    %c0_i32_0 = arith.constant 0 : i32
    %c0_i32_1 = arith.constant 0 : i32
    %c0_i32_2 = arith.constant 0 : i32
    return %arg0, %c0_i32, %c0_i32_0, %c0_i32_1 : i32, i32, i32, i32
  }
  func.func @transform_1(%arg0: i32) -> (i32, i32, i32) {
    %c0_i32 = arith.constant 0 : i32
    %c0_i32_0 = arith.constant 0 : i32
    %c0_i32_1 = arith.constant 0 : i32
    %c0_i32_2 = arith.constant 0 : i32
    return %c0_i32, %c0_i32_0, %c0_i32_1 : i32, i32, i32
  }
  func.func @transform_2(%arg0: i32) -> (i32, i32) {
    %c0_i32 = arith.constant 0 : i32
    %c0_i32_0 = arith.constant 0 : i32
    %c0_i32_1 = arith.constant 0 : i32
    return %c0_i32, %c0_i32_0 : i32, i32
  }
  func.func @transform_3(%arg0: i32) -> (i32, i32, i32) {
    %c0_i32 = arith.constant 0 : i32
    %c0_i32_0 = arith.constant 0 : i32
    %c0_i32_1 = arith.constant 0 : i32
    %c0_i32_2 = arith.constant 0 : i32
    return %c0_i32, %c0_i32_0, %c0_i32_1 : i32, i32, i32
  }
  func.func @transform_4(%arg0: i32) -> (i32, i32) {
    %c0_i32 = arith.constant 0 : i32
    %c0_i32_0 = arith.constant 0 : i32
    %c0_i32_1 = arith.constant 0 : i32
    return %c0_i32, %c0_i32_0 : i32, i32
  }
  func.func @transform_5(%arg0: i32) -> i32 {
    %c0_i32 = arith.constant 0 : i32
    %c0_i32_0 = arith.constant 0 : i32
    return %c0_i32 : i32
  }
  func.func @transform_6(%arg0: i32) -> (i32, i32, i32) {
    %c0_i32 = arith.constant 0 : i32
    %c0_i32_0 = arith.constant 0 : i32
    %c0_i32_1 = arith.constant 0 : i32
    return %arg0, %c0_i32, %c0_i32_0 : i32, i32, i32
  }
}

</mosaic_0001>

<bundles_post_ra>
// kernel: tpu_custom_call.1
= control target key start
LH: loop header
LB: loop body
LE: loop exit
PB: predicated region body
PF: predicated region fallthrough
CT: control target
= control target key end

     0   :  { %11 = vsyncpa [#allocation4], 0  ;;  %s7062_s21 = smov 0   ;;  %s10521_s0 = inlined_call_operand.vmem [shape: f32[2,18,18,32], index: 0, kind: input, shape index: {}]   ;;  %s10522_s1 = inlined_call_operand.vmem [shape: bf16[9,32,32], index: 1, kind: input, shape index: {}]   ;;  %s10523_s2 = inlined_call_operand.vmem [shape: f32[1,32], index: 2, kind: input, shape index: {}]   ;;  %s10524_s3 = inlined_call_operand.vmem [shape: bf16[9,32,32], index: 3, kind: input, shape index: {}]   ;;  %s10525_s4 = inlined_call_operand.vmem [shape: f32[1,32], index: 4, kind: input, shape index: {}]   ;;  %s10526_s5 = inlined_call_operand.vmem [shape: f32[2], index: 5, kind: input, shape index: {}]   ;;  %s10527_s6 = inlined_call_operand.vmem [shape: f32[2,256,32], index: 6, kind: output, shape index: {}]  }
   0x1 LB: > { %s7068_s22 = sadd.s32 4294967295, %s7023_s21   ;;  %p5567_p0 = scmp.ge.s32.totalorder %s7023_s21, 1  ;;  %s7023_s21 = sphi %s7062_s21, %s17_s21  }
   0x2   : > { %p179_p1 = scmp.lt.s32.totalorder %s7023_s21, 3  ;;  %s204_s25 = sshll.u32 %s10526_s5, 4  ;;  %s205_s25 = int_to_ptr.vmem [resolvable:$true] %s204_s25 }
   0x3   : > { %p6950_p3 = scmp.eq.s32.totalorder %s7068_s22, 0  ;;  %s6998_s27 = scalar_lea.vmem %s205_s25, 16 }
   0x4   : > { %p7075_p2 = pnand %p5567_p0, %p179_p1  ;;  %p6999_p6 = scmp.ne.s32.totalorder %s205_s25, %s6998_s27 }
   0x5   : > { %p7006_p10 = scmp.lt.s32.totalorder %s205_s25, %s205_s25  ;;  %p7007_p11 = scmp.lt.s32.totalorder %s6998_s27, %s6998_s27 }
   0x6   : > { %p6946_p4 = pneg %p7075_p2 }
   0x7   : > { %p7008_p12 = por %p7007_p11, %p7006_p10 }
   0x8   : > { %p6947_p5 = pnand %p6950_p3, %p6946_p4 }
   0xa   : > { %p7000_p7 = pneg %p6947_p5 }
   0xc   : > { %p7001_p8 = pnand %p7000_p7, %p6999_p6 }
   0xe   : > { %p7002_p9 = pneg %p7001_p8 }
  0x10   : > { %p7009_p13 = pnand %p7008_p12, %p7002_p9 }
  0x12   : > { %7012 = shalt.err (!%p7009_p13)
}
  0x13   : > { %s7025_s28 = smov [#allocation3]   ;;  %225 = sbr.rel (%p7075_p2) target bundleno = 1062 (0x426), region = 44 }
  0x14   : > { %6949 = dma.vmem_to_smem (!%p6947_p5), %s205_s25, 16, %s7025_s28, [#allocation4]  }
  0x18   : > { %7018 = dma.done.wait (%p6950_p3), [#allocation4], 16  }
  0x19   : > { %7020 = vsyncadd (%p6950_p3), [#allocation4], 4294967280 }
  0x1a   : > { %231 = sfence }
  0x1b   : > { %v6962_v0 = vld [vmem:[%s10522_s1 + $0x18] sm:$0xff]   ;;  %p256_p0 = scmp.lt.s32.totalorder %s7068_s22, 1  ;;  %v6963_v1 = vld [vmem:[%s10522_s1 + $0x8] sm:$0xff]   ;;  %v6964_v2 = vld [vmem:[%s10522_s1 + $0x10] sm:$0xff]   ;;  %vm389_vm0 = vcmask 1046528   ;;  %vm535_vm1 = vcmask 261120  }
  0x1c   : > { %6293 = vmatprep.subr.bf16.mxu0 %v6962_v0  ;;  %6329 = vmatprep.subr.bf16.mxu1 %v6963_v1  ;;  %v6965_v3 = vld [vmem:[%s10522_s1] sm:$0xff]   ;;  %v6966_v4 = vld [vmem:[%s10522_s1 + $0x28] sm:$0xff]   ;;  %v6968_v5 = vld [vmem:[%s10522_s1 + $0x38] sm:$0xff]   ;;  %vm966_vm2 = vcmask 1045504   ;;  %vm2810_vm3 = vcmask 254976   ;;  %s5965_s19 = sld [smem:[#allocation3 + $0x1]] }
  0x1d   : > { %s11118_s22 = smov (!%p256_p0, %s7068_s22), 1  ;;  %6294 = vmatpush3.bf16.msra.mxu0 %v6962_v0  ;;  %6330 = vmatpush3.bf16.msra.mxu1 %v6963_v1  ;;  %v6967_v39 = vld [vmem:[%s10522_s1 + $0x20] sm:$0xff]  }
  0x1e   : > { %6295 = vmatprep.subr.bf16.mxu0 %v6964_v2  ;;  %s6941_s13 = smul.u32 432, %s11118_s22  ;;  %6331 = vmatprep.subr.bf16.mxu1 %v6965_v3 }
  0x20   : > { %s7113_s18 = scalar_lea.vmem %s10521_s0, %s6941_s13  ;;  %s2710_s13 = sld [smem:[#allocation3]] }
  0x21   : > { %6296 = vmatpush3.bf16.msra.mxu0 %v6964_v2  ;;  %v7119_v6 = vld [vmem:[%s7113_s18] sm:$0xff]  ;;  %v7122_v7 = vld [vmem:[%s7113_s18 + $0x8] sm:$0xff]  ;;  %v7125_v8 = vld [vmem:[%s7113_s18 + $0x10] sm:$0x3]  ;;  %6332 = vmatpush3.bf16.msra.mxu1 %v6965_v3 }
  0x22   : > { %10645 = vst [vmem:[#allocation6_spill] sm:$0xff] %v7119_v6  ;;  %10646 = vst [vmem:[#allocation7_spill] sm:$0xff] %v7122_v7  ;;  %v390_v9 = vrot.slane %v7119_v6, 1  ;;  %v391_v10 = vrot.slane %v7122_v7, 1  ;;  %v393_v11 = vrot.slane %v7125_v8, 1  ;;  %6365 = vmatprep.subr.bf16.mxu0 %v6966_v4  ;;  %v7131_v12 = vld [vmem:[%s7113_s18 + $0x18] sm:$0xff]  ;;  %v321_v14 = vpack.c.bf16 %v7122_v7, %v7119_v6  ;;  %6401 = vmatprep.subr.bf16.mxu1 %v6968_v5 }
  0x23   : > { %10647 = vst [vmem:[#allocation8_spill] sm:$0xff] %v7125_v8  ;;  %v7134_v13 = vld [vmem:[%s7113_s18 + $0x20] sm:$0xff]  ;;  %v7139_v15 = vld [vmem:[%s7113_s18 + $0x28] sm:$0x3]  ;;  %v395_v16 = vrot.slane %v7131_v12, 1  ;;  %v7143_v17 = vld [vmem:[%s7113_s18 + $0x30] sm:$0xff] }
  0x24   : > { %10648 = vst [vmem:[#allocation9_spill] sm:$0xff] %v7143_v17  ;;  %v392_v18 = vsel %vm389_vm0, %v390_v9, %v391_v10  ;;  %v394_v19 = vsel %vm389_vm0, %v391_v10, %v393_v11  ;;  %v396_v20 = vrot.slane %v7134_v13, 1  ;;  %v398_v21 = vrot.slane %v7139_v15, 1  ;;  %v7150_v22 = vld [vmem:[%s7113_s18 + $0x38] sm:$0xff]  ;;  %v7153_v23 = vld [vmem:[%s7113_s18 + $0x40] sm:$0x3]  ;;  %6333 = vmatprep.mubr.msk.bf16.mxu1 %vm535_vm1, %v321_v14 }
  0x25   : > { %10649 = vst [vmem:[#allocation10_spill] sm:$0xff] %v7150_v22  ;;  %10650 = vst [vmem:[#allocation11_spill] sm:$0xff] %v7153_v23  ;;  %v502_v24 = vpack.c.bf16 %v394_v19, %v392_v18  ;;  %v7157_v25 = vld [vmem:[%s7113_s18 + $0x48] sm:$0xff]  ;;  %v7160_v26 = vld [vmem:[%s7113_s18 + $0x50] sm:$0xff]  ;;  %v7173_v30 = vpack.c.bf16 %v7134_v13, %v7131_v12  ;;  %v400_v31 = vrot.slane %v7143_v17, 1  ;;  %v401_v35 = vrot.slane %v7150_v22, 1 }
  0x26   : > { %v7163_v27 = vld [vmem:[%s7113_s18 + $0x58] sm:$0x3]  ;;  %v7166_v28 = vsel %vm389_vm0, %v395_v16, %v396_v20  ;;  %v7169_v29 = vsel %vm389_vm0, %v396_v20, %v398_v21  ;;  %v7177_v32 = vld [vmem:[%s7113_s18 + $0x60] sm:$0xff]  ;;  %v7180_v33 = vld [vmem:[%s7113_s18 + $0x68] sm:$0xff]  ;;  %v403_v36 = vrot.slane %v7153_v23, 1  ;;  %v7191_v37 = vpack.c.bf16 %v7150_v22, %v7143_v17 }
  0x27   : > { %10651 = vst [vmem:[#allocation12_spill] sm:$0xff] %v7166_v28  ;;  %10652 = vst [vmem:[#allocation13_spill] sm:$0xff] %v7169_v29  ;;  %6297 = vmatprep.mubr.msk.bf16.mxu0 %vm535_vm1, %v502_v24  ;;  %v7185_v34 = vpack.c.bf16 %v7169_v29, %v7166_v28  ;;  %v7194_v38 = vld [vmem:[%s7113_s18 + $0x70] sm:$0x3]  ;;  %6334 = vmatmul.mubr.msk.bf16.vlgmr.msra.gmra.mxu1 %vm535_vm1, %v7173_v30  ;;  %v405_v40 = vrot.slane %v7157_v25, 1  ;;  %v406_v41 = vrot.slane %v7160_v26, 1 }
  0x28   : > { %10653 = vst [vmem:[#allocation14_spill] sm:$0xff] %v7173_v30  ;;  %10655 = vst [vmem:[#allocation16_spill] sm:$0xff] %v7191_v37  ;;  %v408_v42 = vrot.slane %v7163_v27, 1  ;;  %v7207_v43 = vsel %vm389_vm0, %v400_v31, %v401_v35  ;;  %v7210_v44 = vsel %vm389_vm0, %v401_v35, %v403_v36  ;;  %6337 = vmatprep.mubr.msk.bf16.mxu1 %vm535_vm1, %v7191_v37  ;;  %v410_v45 = vrot.slane %v7177_v32, 1  ;;  %v7217_v47 = vld [vmem:[%s7113_s18 + $0x78] sm:$0xff]  ;;  %v7220_v48 = vld [vmem:[%s7113_s18 + $0x80] sm:$0xff] }
  0x29   : > { %10654 = vst [vmem:[#allocation15_spill] sm:$0xff] %v7185_v34  ;;  %6298 = vmatmul.mubr.msk.bf16.vlgmr.msra.gmra.mxu0 %vm535_vm1, %v7185_v34  ;;  %10656 = vst [vmem:[#allocation17_spill] sm:$0xff] %v7207_v43  ;;  %v411_v46 = vrot.slane %v7180_v33, 1  ;;  %v7223_v49 = vld [vmem:[%s7113_s18 + $0x88] sm:$0x3]  ;;  %v7227_v50 = vpack.c.bf16 %v7210_v44, %v7207_v43  ;;  %v7230_v51 = vsel %vm389_vm0, %v405_v40, %v406_v41  ;;  %v413_v53 = vrot.slane %v7194_v38, 1 }
  0x2a   : > { %10657 = vst [vmem:[#allocation18_spill] sm:$0xff] %v7210_v44  ;;  %6366 = vmatpush3.bf16.msra.mxu0 %v6966_v4  ;;  %10659 = vst [vmem:[#allocation20_spill] sm:$0xff] %v7230_v51  ;;  %v7233_v52 = vsel %vm389_vm0, %v406_v41, %v408_v42  ;;  %v7237_v54 = vld [vmem:[%s7113_s18 + $0x90] sm:$0xff]  ;;  %v7240_v55 = vld [vmem:[%s7113_s18 + $0x98] sm:$0xff]  ;;  %6402 = vmatpush3.bf16.msra.mxu1 %v6968_v5  ;;  %v7244_v56 = vpack.c.bf16 %v7160_v26, %v7157_v25  ;;  %v415_v60 = vrot.slane %v7217_v47, 1 }
  0x2b   : > { %10658 = vst [vmem:[#allocation19_spill] sm:$0xff] %v7227_v50  ;;  %10660 = vst [vmem:[#allocation21_spill] sm:$0xff] %v7233_v52  ;;  %v7247_v57 = vsel %vm389_vm0, %v410_v45, %v411_v46  ;;  %v7250_v58 = vld [vmem:[%s7113_s18 + $0xa0] sm:$0x3]  ;;  %6367 = vmatprep.subr.bf16.mxu0 %v6967_v39  ;;  %6301 = vmatprep.mubr.msk.bf16.mxu0 %vm535_vm1, %v7227_v50  ;;  %v7255_v59 = vsel %vm389_vm0, %v411_v46, %v413_v53  ;;  %v416_v61 = vrot.slane %v7220_v48, 1  ;;  %v7271_v3 = vld [vmem:[%s7113_s18 + $0xa8] sm:$0xff] }
  0x2c   : > { %10661 = vst [vmem:[#allocation22_spill] sm:$0xff] %v7244_v56  ;;  %10662 = vst [vmem:[#allocation23_spill] sm:$0xff] %v7247_v57  ;;  %v418_v62 = vrot.slane %v7223_v49, 1  ;;  %v7262_v63 = vpack.c.bf16 %v7233_v52, %v7230_v51  ;;  %v7266_v0 = vpack.c.bf16 %v7180_v33, %v7177_v32  ;;  %v420_v1 = vrot.slane %v7237_v54, 1  ;;  %v7274_v4 = vld [vmem:[%s7113_s18 + $0xb0] sm:$0xff]  ;;  %v7285_v11 = vld [vmem:[%s7113_s18 + $0xc0] sm:$0xff] }
  0x2d   : > { %10663 = vst [vmem:[#allocation24_spill] sm:$0xff] %v7255_v59  ;;  %v421_v2 = vrot.slane %v7240_v55, 1  ;;  %v7278_v5 = vpack.c.bf16 %v7255_v59, %v7247_v57  ;;  %v423_v9 = vrot.slane %v7250_v58, 1  ;;  %v7282_v10 = vld [vmem:[%s7113_s18 + $0xb8] sm:$0x3]  ;;  %v7288_v14 = vld [vmem:[%s7113_s18 + $0xc8] sm:$0xff]  ;;  %v7304_v24 = vsel %vm389_vm0, %v415_v60, %v416_v61 }
  0x2e   : > { %10664 = vst [vmem:[#allocation25_spill] sm:$0xff] %v7262_v63  ;;  %10665 = vst [vmem:[#allocation26_spill] sm:$0xff] %v7266_v0  ;;  %6368 = vmatpush3.bf16.msra.mxu0 %v6967_v39  ;;  %v7293_v19 = vld [vmem:[%s7113_s18 + $0xd0] sm:$0x3]  ;;  %v7296_v20 = vld [vmem:[%s7113_s18 + $0xd8] sm:$0xff]  ;;  %v7307_v31 = vsel %vm389_vm0, %v416_v61, %v418_v62  ;;  %v425_v36 = vrot.slane %v7271_v3, 1  ;;  %v7371_v28 = vpack.c.bf16 %v7240_v55, %v7237_v54 }
  0x2f   : > { %10666 = vst [vmem:[#allocation27_spill] sm:$0xff] %v7278_v5  ;;  %v7299_v21 = vld [vmem:[%s7113_s18 + $0xe0] sm:$0xff]  ;;  %6338 = vmatmul.mubr.msk.bf16.gmra.mxu1 %vm535_vm1, %v7244_v56  ;;  %10667 = vst [vmem:[#allocation28_spill] sm:$0xff] %v7304_v24  ;;  %v7310_v35 = vsel %vm389_vm0, %v420_v1, %v421_v2  ;;  %v7314_v39 = vld [vmem:[%s7113_s18 + $0xe8] sm:$0x3]  ;;  %v426_v40 = vrot.slane %v7274_v4, 1  ;;  %v7333_v60 = vsel %vm389_vm0, %v421_v2, %v423_v9 }
  0x30   : > { %10668 = vst [vmem:[#allocation29_spill] sm:$0xff] %v7307_v31  ;;  %10669 = vst [vmem:[#allocation30_spill] sm:$0xff] %v7310_v35  ;;  %6341 = vmatprep.mubr.msk.bf16.mxu1 %vm535_vm1, %v7266_v0  ;;  %v428_v41 = vrot.slane %v7282_v10, 1  ;;  %v430_v42 = vrot.slane %v7285_v11, 1  ;;  %v431_v45 = vrot.slane %v7288_v14, 1  ;;  %v7325_v46 = vld [vmem:[%s7113_s18 + $0xf0] sm:$0xff]  ;;  %v7352_v2 = vpack.c.bf16 %v7220_v48, %v7217_v47 }
  0x31   : > { %6302 = vmatmul.mubr.msk.bf16.gmra.mxu0 %vm535_vm1, %v7262_v63  ;;  %v7328_v53 = vld [vmem:[%s7113_s18 + $0xf8] sm:$0xff]  ;;  %10670 = vst [vmem:[#allocation31_spill] sm:$0xff] %v7333_v60  ;;  %v433_v61 = vrot.slane %v7293_v19, 1  ;;  %v435_v62 = vrot.slane %v7296_v20, 1  ;;  %v436_v1 = vrot.slane %v7299_v21, 1  ;;  %v7342_v18 = vld [vmem:[%s7113_s18 + $0x108] sm:$0xff]  ;;  %v7363_v29 = vpack.c.bf16 %v7307_v31, %v7304_v24 }
  0x32   : > { %6305 = vmatprep.mubr.msk.bf16.mxu0 %vm535_vm1, %v7278_v5  ;;  %v7339_v16 = vld [vmem:[%s7113_s18 + $0x100] sm:$0x3]  ;;  %v6969_v52 = vld [vmem:[%s10522_s1 + $0x30] sm:$0xff]   ;;  %10671 = vst [vmem:[#allocation32_spill] sm:$0xff] %v7352_v2  ;;  %v438_v9 = vrot.slane %v7314_v39, 1  ;;  %v7358_v51 = vld [vmem:[%s10522_s1 + $0x48] sm:$0xff]   ;;  %v7367_v44 = vpack.c.bf16 %v7333_v60, %v7310_v35  ;;  %v7386_v31 = vsel %vm389_vm0, %v426_v40, %v428_v41 }
  0x33   : > { %v7348_v59 = vld [vmem:[%s7113_s18 + $0x110] sm:$0xff]  ;;  %6403 = vmatprep.subr.bf16.mxu1 %v6969_v52  ;;  %10672 = vst [vmem:[#allocation33_spill] sm:$0xff] %v7358_v51  ;;  %v975_v57 = vrot.slane %v7139_v15, 2  ;;  %10673 = vst [vmem:[#allocation34_spill] sm:$0xff] %v7363_v29  ;;  %v7374_v43 = vld [vmem:[%s7113_s18 + $0x118] sm:$0x3]  ;;  %v7383_v15 = vsel %vm389_vm0, %v425_v36, %v426_v40  ;;  %6437 = vmatprep.subr.bf16.mxu0 %v7358_v51  ;;  %v7400_v36 = vsel %vm389_vm0, %v430_v42, %v431_v45 }
  0x34   : > { %10674 = vst [vmem:[#allocation35_spill] sm:$0xff] %v7367_v44  ;;  %10675 = vst [vmem:[#allocation36_spill] sm:$0xff] %v7371_v28  ;;  %v7377_v5 = vld [vmem:[%s7113_s18 + $0x120] sm:$0xff]  ;;  %v7380_v63 = vld [vmem:[%s7113_s18 + $0x130] sm:$0x3]  ;;  %6404 = vmatpush3.bf16.msra.mxu1 %v6969_v52  ;;  %v440_v60 = vrot.slane %v7325_v46, 1  ;;  %v7403_v40 = vsel %vm389_vm0, %v431_v45, %v433_v61  ;;  %v7413_v0 = vsel %vm389_vm0, %v435_v62, %v436_v1 }
  0x35   : > { %10676 = vst [vmem:[#allocation37_spill] sm:$0xff] %v7383_v15  ;;  %10677 = vst [vmem:[#allocation38_spill] sm:$0xff] %v7386_v31  ;;  %v441_v24 = vrot.slane %v7328_v53, 1  ;;  %v7391_v35 = vld [vmem:[%s7113_s18 + $0x128] sm:$0xff]  ;;  %v7397_v52 = vld [vmem:[%s10522_s1 + $0x58] sm:$0xff]   ;;  %v443_v41 = vrot.slane %v7339_v16, 1  ;;  %v7416_v51 = vsel %vm389_vm0, %v436_v1, %v438_v9  ;;  %v7433_v62 = vpack.c.bf16 %v7274_v4, %v7271_v3 }
  0x36   : > { %10678 = vst [vmem:[#allocation39_spill] sm:$0xff] %v7397_v52  ;;  %10679 = vst [vmem:[#allocation40_spill] sm:$0xff] %v7400_v36  ;;  %v445_v50 = vrot.slane %v7342_v18, 1  ;;  %v7408_v34 = vld [vmem:[%s7113_s18 + $0x138] sm:$0xff]  ;;  %v446_v42 = vrot.slane %v7348_v59, 1  ;;  %v448_v45 = vrot.slane %v7374_v43, 1  ;;  %6473 = vmatprep.subr.bf16.mxu1 %v7397_v52  ;;  %v7453_v37 = vpack.c.bf16 %v7403_v40, %v7400_v36 }
  0x37   : > { %10680 = vst [vmem:[#allocation41_spill] sm:$0xff] %v7403_v40  ;;  %6342 = vmatmul.mubr.msk.bf16.gmra.mxu1 %vm535_vm1, %v7352_v2  ;;  %10681 = vst [vmem:[#allocation42_spill] sm:$0xff] %v7413_v0  ;;  %v7421_v61 = vld [vmem:[%s7113_s18 + $0x140] sm:$0xff]  ;;  %v7424_v56 = vld [vmem:[%s7113_s18 + $0x148] sm:$0x3]  ;;  %v450_v1 = vrot.slane %v7377_v5, 1  ;;  %v7443_v2 = vpack.c.bf16 %v7386_v31, %v7383_v15  ;;  %v7457_v30 = vpack.c.bf16 %v7416_v51, %v7413_v0 }
  0x38   : > { %10682 = vst [vmem:[#allocation43_spill] sm:$0xff] %v7416_v51  ;;  %10683 = vst [vmem:[#allocation44_spill] sm:$0xff] %v7424_v56  ;;  %6345 = vmatprep.mubr.msk.bf16.mxu1 %vm535_vm1, %v7371_v28  ;;  %v7437_v9 = vld [vmem:[%s7113_s18 + $0x150] sm:$0xff]  ;;  %v451_v28 = vrot.slane %v7391_v35, 1  ;;  %v453_v52 = vrot.slane %v7380_v63, 1  ;;  %v7461_v31 = vpack.c.bf16 %v7299_v21, %v7296_v20  ;;  %v7464_v15 = vsel %vm389_vm0, %v440_v60, %v441_v24 }
  0x39   : > { %6306 = vmatmul.mubr.msk.bf16.gmra.mxu0 %vm535_vm1, %v7363_v29  ;;  %v7447_v29 = vpack.c.bf16 %v7288_v14, %v7285_v11  ;;  %10684 = vst [vmem:[#allocation45_spill] sm:$0xff] %v7453_v37  ;;  %10685 = vst [vmem:[#allocation46_spill] sm:$0xff] %v7464_v15  ;;  %v7470_v23 = vld [vmem:[%s7113_s18 + $0x160] sm:$0x3]  ;;  %v7473_v22 = vsel %vm389_vm0, %v441_v24, %v443_v41  ;;  %v7476_v40 = vsel %vm389_vm0, %v445_v50, %v446_v42 }
  0x3a   : > { %6309 = vmatprep.mubr.msk.bf16.mxu0 %vm535_vm1, %v7367_v44  ;;  %v7467_v44 = vld [vmem:[%s7113_s18 + $0x158] sm:$0xff]  ;;  %10686 = vst [vmem:[#allocation47_spill] sm:$0xff] %v7473_v22  ;;  %10687 = vst [vmem:[#allocation48_spill] sm:$0xff] %v7476_v40  ;;  %v7479_v51 = vsel %vm389_vm0, %v446_v42, %v448_v45  ;;  %v455_v0 = vrot.slane %v7408_v34, 1  ;;  %v7484_v36 = vpack.c.bf16 %v7328_v53, %v7325_v46  ;;  %v456_v17 = vrot.slane %v7421_v61, 1 }
  0x3b   : > { %10688 = vst [vmem:[#allocation49_spill] sm:$0xff] %v7479_v51  ;;  %v7488_v60 = vpack.c.bf16 %v7348_v59, %v7342_v18  ;;  %v458_v24 = vrot.slane %v7424_v56, 1  ;;  %v7493_v50 = vsel %vm389_vm0, %v450_v1, %v451_v28  ;;  %v7496_v41 = vsel %vm389_vm0, %v451_v28, %v453_v52 }
  0x3c   : > { %10689 = vst [vmem:[#allocation50_spill] sm:$0xff] %v7493_v50  ;;  %10690 = vst [vmem:[#allocation51_spill] sm:$0xff] %v7496_v41  ;;  %v460_v42 = vrot.slane %v7437_v9, 1  ;;  %v461_v45 = vrot.slane %v7467_v44, 1  ;;  %v7502_v8 = vpack.c.bf16 %v7473_v22, %v7464_v15  ;;  %v7506_v7 = vpack.c.bf16 %v7479_v51, %v7476_v40 }
  0x3d   : > { %v10691_v6 = vrot.slane %v7134_v13, 2  ;;  %v10692_v1 = vrot.slane %v7131_v12, 2  ;;  %v7520_v22 = vpack.c.bf16 %v7391_v35, %v7377_v5  ;;  %v7524_v51 = vpack.c.bf16 %v7421_v61, %v7408_v34 }
  0x3e   : > { %v463_v40 = vrot.slane %v7470_v23, 1  ;;  %v7538_v13 = vsel %vm389_vm0, %v455_v0, %v456_v17  ;;  %v992_v0 = vrot.slane %v7217_v47, 2  ;;  %v993_v15 = vrot.slane %v7220_v48, 2 }
  0x3f   : > { %v974_v56 = vsel %vm966_vm2, %v10692_v1, %v10691_v6  ;;  %v10693_v28 = vmov %v10691_v6  ;;  %6346 = vmatmul.mubr.msk.bf16.gmra.mxu1 %vm535_vm1, %v7433_v62  ;;  %v7535_v6 = vpack.c.bf16 %v7496_v41, %v7493_v50  ;;  %10694 = vst [vmem:[#allocation52_spill] sm:$0xff] %v7538_v13  ;;  %v982_v1 = vrot.slane %v7157_v25, 2 }
  0x40   : > { %v976_v52 = vsel %vm966_vm2, %v10693_v28, %v975_v57  ;;  %6349 = vmatprep.mubr.msk.bf16.mxu1 %vm535_vm1, %v7447_v29  ;;  %v7541_v57 = vsel %vm389_vm0, %v456_v17, %v458_v24  ;;  %v985_v28 = vrot.slane %v7163_v27, 2  ;;  %v988_v41 = vrot.slane %v7180_v33, 2 }
  0x41   : > { %v7527_v12 = vpack.c.bf16 %v976_v52, %v974_v56  ;;  %6310 = vmatmul.mubr.msk.bf16.gmra.mxu0 %vm535_vm1, %v7443_v2  ;;  %10695 = vst [vmem:[#allocation53_spill] sm:$0xff] %v7541_v57  ;;  %v983_v56 = vrot.slane %v7160_v26, 2  ;;  %v987_v52 = vrot.slane %v7177_v32, 2  ;;  %v7551_v50 = vsel %vm389_vm0, %v460_v42, %v461_v45 }
  0x42   : > { %6313 = vmatprep.mubr.msk.bf16.mxu0 %vm535_vm1, %v7453_v37  ;;  %10696 = vst [vmem:[#allocation54_spill] sm:$0xff] %v7551_v50  ;;  %v7555_v17 = vpack.c.bf16 %v7467_v44, %v7437_v9  ;;  %v990_v25 = vrot.slane %v7194_v38, 2  ;;  %v7560_v24 = vsel %vm389_vm0, %v461_v45, %v463_v40  ;;  %v995_v37 = vrot.slane %v7223_v49, 2 }
  0x43   : > { %10697 = vst [vmem:[#allocation55_spill] sm:$0xff] %v7560_v24  ;;  %v984_v26 = vsel %vm966_vm2, %v982_v1, %v983_v56  ;;  %v986_v27 = vsel %vm966_vm2, %v983_v56, %v985_v28  ;;  %v989_v32 = vsel %vm966_vm2, %v987_v52, %v988_v41  ;;  %v997_v47 = vrot.slane %v7237_v54, 2 }
  0x44   : > { %v7565_v33 = vpack.c.bf16 %v986_v27, %v984_v26  ;;  %v991_v42 = vsel %vm966_vm2, %v988_v41, %v990_v25  ;;  %v998_v40 = vrot.slane %v7240_v55, 2  ;;  %v1000_v45 = vrot.slane %v7250_v58, 2 }
  0x45   : > { %v7570_v38 = vpack.c.bf16 %v991_v42, %v989_v32  ;;  %v994_v1 = vsel %vm966_vm2, %v992_v0, %v993_v15  ;;  %v996_v56 = vsel %vm966_vm2, %v993_v15, %v995_v37  ;;  %v1002_v28 = vrot.slane %v7271_v3, 2 }
  0x46   : > { %v1003_v41 = vrot.slane %v7274_v4, 2  ;;  %v7581_v48 = vpack.c.bf16 %v996_v56, %v994_v1  ;;  %v999_v49 = vsel %vm966_vm2, %v997_v47, %v998_v40  ;;  %v1001_v54 = vsel %vm966_vm2, %v998_v40, %v1000_v45 }
  0x47   : > { %6350 = vmatmul.mubr.msk.bf16.gmra.mxu1 %vm535_vm1, %v7461_v31  ;;  %v1005_v55 = vrot.slane %v7282_v10, 2  ;;  %v7590_v37 = vpack.c.bf16 %v1001_v54, %v999_v49  ;;  %v1007_v3 = vrot.slane %v7285_v11, 2  ;;  %v1008_v4 = vrot.slane %v7288_v14, 2 }
  0x48   : > { %6353 = vmatprep.mubr.msk.bf16.mxu1 %vm535_vm1, %v7484_v36  ;;  %v1004_v58 = vsel %vm966_vm2, %v1002_v28, %v1003_v41  ;;  %v1010_v10 = vrot.slane %v7293_v19, 2  ;;  %v1012_v52 = vrot.slane %v7296_v20, 2  ;;  %v1013_v25 = vrot.slane %v7299_v21, 2 }
  0x49   : > { %6314 = vmatmul.mubr.msk.bf16.gmra.mxu0 %vm535_vm1, %v7457_v30  ;;  %v1006_v15 = vsel %vm966_vm2, %v1003_v41, %v1005_v55  ;;  %v1009_v26 = vsel %vm966_vm2, %v1007_v3, %v1008_v4  ;;  %v1015_v27 = vrot.slane %v7314_v39, 2  ;;  %v1017_v11 = vrot.slane %v7325_v46, 2  ;;  %v10698_v55 = vld [vmem:[#allocation44_spill] sm:$0xff] }
  0x4a   : > { %6317 = vmatprep.mubr.msk.bf16.mxu0 %vm535_vm1, %v7502_v8  ;;  %v7601_v0 = vpack.c.bf16 %v1006_v15, %v1004_v58  ;;  %v1011_v14 = vsel %vm966_vm2, %v1008_v4, %v1010_v10  ;;  %v1014_v32 = vsel %vm966_vm2, %v1012_v52, %v1013_v25  ;;  %v1018_v42 = vrot.slane %v7328_v53, 2  ;;  %v314_v15 = vld [vmem:[%s7113_s18 + $0x178] sm:$0x3] }
  0x4b   : > { %v1020_v19 = vrot.slane %v7339_v16, 2  ;;  %v7610_v20 = vpack.c.bf16 %v1011_v14, %v1009_v26  ;;  %v1016_v21 = vsel %vm966_vm2, %v1013_v25, %v1015_v27  ;;  %v1022_v47 = vrot.slane %v7342_v18, 2  ;;  %v313_v18 = vld [vmem:[%s7113_s18 + $0x170] sm:$0xff] }
  0x4c   : > { %v1023_v39 = vrot.slane %v7348_v59, 2  ;;  %v7615_v40 = vpack.c.bf16 %v1016_v21, %v1014_v32  ;;  %v1019_v46 = vsel %vm966_vm2, %v1017_v11, %v1018_v42  ;;  %v1025_v1 = vrot.slane %v7374_v43, 2  ;;  %v312_v59 = vld [vmem:[%s7113_s18 + $0x168] sm:$0xff] }
  0x4d   : > { %v1021_v45 = vsel %vm966_vm2, %v1018_v42, %v1020_v19  ;;  %v1027_v56 = vrot.slane %v7377_v5, 2  ;;  %v1028_v28 = vrot.slane %v7391_v35, 2  ;;  %v1030_v49 = vrot.slane %v7380_v63, 2 }
  0x4e   : > { %v7620_v53 = vpack.c.bf16 %v1021_v45, %v1019_v46  ;;  %v1024_v16 = vsel %vm966_vm2, %v1022_v47, %v1023_v39  ;;  %v1026_v41 = vsel %vm966_vm2, %v1023_v39, %v1025_v1  ;;  %v1032_v43 = vrot.slane %v7408_v34, 2  ;;  %v10699_v46 = vld [vmem:[#allocation6_spill] sm:$0xff]  ;;  %v10700_v1 = vld [vmem:[#allocation7_spill] sm:$0xff] }
  0x4f   : > { %6354 = vmatmul.mubr.msk.bf16.gmra.mxu1 %vm535_vm1, %v7488_v60  ;;  %v1033_v54 = vrot.slane %v7421_v61, 2  ;;  %v7637_v5 = vpack.c.bf16 %v1026_v41, %v1024_v16  ;;  %v1029_v35 = vsel %vm966_vm2, %v1027_v56, %v1028_v28  ;;  %v1035_v58 = vrot.slane %v10698_v55, 2  ;;  %v10701_v56 = vld [vmem:[#allocation8_spill] sm:$0xff] }
  0x50   : > { %6357 = vmatprep.mubr.msk.bf16.mxu1 %vm535_vm1, %v7520_v22  ;;  %v1037_v3 = vrot.slane %v7437_v9, 2  ;;  %v1031_v34 = vsel %vm966_vm2, %v1028_v28, %v1030_v49  ;;  %v1038_v61 = vrot.slane %v7467_v44, 2  ;;  %v1040_v4 = vrot.slane %v7470_v23, 2 }
  0x51   : > { %6318 = vmatmul.mubr.msk.bf16.gmra.mxu0 %vm535_vm1, %v7506_v7  ;;  %v1034_v63 = vsel %vm966_vm2, %v1032_v43, %v1033_v54  ;;  %v7649_v10 = vpack.c.bf16 %v1031_v34, %v1029_v35  ;;  %v1036_v52 = vsel %vm966_vm2, %v1033_v54, %v1035_v58  ;;  %v1042_v25 = vrot.slane %v312_v59, 2  ;;  %v10704_v34 = vld [vmem:[#allocation9_spill] sm:$0xff] }
  0x52   : > { %6321 = vmatprep.mubr.msk.bf16.mxu0 %vm535_vm1, %v7535_v6  ;;  %v1043_v26 = vrot.slane %v313_v18, 2  ;;  %v7652_v27 = vpack.c.bf16 %v1036_v52, %v1034_v63  ;;  %v1039_v9 = vsel %vm966_vm2, %v1037_v3, %v1038_v61  ;;  %v1041_v11 = vsel %vm966_vm2, %v1038_v61, %v1040_v4  ;;  %v10705_v61 = vld [vmem:[#allocation10_spill] sm:$0xff] }
  0x53   : > { %v1045_v14 = vrot.slane %v314_v15, 2  ;;  %v7658_v32 = vpack.c.bf16 %v7541_v57, %v7538_v13  ;;  %v465_v44 = vrot.slane %v312_v59, 1  ;;  %v7660_v23 = vpack.c.bf16 %v1041_v11, %v1039_v9  ;;  %v6971_v9 = vld [vmem:[%s10522_s1 + $0x40] sm:$0xff]  }
  0x54   : > { %v1044_v42 = vsel %vm966_vm2, %v1042_v25, %v1043_v26  ;;  %v7665_v19 = vpack.c.bf16 %v7560_v24, %v7551_v50  ;;  %v466_v21 = vrot.slane %v313_v18, 1  ;;  %v468_v47 = vrot.slane %v314_v15, 1  ;;  %v10706_v15 = vld [vmem:[#allocation11_spill] sm:$0xff]  ;;  %v10707_v25 = vld [vmem:[#allocation14_spill] sm:$0xff]  ;;  %v10708_v11 = vld [vmem:[#allocation16_spill] sm:$0xff] }
  0x55   : > { %v1046_v39 = vsel %vm966_vm2, %v1043_v26, %v1045_v14  ;;  %v967_v45 = vrot.slane %v10699_v46, 2  ;;  %v968_v16 = vrot.slane %v10700_v1, 2  ;;  %v970_v28 = vrot.slane %v10701_v56, 2  ;;  %v6973_v14 = vld [vmem:[%s10522_s1 + $0x50] sm:$0xff]   ;;  %v10714_v1 = vld [vmem:[#allocation36_spill] sm:$0xff]  ;;  %v316_v56 = vld [vmem:[%s7113_s18 + $0x188] sm:$0xff] }
  0x56   : > { %v7671_v41 = vpack.c.bf16 %v1046_v39, %v1044_v42  ;;  %v7682_v49 = vsel %vm389_vm0, %v465_v44, %v466_v21  ;;  %v7685_v43 = vsel %vm389_vm0, %v466_v21, %v468_v47  ;;  %v7689_v55 = vpack.c.bf16 %v313_v18, %v312_v59  ;;  %v10709_v44 = vld [vmem:[#allocation22_spill] sm:$0xff]  ;;  %v10710_v42 = vld [vmem:[#allocation33_spill] sm:$0xff]  ;;  %v10711_v21 = vld [vmem:[#allocation39_spill] sm:$0xff] }
  0x57   : > { %6358 = vmatmul.mubr.msk.bf16.gmra.mxu1 %vm535_vm1, %v7524_v51  ;;  %10702 = vst [vmem:[#allocation44_spill] sm:$0xff] %v7682_v49  ;;  %10703 = vst [vmem:[#allocation6_spill] sm:$0xff] %v7685_v43  ;;  %v969_v54 = vsel %vm966_vm2, %v967_v45, %v968_v16  ;;  %v971_v35 = vsel %vm966_vm2, %v968_v16, %v970_v28  ;;  %v7693_v58 = vpack.c.bf16 %v7685_v43, %v7682_v49  ;;  %v6974_v47 = vld [vmem:[%s10522_s1 + $0x68] sm:$0xff]   ;;  %v6976_v39 = vld [vmem:[%s10522_s1 + $0x78] sm:$0xff]  }
  0x58   : > { %6361 = vmatprep.mubr.msk.bf16.mxu1 %vm535_vm1, %v7555_v17  ;;  %v1079_v3 = vpack.c.bf16 %v971_v35, %v969_v54  ;;  %v977_v63 = vrot.slane %v10704_v34, 2  ;;  %v978_v4 = vrot.slane %v10705_v61, 2  ;;  %v980_v52 = vrot.slane %v10706_v15, 2  ;;  %v10712_v46 = vld [vmem:[#allocation26_spill] sm:$0xff]  ;;  %v10713_v45 = vld [vmem:[#allocation32_spill] sm:$0xff]  ;;  %v10715_v54 = vld [vmem:[#allocation15_spill] sm:$0xff] }
  0x59   : > { %6322 = vmatmul.mubr.msk.bf16.gmra.mxu0 %vm535_vm1, %v7658_v32  ;;  %v315_v16 = vld [vmem:[%s7113_s18 + $0x180] sm:$0xff]  ;;  %v10716_v34 = vld [vmem:[#allocation19_spill] sm:$0xff] }
  0x5a   : > { %6325 = vmatprep.mubr.msk.bf16.mxu0 %vm535_vm1, %v7665_v19  ;;  %v979_v59 = vsel %vm966_vm2, %v977_v63, %v978_v4  ;;  %v981_v18 = vsel %vm966_vm2, %v978_v4, %v980_v52  ;;  %v7781_v28 = vpack.c.bf16 %v316_v56, %v315_v16  ;;  %v6975_v35 = vld [vmem:[%s10522_s1 + $0x60] sm:$0xff]   ;;  %v6978_v63 = vld [vmem:[%s10522_s1 + $0x88] sm:$0xff]   ;;  %v10718_v61 = vld [vmem:[#allocation27_spill] sm:$0xff] }
  0x5b   : > { %v7707_v26 = vpack.c.bf16 %v981_v18, %v979_v59  ;;  %v10719_v4 = vld [vmem:[#allocation34_spill] sm:$0xff]  ;;  %v10720_v15 = vld [vmem:[#allocation35_spill] sm:$0xff]  ;;  %v10721_v52 = vld [vmem:[#allocation45_spill] sm:$0xff]  ;;  %v1791_v59 = vrot.slane %v315_v16, 2  ;;  %v1792_v18 = vrot.slane %v316_v56, 2 }
  0x5f   : > { %6362 = vmatmul.mubr.msk.bf16.gmra.mxu1 %vm535_vm1, %v7689_v55 }
  0x60   : > { %6405 = vmatprep.mubr.msk.bf16.mxu1 %vm535_vm1, %v10707_v25  ;;  %v317_v25 = vld [vmem:[%s7113_s18 + $0x190] sm:$0x3] }
  0x61   : > { %6326 = vmatmul.mubr.msk.bf16.gmra.mxu0 %vm535_vm1, %v7693_v58 }
  0x62   : > { %6369 = vmatprep.mubr.msk.bf16.mxu0 %vm535_vm1, %v1079_v3  ;;  %v6977_v3 = vld [vmem:[%s10522_s1 + $0x70] sm:$0xff]  }
  0x67   : > { %6406 = vmatmul.mubr.msk.bf16.vlgmr.msra.gmra.mxu1 %vm535_vm1, %v10708_v11 }
  0x68   : > { %6409 = vmatprep.mubr.msk.bf16.mxu1 %vm535_vm1, %v10709_v44  ;;  %6474 = vmatpush3.bf16.msra.mxu1 %v10711_v21  ;;  %v1573_v21 = vrot.slane %v317_v25, 1 }
  0x69   : > { %6370 = vmatmul.mubr.msk.bf16.vlgmr.msra.gmra.mxu0 %vm535_vm1, %v7527_v12  ;;  %6475 = vmatprep.subr.bf16.mxu1 %v6973_v14 }
  0x6a   : > { %6438 = vmatpush3.bf16.msra.mxu0 %v10710_v42  ;;  %6373 = vmatprep.mubr.msk.bf16.mxu0 %vm535_vm1, %v7707_v26  ;;  %v1571_v42 = vrot.slane %v316_v56, 1 }
  0x6b   : > { %6439 = vmatprep.subr.bf16.mxu0 %v6971_v9 }
  0x6c   : > { %6476 = vmatpush3.bf16.msra.mxu1 %v6973_v14  ;;  %v1570_v14 = vrot.slane %v315_v16, 1  ;;  %v7869_v56 = vsel %vm389_vm0, %v1571_v42, %v1573_v21 }
  0x6d   : > { %6545 = vmatprep.subr.bf16.mxu1 %v6976_v39  ;;  %10723 = vst [vmem:[#allocation8_spill] sm:$0xff] %v7869_v56 }
  0x6e   : > { %6440 = vmatpush3.bf16.msra.mxu0 %v6971_v9  ;;  %v1794_v9 = vrot.slane %v317_v25, 2  ;;  %v7866_v16 = vsel %vm389_vm0, %v1570_v14, %v1571_v42 }
  0x6f   : > { %6509 = vmatprep.subr.bf16.mxu0 %v6974_v47  ;;  %6410 = vmatmul.mubr.msk.bf16.gmra.mxu1 %vm535_vm1, %v10712_v46  ;;  %10722 = vst [vmem:[#allocation7_spill] sm:$0xff] %v7866_v16  ;;  %v7881_v43 = vpack.c.bf16 %v7869_v56, %v7866_v16 }
  0x70   : > { %6413 = vmatprep.mubr.msk.bf16.mxu1 %vm535_vm1, %v10713_v45 }
  0x71   : > { %6374 = vmatmul.mubr.msk.bf16.gmra.mxu0 %vm535_vm1, %v7565_v33 }
  0x72   : > { %6377 = vmatprep.mubr.msk.bf16.mxu0 %vm535_vm1, %v7570_v38 }
  0x77   : > { %6414 = vmatmul.mubr.msk.bf16.gmra.mxu1 %vm535_vm1, %v10714_v1 }
  0x78   : > { %6417 = vmatprep.mubr.msk.bf16.mxu1 %vm535_vm1, %v7433_v62 }
  0x79   : > { %6378 = vmatmul.mubr.msk.bf16.gmra.mxu0 %vm535_vm1, %v7581_v48 }
  0x7a   : > { %6381 = vmatprep.mubr.msk.bf16.mxu0 %vm535_vm1, %v7590_v37 }
  0x7f   : > { %6418 = vmatmul.mubr.msk.bf16.gmra.mxu1 %vm535_vm1, %v7447_v29 }
  0x80   : > { %6421 = vmatprep.mubr.msk.bf16.mxu1 %vm535_vm1, %v7461_v31 }
  0x81   : > { %6382 = vmatmul.mubr.msk.bf16.gmra.mxu0 %vm535_vm1, %v7601_v0 }
  0x82   : > { %6385 = vmatprep.mubr.msk.bf16.mxu0 %vm535_vm1, %v7610_v20 }
  0x87   : > { %6422 = vmatmul.mubr.msk.bf16.gmra.mxu1 %vm535_vm1, %v7484_v36 }
  0x88   : > { %6425 = vmatprep.mubr.msk.bf16.mxu1 %vm535_vm1, %v7488_v60 }
  0x89   : > { %6386 = vmatmul.mubr.msk.bf16.gmra.mxu0 %vm535_vm1, %v7615_v40 }
  0x8a   : > { %6389 = vmatprep.mubr.msk.bf16.mxu0 %vm535_vm1, %v7620_v53 }
  0x8f   : > { %6426 = vmatmul.mubr.msk.bf16.gmra.mxu1 %vm535_vm1, %v7520_v22 }
  0x90   : > { %6429 = vmatprep.mubr.msk.bf16.mxu1 %vm535_vm1, %v7524_v51 }
  0x91   : > { %6390 = vmatmul.mubr.msk.bf16.gmra.mxu0 %vm535_vm1, %v7637_v5 }
  0x92   : > { %6393 = vmatprep.mubr.msk.bf16.mxu0 %vm535_vm1, %v7649_v10 }
  0x97   : > { %6430 = vmatmul.mubr.msk.bf16.gmra.mxu1 %vm535_vm1, %v7555_v17 }
  0x98   : > { %6433 = vmatprep.mubr.msk.bf16.mxu1 %vm535_vm1, %v7689_v55 }
  0x99   : > { %6394 = vmatmul.mubr.msk.bf16.gmra.mxu0 %vm535_vm1, %v7652_v27 }
  0x9a   : > { %6397 = vmatprep.mubr.msk.bf16.mxu0 %vm535_vm1, %v7660_v23 }
  0x9f   : > { %6434 = vmatmul.mubr.msk.bf16.gmra.mxu1 %vm535_vm1, %v7781_v28 }
  0xa0   : > { %6477 = vmatprep.mubr.msk.bf16.mxu1 %vm535_vm1, %v7527_v12  ;;  %v10717_v12 = vld [vmem:[#allocation25_spill] sm:$0xff] }
  0xa1   : > { %6398 = vmatmul.mubr.msk.bf16.gmra.mxu0 %vm535_vm1, %v7671_v41 }
  0xa2   : > { %6441 = vmatprep.mubr.msk.bf16.mxu0 %vm535_vm1, %v10715_v54  ;;  %v7858_v54 = vld [vmem:[%s7113_s18 + $0x198] sm:$0xff] }
  0xa7   : > { %6478 = vmatmul.mubr.msk.bf16.vlgmr.msra.gmra.mxu1 %vm535_vm1, %v7707_v26 }
  0xa8   : > { %6481 = vmatprep.mubr.msk.bf16.mxu1 %vm535_vm1, %v7565_v33  ;;  %6546 = vmatpush3.bf16.msra.mxu1 %v6976_v39  ;;  %v1795_v39 = vsel %vm966_vm2, %v1792_v18, %v1794_v9 }
  0xa9   : > { %6442 = vmatmul.mubr.msk.bf16.vlgmr.msra.gmra.mxu0 %vm535_vm1, %v10716_v34  ;;  %6547 = vmatprep.subr.bf16.mxu1 %v6977_v3 }
  0xaa   : > { %6510 = vmatpush3.bf16.msra.mxu0 %v6974_v47  ;;  %6445 = vmatprep.mubr.msk.bf16.mxu0 %vm535_vm1, %v10717_v12  ;;  %v1793_v47 = vsel %vm966_vm2, %v1791_v59, %v1792_v18  ;;  %v7874_v59 = vld [vmem:[%s7113_s18 + $0x1a8] sm:$0x3] }
  0xab   : > { %6511 = vmatprep.subr.bf16.mxu0 %v6975_v35  ;;  %v7876_v18 = vpack.c.bf16 %v1795_v39, %v1793_v47  ;;  %v2453_v9 = vrot.slane %v7874_v59, 2  ;;  %v6979_v47 = vld [vmem:[%s10522_s1 + $0x80] sm:$0xff]  }
  0xac   : > { %6548 = vmatpush3.bf16.msra.mxu1 %v6977_v3  ;;  %v2450_v3 = vrot.slane %v7858_v54, 2 }
  0xae   : > { %6512 = vmatpush3.bf16.msra.mxu0 %v6975_v35  ;;  %v7861_v35 = vld [vmem:[%s7113_s18 + $0x1a0] sm:$0xff]  ;;  %s5968_s18 = sshll.u32 %s11118_s22, 8 }
  0xaf   : > { %6581 = vmatprep.subr.bf16.mxu0 %v6978_v63  ;;  %6482 = vmatmul.mubr.msk.bf16.gmra.mxu1 %vm535_vm1, %v7570_v38  ;;  %v2451_v25 = vrot.slane %v7861_v35, 2  ;;  %s10269_s25 = scalar_lea.vmem %s10527_s6, %s5968_s18 }
  0xb0   : > { %6485 = vmatprep.mubr.msk.bf16.mxu1 %vm535_vm1, %v7581_v48 }
  0xb1   : > { %6446 = vmatmul.mubr.msk.bf16.gmra.mxu0 %vm535_vm1, %v10718_v61  ;;  %v7884_v14 = vsel %vm966_vm2, %v2450_v3, %v2451_v25  ;;  %v7887_v42 = vsel %vm966_vm2, %v2451_v25, %v2453_v9 }
  0xb2   : > { %6449 = vmatprep.mubr.msk.bf16.mxu0 %vm535_vm1, %v10719_v4 }
  0xb7   : > { %6486 = vmatmul.mubr.msk.bf16.gmra.mxu1 %vm535_vm1, %v7590_v37 }
  0xb8   : > { %6489 = vmatprep.mubr.msk.bf16.mxu1 %vm535_vm1, %v7601_v0 }
  0xb9   : > { %6450 = vmatmul.mubr.msk.bf16.gmra.mxu0 %vm535_vm1, %v10720_v15 }
  0xba   : > { %6453 = vmatprep.mubr.msk.bf16.mxu0 %vm535_vm1, %v7443_v2 }
  0xbf   : > { %6490 = vmatmul.mubr.msk.bf16.gmra.mxu1 %vm535_vm1, %v7610_v20 }
  0xc0   : > { %6493 = vmatprep.mubr.msk.bf16.mxu1 %vm535_vm1, %v7615_v40 }
  0xc1   : > { %6454 = vmatmul.mubr.msk.bf16.gmra.mxu0 %vm535_vm1, %v10721_v52 }
  0xc2   : > { %6457 = vmatprep.mubr.msk.bf16.mxu0 %vm535_vm1, %v7457_v30 }
  0xc7   : > { %6494 = vmatmul.mubr.msk.bf16.gmra.mxu1 %vm535_vm1, %v7620_v53 }
  0xc8   : > { %6497 = vmatprep.mubr.msk.bf16.mxu1 %vm535_vm1, %v7637_v5 }
  0xc9   : > { %6458 = vmatmul.mubr.msk.bf16.gmra.mxu0 %vm535_vm1, %v7502_v8 }
  0xca   : > { %6461 = vmatprep.mubr.msk.bf16.mxu0 %vm535_vm1, %v7506_v7 }
  0xcf   : > { %6498 = vmatmul.mubr.msk.bf16.gmra.mxu1 %vm535_vm1, %v7649_v10 }
  0xd0   : > { %6501 = vmatprep.mubr.msk.bf16.mxu1 %vm535_vm1, %v7652_v27 }
  0xd1   : > { %6462 = vmatmul.mubr.msk.bf16.gmra.mxu0 %vm535_vm1, %v7535_v6 }
  0xd2   : > { %6465 = vmatprep.mubr.msk.bf16.mxu0 %vm535_vm1, %v7658_v32 }
  0xd7   : > { %6502 = vmatmul.mubr.msk.bf16.gmra.mxu1 %vm535_vm1, %v7660_v23 }
  0xd8   : > { %6505 = vmatprep.mubr.msk.bf16.mxu1 %vm535_vm1, %v7671_v41 }
  0xd9   : > { %6466 = vmatmul.mubr.msk.bf16.gmra.mxu0 %vm535_vm1, %v7665_v19 }
  0xda   : > { %6469 = vmatprep.mubr.msk.bf16.mxu0 %vm535_vm1, %v7693_v58 }
  0xdf   : > { %6506 = vmatmul.mubr.msk.bf16.gmra.mxu1 %vm535_vm1, %v7876_v18 }
  0xe0   : > { %6549 = vmatprep.mubr.msk.bf16.mxu1 %vm535_vm1, %v10716_v34 }
  0xe1   : > { %6470 = vmatmul.mubr.msk.bf16.gmra.mxu0 %vm535_vm1, %v7881_v43 }
  0xe2   : > { %6513 = vmatprep.mubr.msk.bf16.mxu0 %vm535_vm1, %v10708_v11 }
  0xe7   : > { %v6335_v39 = vpop.f32.mrf.mxu1  ;;  %6550 = vmatmul.mubr.msk.bf16.vlgmr.msra.gmra.mxu1 %vm535_vm1, %v10717_v12 }
  0xe8   : > { %6553 = vmatprep.mubr.msk.bf16.mxu1 %vm535_vm1, %v10718_v61 }
  0xe9   : > { %v6299_v3 = vpop.f32.mrf.mxu0  ;;  %6514 = vmatmul.mubr.msk.bf16.vlgmr.msra.gmra.mxu0 %vm535_vm1, %v10709_v44  ;;  %v839_v34 = vpop.f32.mrf.mxu1 }
  0xea   : > { %v7908_v25 = vadd.f32 %v6335_v39, %v6299_v3  ;;  %6582 = vmatpush3.bf16.msra.mxu0 %v6978_v63  ;;  %6517 = vmatprep.mubr.msk.bf16.mxu0 %vm535_vm1, %v10712_v46 }
  0xeb   : > { %v618_v11 = vpop.f32.mrf.mxu0  ;;  %6583 = vmatprep.subr.bf16.mxu0 %v6979_v47  ;;  %v6336_v21 = vpop.f32.mrf.mxu1 }
  0xec   : > { %v7912_v9 = vadd.f32 %v839_v34, %v618_v11 }
  0xed   : > { %v6300_v12 = vpop.f32.mrf.mxu0  ;;  %v842_v49 = vpop.f32.mrf.mxu1 }
  0xee   : > { %v7914_v56 = vadd.f32 %v6336_v21, %v6300_v12  ;;  %6584 = vmatpush3.bf16.msra.mxu0 %v6979_v47 }
  0xef   : > { %v621_v44 = vpop.f32.mrf.mxu0  ;;  %v6339_v61 = vpop.f32.mrf.mxu1  ;;  %6554 = vmatmul.mubr.msk.bf16.gmra.mxu1 %vm535_vm1, %v10719_v4 }
  0xf0   : > { %v7916_v16 = vadd.f32 %v842_v49, %v621_v44  ;;  %6557 = vmatprep.mubr.msk.bf16.mxu1 %vm535_vm1, %v10720_v15 }
  0xf1   : > { %v6303_v63 = vpop.f32.mrf.mxu0  ;;  %6518 = vmatmul.mubr.msk.bf16.gmra.mxu0 %vm535_vm1, %v10713_v45  ;;  %v855_v21 = vpop.f32.mrf.mxu1 }
  0xf2   : > { %v7924_v46 = vadd.f32 %v6339_v61, %v6303_v63  ;;  %6521 = vmatprep.mubr.msk.bf16.mxu0 %vm535_vm1, %v10714_v1 }
  0xf3   : > { %v634_v47 = vpop.f32.mrf.mxu0  ;;  %v6340_v39 = vpop.f32.mrf.mxu1 }
  0xf4   : > { %v7928_v49 = vadd.f32 %v855_v21, %v634_v47 }
  0xf5   : > { %v6304_v3 = vpop.f32.mrf.mxu0  ;;  %v858_v4 = vpop.f32.mrf.mxu1 }
  0xf6   : > { %v7930_v34 = vadd.f32 %v6340_v39, %v6304_v3 }
  0xf7   : > { %v637_v11 = vpop.f32.mrf.mxu0  ;;  %v6343_v45 = vpop.f32.mrf.mxu1  ;;  %6558 = vmatmul.mubr.msk.bf16.gmra.mxu1 %vm535_vm1, %v7443_v2 }
  0xf8   : > { %v7932_v12 = vadd.f32 %v858_v4, %v637_v11  ;;  %6561 = vmatprep.mubr.msk.bf16.mxu1 %vm535_vm1, %v10721_v52 }
  0xf9   : > { %v6307_v15 = vpop.f32.mrf.mxu0  ;;  %6522 = vmatmul.mubr.msk.bf16.gmra.mxu0 %vm535_vm1, %v7433_v62  ;;  %v871_v44 = vpop.f32.mrf.mxu1 }
  0xfa   : > { %v7940_v1 = vadd.f32 %v6343_v45, %v6307_v15  ;;  %6525 = vmatprep.mubr.msk.bf16.mxu0 %vm535_vm1, %v7447_v29 }
  0xfb   : > { %v650_v61 = vpop.f32.mrf.mxu0  ;;  %v6344_v21 = vpop.f32.mrf.mxu1 }
  0xfc   : > { %v7944_v63 = vadd.f32 %v871_v44, %v650_v61 }
  0xfd   : > { %v6308_v47 = vpop.f32.mrf.mxu0  ;;  %v874_v2 = vpop.f32.mrf.mxu1 }
  0xfe   : > { %v7946_v39 = vadd.f32 %v6344_v21, %v6308_v47 }
  0xff   : > { %v653_v3 = vpop.f32.mrf.mxu0  ;;  %v6347_v62 = vpop.f32.mrf.mxu1  ;;  %6562 = vmatmul.mubr.msk.bf16.gmra.mxu1 %vm535_vm1, %v7457_v30 }
 0x100   : > { %v7948_v4 = vadd.f32 %v874_v2, %v653_v3  ;;  %6565 = vmatprep.mubr.msk.bf16.mxu1 %vm535_vm1, %v7502_v8 }
 0x101   : > { %v6311_v52 = vpop.f32.mrf.mxu0  ;;  %6526 = vmatmul.mubr.msk.bf16.gmra.mxu0 %vm535_vm1, %v7461_v31  ;;  %v887_v11 = vpop.f32.mrf.mxu1 }
 0x102   : > { %v7956_v29 = vadd.f32 %v6347_v62, %v6311_v52  ;;  %6529 = vmatprep.mubr.msk.bf16.mxu0 %vm535_vm1, %v7484_v36 }
 0x103   : > { %v666_v45 = vpop.f32.mrf.mxu0  ;;  %v6348_v44 = vpop.f32.mrf.mxu1 }
 0x104   : > { %v7960_v15 = vadd.f32 %v887_v11, %v666_v45 }
 0x105   : > { %v6312_v61 = vpop.f32.mrf.mxu0  ;;  %v890_v30 = vpop.f32.mrf.mxu1 }
 0x106   : > { %v7962_v21 = vadd.f32 %v6348_v44, %v6312_v61 }
 0x107   : > { %v669_v47 = vpop.f32.mrf.mxu0  ;;  %v6351_v31 = vpop.f32.mrf.mxu1  ;;  %6566 = vmatmul.mubr.msk.bf16.gmra.mxu1 %vm535_vm1, %v7506_v7 }
 0x108   : > { %v7964_v2 = vadd.f32 %v890_v30, %v669_v47  ;;  %6569 = vmatprep.mubr.msk.bf16.mxu1 %vm535_vm1, %v7535_v6 }
 0x109   : > { %v6315_v8 = vpop.f32.mrf.mxu0  ;;  %6530 = vmatmul.mubr.msk.bf16.gmra.mxu0 %vm535_vm1, %v7488_v60  ;;  %v903_v3 = vpop.f32.mrf.mxu1 }
 0x10a   : > { %v7972_v36 = vadd.f32 %v6351_v31, %v6315_v8  ;;  %6533 = vmatprep.mubr.msk.bf16.mxu0 %vm535_vm1, %v7520_v22 }
 0x10b   : > { %v682_v62 = vpop.f32.mrf.mxu0  ;;  %v6352_v11 = vpop.f32.mrf.mxu1 }
 0x10c   : > { %v7976_v52 = vadd.f32 %v903_v3, %v682_v62  ;;  %v2230_v62 = vrot.slane %v7861_v35, 1 }
 0x10d   : > { %v6316_v45 = vpop.f32.mrf.mxu0  ;;  %v7980_v7 = vpop.f32.mrf.mxu1 }
 0x10e   : > { %v7978_v44 = vadd.f32 %v6352_v11, %v6316_v45 }
 0x10f   : > { %v7982_v61 = vpop.f32.mrf.mxu0  ;;  %v6355_v60 = vpop.f32.mrf.mxu1  ;;  %6570 = vmatmul.mubr.msk.bf16.gmra.mxu1 %vm535_vm1, %v7658_v32  ;;  %v2229_v32 = vrot.slane %v7858_v54, 1 }
 0x110   : > { %6573 = vmatprep.mubr.msk.bf16.mxu1 %vm535_vm1, %v7665_v19 }
 0x111   : > { %v6319_v6 = vpop.f32.mrf.mxu0  ;;  %6534 = vmatmul.mubr.msk.bf16.gmra.mxu0 %vm535_vm1, %v7524_v51  ;;  %v919_v30 = vpop.f32.mrf.mxu1  ;;  %v2232_v51 = vrot.slane %v7874_v59, 1 }
 0x112   : > { %v7990_v22 = vadd.f32 %v6355_v60, %v6319_v6  ;;  %6537 = vmatprep.mubr.msk.bf16.mxu0 %vm535_vm1, %v7555_v17  ;;  %v2231_v6 = vsel %vm389_vm0, %v2229_v32, %v2230_v62 }
 0x113   : > { %v698_v47 = vpop.f32.mrf.mxu0  ;;  %v6356_v8 = vpop.f32.mrf.mxu1  ;;  %v2233_v59 = vsel %vm389_vm0, %v2230_v62, %v2232_v51 }
 0x114   : > { %v7994_v31 = vadd.f32 %v919_v30, %v698_v47  ;;  %v2236_v57 = vpack.c.bf16 %v2233_v59, %v2231_v6 }
 0x115   : > { %v6320_v3 = vpop.f32.mrf.mxu0  ;;  %v8001_v19 = vpop.f32.mrf.mxu1 }
 0x116   : > { %v7999_v11 = vadd.f32 %v6356_v8, %v6320_v3 }
 0x117   : > { %v8003_v45 = vpop.f32.mrf.mxu0  ;;  %v6359_v60 = vpop.f32.mrf.mxu1  ;;  %6574 = vmatmul.mubr.msk.bf16.gmra.mxu1 %vm535_vm1, %v7693_v58 }
 0x118   : > { %6577 = vmatprep.mubr.msk.bf16.mxu1 %vm535_vm1, %v7881_v43 }
 0x119   : > { %v6323_v17 = vpop.f32.mrf.mxu0  ;;  %6538 = vmatmul.mubr.msk.bf16.gmra.mxu0 %vm535_vm1, %v7689_v55  ;;  %v935_v47 = vpop.f32.mrf.mxu1  ;;  %v2012_v55 = vpack.c.bf16 %v7861_v35, %v7858_v54 }
 0x11a   : > { %v8013_v30 = vadd.f32 %v6359_v60, %v6323_v17  ;;  %6541 = vmatprep.mubr.msk.bf16.mxu0 %vm535_vm1, %v7781_v28 }
 0x11b   : > { %v714_v8 = vpop.f32.mrf.mxu0  ;;  %v6360_v58 = vpop.f32.mrf.mxu1 }
 0x11c   : > { %v8017_v3 = vadd.f32 %v935_v47, %v714_v8 }
 0x11d   : > { %v6324_v24 = vpop.f32.mrf.mxu0  ;;  %v8023_v32 = vpop.f32.mrf.mxu1 }
 0x11e   : > { %v8021_v43 = vadd.f32 %v6360_v58, %v6324_v24 }
 0x11f   : > { %v8025_v62 = vpop.f32.mrf.mxu0  ;;  %v6363_v51 = vpop.f32.mrf.mxu1  ;;  %6578 = vmatmul.mubr.msk.bf16.gmra.mxu1 %vm535_vm1, %v2236_v57 }
 0x121   : > { %v6327_v60 = vpop.f32.mrf.mxu0  ;;  %6542 = vmatmul.mubr.msk.bf16.gmra.mxu0 %vm535_vm1, %v2012_v55  ;;  %v951_v17 = vpop.f32.mrf.mxu1 }
 0x122   : > { %v8029_v28 = vadd.f32 %v6363_v51, %v6327_v60  ;;  %6585 = vmatprep.mubr.msk.bf16.mxu0 %vm535_vm1, %v7707_v26 }
 0x123   : > { %v730_v6 = vpop.f32.mrf.mxu0  ;;  %v6364_v24 = vpop.f32.mrf.mxu1 }
 0x124   : > { %v8033_v54 = vadd.f32 %v951_v17, %v730_v6 }
 0x125   : > { %v6328_v35 = vpop.f32.mrf.mxu0  ;;  %v8037_v47 = vpop.f32.mrf.mxu1 }
 0x126   : > { %v8035_v59 = vadd.f32 %v6364_v24, %v6328_v35  ;;  %10724 = vst [vmem:[#allocation9_spill] sm:$0xff] %v8037_v47 }
 0x127   : > { %v8039_v8 = vpop.f32.mrf.mxu0  ;;  %v6407_v57 = vpop.f32.mrf.mxu1 }
 0x129   : > { %v6371_v58 = vpop.f32.mrf.mxu0  ;;  %6586 = vmatmul.mubr.msk.bf16.vlgmr.msra.gmra.mxu0 %vm535_vm1, %v7565_v33  ;;  %v1408_v51 = vpop.f32.mrf.mxu1 }
 0x12a   : > { %v1323_v55 = vadd.f32 %v6371_v58, %v7908_v25  ;;  %6589 = vmatprep.mubr.msk.bf16.mxu0 %vm535_vm1, %v7570_v38 }
 0x12b   : > { %v1194_v26 = vpop.f32.mrf.mxu0  ;;  %v6408_v6 = vpop.f32.mrf.mxu1 }
 0x12c   : > { %v1321_v60 = vadd.f32 %v1194_v26, %v7912_v9  ;;  %v8047_v17 = vadd.f32 %v6407_v57, %v1323_v55 }
 0x12d   : > { %v6372_v24 = vpop.f32.mrf.mxu0  ;;  %v8052_v50 = vpop.f32.mrf.mxu1 }
 0x12e   : > { %v1324_v35 = vadd.f32 %v6372_v24, %v7914_v56  ;;  %v8050_v13 = vadd.f32 %v1408_v51, %v1321_v60 }
 0x12f   : > { %v1197_v33 = vpop.f32.mrf.mxu0  ;;  %v6411_v38 = vpop.f32.mrf.mxu1 }
 0x130   : > { %v8055_v25 = vadd.f32 %v1197_v33, %v7916_v16  ;;  %v8057_v58 = vadd.f32 %v6408_v6, %v1324_v35 }
 0x131   : > { %v6375_v47 = vpop.f32.mrf.mxu0  ;;  %6590 = vmatmul.mubr.msk.bf16.gmra.mxu0 %vm535_vm1, %v7581_v48  ;;  %v1424_v57 = vpop.f32.mrf.mxu1 }
 0x132   : > { %v1327_v9 = vadd.f32 %v6375_v47, %v7924_v46  ;;  %6593 = vmatprep.mubr.msk.bf16.mxu0 %vm535_vm1, %v7590_v37 }
 0x133   : > { %v1210_v56 = vpop.f32.mrf.mxu0  ;;  %v6412_v16 = vpop.f32.mrf.mxu1 }
 0x134   : > { %v1325_v55 = vadd.f32 %v1210_v56, %v7928_v49  ;;  %v8065_v51 = vadd.f32 %v6411_v38, %v1327_v9 }
 0x135   : > { %v6376_v26 = vpop.f32.mrf.mxu0  ;;  %v8070_v24 = vpop.f32.mrf.mxu1 }
 0x136   : > { %v1328_v60 = vadd.f32 %v6376_v26, %v7930_v34  ;;  %v8068_v6 = vadd.f32 %v1424_v57, %v1325_v55 }
 0x137   : > { %v1213_v48 = vpop.f32.mrf.mxu0  ;;  %v6415_v37 = vpop.f32.mrf.mxu1 }
 0x138   : > { %v8073_v46 = vadd.f32 %v1213_v48, %v7932_v12  ;;  %v8075_v47 = vadd.f32 %v6412_v16, %v1328_v60 }
 0x139   : > { %v6379_v35 = vpop.f32.mrf.mxu0  ;;  %6594 = vmatmul.mubr.msk.bf16.gmra.mxu0 %vm535_vm1, %v7601_v0  ;;  %v1440_v33 = vpop.f32.mrf.mxu1 }
 0x13a   : > { %v1331_v49 = vadd.f32 %v6379_v35, %v7940_v1  ;;  %6597 = vmatprep.mubr.msk.bf16.mxu0 %vm535_vm1, %v7610_v20 }
 0x13b   : > { %v1226_v34 = vpop.f32.mrf.mxu0  ;;  %v6416_v12 = vpop.f32.mrf.mxu1 }
 0x13c   : > { %v1329_v38 = vadd.f32 %v1226_v34, %v7944_v63  ;;  %v8083_v9 = vadd.f32 %v6415_v37, %v1331_v49  ;;  %v6980_v49 = vld [vmem:[%s10524_s3 + $0x18] sm:$0xff]  }
 0x13d   : > { %v6380_v57 = vpop.f32.mrf.mxu0  ;;  %v8088_v16 = vpop.f32.mrf.mxu1  ;;  %6617 = vmatprep.subr.bf16.mxu1 %v6980_v49 }
 0x13e   : > { %v1332_v56 = vadd.f32 %v6380_v57, %v7946_v39  ;;  %v8086_v55 = vadd.f32 %v1440_v33, %v1329_v38  ;;  %6618 = vmatpush3.bf16.msra.mxu1 %v6980_v49 }
 0x13f   : > { %v1229_v0 = vpop.f32.mrf.mxu0  ;;  %v6419_v20 = vpop.f32.mrf.mxu1 }
 0x140   : > { %v8091_v1 = vadd.f32 %v1229_v0, %v7948_v4  ;;  %v8093_v26 = vadd.f32 %v6416_v12, %v1332_v56 }
 0x141   : > { %v6383_v60 = vpop.f32.mrf.mxu0  ;;  %6598 = vmatmul.mubr.msk.bf16.gmra.mxu0 %vm535_vm1, %v7615_v40  ;;  %v1456_v48 = vpop.f32.mrf.mxu1 }
 0x142   : > { %v1335_v63 = vadd.f32 %v6383_v60, %v7956_v29  ;;  %6601 = vmatprep.mubr.msk.bf16.mxu0 %vm535_vm1, %v7620_v53 }
 0x143   : > { %v1242_v39 = vpop.f32.mrf.mxu0  ;;  %v6420_v4 = vpop.f32.mrf.mxu1 }
 0x144   : > { %v1333_v37 = vadd.f32 %v1242_v39, %v7960_v15  ;;  %v8101_v35 = vadd.f32 %v6419_v20, %v1335_v63 }
 0x145   : > { %v6384_v33 = vpop.f32.mrf.mxu0  ;;  %v8109_v29 = vpop.f32.mrf.mxu1 }
 0x146   : > { %v1336_v34 = vadd.f32 %v6384_v33, %v7962_v21  ;;  %v8107_v40 = vadd.f32 %v1456_v48, %v1333_v37 }
 0x147   : > { %v1245_v38 = vpop.f32.mrf.mxu0  ;;  %v6423_v12 = vpop.f32.mrf.mxu1 }
 0x148   : > { %v8112_v53 = vadd.f32 %v1245_v38, %v7964_v2  ;;  %v8114_v15 = vadd.f32 %v6420_v4, %v1336_v34 }
 0x149   : > { %v6387_v57 = vpop.f32.mrf.mxu0  ;;  %6602 = vmatmul.mubr.msk.bf16.gmra.mxu0 %vm535_vm1, %v7637_v5  ;;  %v1472_v21 = vpop.f32.mrf.mxu1 }
 0x14a   : > { %v1339_v56 = vadd.f32 %v6387_v57, %v7972_v36  ;;  %6605 = vmatprep.mubr.msk.bf16.mxu0 %vm535_vm1, %v7649_v10 }
 0x14b   : > { %v1258_v0 = vpop.f32.mrf.mxu0  ;;  %v6424_v2 = vpop.f32.mrf.mxu1 }
 0x14c   : > { %v1337_v20 = vadd.f32 %v1258_v0, %v7976_v52  ;;  %v8122_v60 = vadd.f32 %v6423_v12, %v1339_v56 }
 0x14d   : > { %v6388_v63 = vpop.f32.mrf.mxu0  ;;  %v8127_v37 = vpop.f32.mrf.mxu1 }
 0x14e   : > { %v1340_v48 = vadd.f32 %v6388_v63, %v7978_v44  ;;  %v8125_v39 = vadd.f32 %v1472_v21, %v1337_v20 }
 0x14f   : > { %v8129_v5 = vpop.f32.mrf.mxu0  ;;  %v6427_v4 = vpop.f32.mrf.mxu1 }
 0x150   : > { %v8131_v36 = vadd.f32 %v6424_v2, %v1340_v48 }
 0x151   : > { %v6391_v49 = vpop.f32.mrf.mxu0  ;;  %6606 = vmatmul.mubr.msk.bf16.gmra.mxu0 %vm535_vm1, %v7652_v27  ;;  %v1488_v52 = vpop.f32.mrf.mxu1 }
 0x152   : > { %v1343_v10 = vadd.f32 %v6391_v49, %v7990_v22  ;;  %6609 = vmatprep.mubr.msk.bf16.mxu0 %vm535_vm1, %v7660_v23 }
 0x153   : > { %v1274_v44 = vpop.f32.mrf.mxu0  ;;  %v6428_v38 = vpop.f32.mrf.mxu1 }
 0x154   : > { %v1341_v33 = vadd.f32 %v1274_v44, %v7994_v31  ;;  %v8139_v34 = vadd.f32 %v6427_v4, %v1343_v10 }
 0x155   : > { %v6392_v12 = vpop.f32.mrf.mxu0  ;;  %v8144_v21 = vpop.f32.mrf.mxu1 }
 0x156   : > { %v1344_v57 = vadd.f32 %v6392_v12, %v7999_v11  ;;  %v8142_v56 = vadd.f32 %v1488_v52, %v1341_v33 }
 0x157   : > { %v8146_v27 = vpop.f32.mrf.mxu0  ;;  %v6431_v0 = vpop.f32.mrf.mxu1 }
 0x158   : > { %v8148_v22 = vadd.f32 %v6428_v38, %v1344_v57 }
 0x159   : > { %v6395_v20 = vpop.f32.mrf.mxu0  ;;  %6610 = vmatmul.mubr.msk.bf16.gmra.mxu0 %vm535_vm1, %v7671_v41  ;;  %v1504_v31 = vpop.f32.mrf.mxu1 }
 0x15a   : > { %v1347_v23 = vadd.f32 %v6395_v20, %v8013_v30  ;;  %6613 = vmatprep.mubr.msk.bf16.mxu0 %vm535_vm1, %v7876_v18  ;;  %v10725_v18 = vpack.c.bf16 %v7887_v42, %v7884_v14  ;;  %v6981_v20 = vld [vmem:[%s10524_s3 + $0x10] sm:$0xff]  }
 0x15b   : > { %v1290_v11 = vpop.f32.mrf.mxu0  ;;  %v6432_v48 = vpop.f32.mrf.mxu1  ;;  %6619 = vmatprep.subr.bf16.mxu1 %v6981_v20 }
 0x15c   : > { %v1345_v2 = vadd.f32 %v1290_v11, %v8017_v3  ;;  %v8156_v63 = vadd.f32 %v6431_v0, %v1347_v23  ;;  %6620 = vmatpush3.bf16.msra.mxu1 %v6981_v20 }
 0x15d   : > { %v6396_v4 = vpop.f32.mrf.mxu0  ;;  %v8161_v52 = vpop.f32.mrf.mxu1 }
 0x15e   : > { %v1348_v49 = vadd.f32 %v6396_v4, %v8021_v43  ;;  %v8159_v10 = vadd.f32 %v1504_v31, %v1345_v2 }
 0x15f   : > { %v8163_v41 = vpop.f32.mrf.mxu0  ;;  %v6435_v44 = vpop.f32.mrf.mxu1 }
 0x160   : > { %v8165_v30 = vadd.f32 %v6432_v48, %v1348_v49 }
 0x161   : > { %v6399_v33 = vpop.f32.mrf.mxu0  ;;  %6614 = vmatmul.mubr.msk.bf16.gmra.mxu0 %vm535_vm1, %v10725_v18  ;;  %v1520_v38 = vpop.f32.mrf.mxu1 }
 0x162   : > { %v1351_v3 = vadd.f32 %v6399_v33, %v8029_v28 }
 0x163   : > { %v1306_v12 = vpop.f32.mrf.mxu0  ;;  %v6436_v0 = vpop.f32.mrf.mxu1 }
 0x164   : > { %v1349_v43 = vadd.f32 %v1306_v12, %v8033_v54  ;;  %v8173_v57 = vadd.f32 %v6435_v44, %v1351_v3 }
 0x165   : > { %v6400_v23 = vpop.f32.mrf.mxu0  ;;  %v8181_v14 = vpop.f32.mrf.mxu1 }
 0x166   : > { %v1352_v31 = vadd.f32 %v6400_v23, %v8035_v59  ;;  %v8179_v11 = vadd.f32 %v1520_v38, %v1349_v43 }
 0x167   : > { %v8183_v42 = vpop.f32.mrf.mxu0  ;;  %v8187_v54 = vpop.f32.mrf.mxu1 }
 0x168   : > { %v8185_v28 = vadd.f32 %v6436_v0, %v1352_v31 }
 0x169   : > { %v6443_v2 = vpop.f32.mrf.mxu0  ;;  %v8192_v4 = vpop.f32.mrf.mxu1 }
 0x16a   : > { %v8190_v48 = vadd.f32 %v6443_v2, %v8047_v17  ;;  %v7026_v17 = vmov 0.0  }
 0x16b   : > { %v1632_v49 = vpop.f32.mrf.mxu0  ;;  %v8197_v44 = vpop.f32.mrf.mxu1  ;;  %2815 = vst.msk [vmem:[#allocation2 + $0x30] sm:$0xff] %vm535_vm1, %v7026_v17  ;;  %2816 = vst.msk [vmem:[#allocation2 + $0x38] sm:$0xff] %vm535_vm1, %v7026_v17 }
 0x16c   : > { %v8195_v59 = vadd.f32 %v1632_v49, %v8050_v13  ;;  %2808 = vst.msk [vmem:[#allocation2] sm:$0xff] %vm535_vm1, %v7026_v17  ;;  %2809 = vst.msk [vmem:[#allocation2 + $0x8] sm:$0xff] %vm535_vm1, %v7026_v17 }
 0x16d   : > { %v6444_v33 = vpop.f32.mrf.mxu0  ;;  %v8202_v3 = vpop.f32.mrf.mxu1  ;;  %2812 = vst.msk [vmem:[#allocation2 + $0x18] sm:$0xff] %vm535_vm1, %v7026_v17  ;;  %2813 = vst.msk [vmem:[#allocation2 + $0x20] sm:$0xff] %vm535_vm1, %v7026_v17 }
 0x16e   : > { %v8200_v18 = vadd.f32 %v6444_v33, %v8057_v58  ;;  %10726 = vst [vmem:[#allocation10_spill] sm:$0xff] %v8202_v3  ;;  %2818 = vst.msk [vmem:[#allocation2 + $0x48] sm:$0xff] %vm535_vm1, %v7026_v17  ;;  %v6982_v33 = vld [vmem:[%s10524_s3 + $0x8] sm:$0xff]  }
 0x16f   : > { %v8204_v38 = vpop.f32.mrf.mxu0  ;;  %v8206_v12 = vpop.f32.mrf.mxu1  ;;  %2819 = vst.msk [vmem:[#allocation2 + $0x50] sm:$0xff] %vm535_vm1, %v7026_v17  ;;  %2821 = vst.msk [vmem:[#allocation2 + $0x60] sm:$0xff] %vm535_vm1, %v7026_v17  ;;  %6653 = vmatprep.subr.bf16.mxu0 %v6982_v33 }
 0x170   : > { %10727 = vst [vmem:[#allocation11_spill] sm:$0xff] %v8206_v12  ;;  %2822 = vst.msk [vmem:[#allocation2 + $0x68] sm:$0xff] %vm535_vm1, %v7026_v17  ;;  %6654 = vmatpush3.bf16.msra.mxu0 %v6982_v33 }
 0x171   : > { %2824 = vst.msk [vmem:[#allocation2 + $0x78] sm:$0xff] %vm535_vm1, %v7026_v17  ;;  %2825 = vst.msk [vmem:[#allocation2 + $0x80] sm:$0xff] %vm535_vm1, %v7026_v17  ;;  %v6447_v13 = vpop.f32.mrf.mxu0  ;;  %v8247_v43 = vpop.f32.mrf.mxu1 }
 0x172   : > { %2827 = vst.msk [vmem:[#allocation2 + $0x90] sm:$0xff] %vm535_vm1, %v7026_v17  ;;  %2828 = vst.msk [vmem:[#allocation2 + $0x98] sm:$0xff] %vm535_vm1, %v7026_v17  ;;  %v8245_v58 = vadd.f32 %v6447_v13, %v8065_v51 }
 0x173   : > { %2830 = vst.msk [vmem:[#allocation2 + $0xa8] sm:$0xff] %vm535_vm1, %v7026_v17  ;;  %2831 = vst.msk [vmem:[#allocation2 + $0xb0] sm:$0xff] %vm535_vm1, %v7026_v17  ;;  %v1648_v0 = vpop.f32.mrf.mxu0  ;;  %v8252_v23 = vpop.f32.mrf.mxu1 }
 0x174   : > { %2833 = vst.msk [vmem:[#allocation2 + $0xc0] sm:$0xff] %vm535_vm1, %v7026_v17  ;;  %2834 = vst.msk [vmem:[#allocation2 + $0xc8] sm:$0xff] %vm535_vm1, %v7026_v17  ;;  %v8250_v20 = vadd.f32 %v1648_v0, %v8068_v6 }
 0x175   : > { %2836 = vst.msk [vmem:[#allocation2 + $0xd8] sm:$0xff] %vm535_vm1, %v7026_v17  ;;  %2837 = vst.msk [vmem:[#allocation2 + $0xe0] sm:$0xff] %vm535_vm1, %v7026_v17  ;;  %v6448_v51 = vpop.f32.mrf.mxu0  ;;  %v8275_v31 = vpop.f32.mrf.mxu1 }
 0x176   : > { %2839 = vst.msk [vmem:[#allocation2 + $0xf0] sm:$0xff] %vm535_vm1, %v7026_v17  ;;  %2840 = vst.msk [vmem:[#allocation2 + $0xf8] sm:$0xff] %vm535_vm1, %v7026_v17  ;;  %v8273_v6 = vadd.f32 %v6448_v51, %v8075_v47 }
 0x177   : > { %2842 = vst.msk [vmem:[#allocation2 + $0x108] sm:$0xff] %vm535_vm1, %v7026_v17  ;;  %2843 = vst.msk [vmem:[#allocation2 + $0x110] sm:$0xff] %vm535_vm1, %v7026_v17  ;;  %v8277_v2 = vpop.f32.mrf.mxu0  ;;  %v8279_v49 = vpop.f32.mrf.mxu1 }
 0x178   : > { %2845 = vst.msk [vmem:[#allocation2 + $0x120] sm:$0xff] %vm535_vm1, %v7026_v17  ;;  %2846 = vst.msk [vmem:[#allocation2 + $0x128] sm:$0xff] %vm535_vm1, %v7026_v17 }
 0x179   : > { %2848 = vst.msk [vmem:[#allocation2 + $0x138] sm:$0xff] %vm535_vm1, %v7026_v17  ;;  %2849 = vst.msk [vmem:[#allocation2 + $0x140] sm:$0xff] %vm535_vm1, %v7026_v17  ;;  %v6451_v13 = vpop.f32.mrf.mxu0 }
 0x17a   : > { %2851 = vst.msk [vmem:[#allocation2 + $0x150] sm:$0xff] %vm535_vm1, %v7026_v17  ;;  %2852 = vst.msk [vmem:[#allocation2 + $0x158] sm:$0xff] %vm535_vm1, %v7026_v17  ;;  %v8285_v0 = vadd.f32 %v6451_v13, %v8083_v9  ;;  %v8302_v13 = vld [vmem:[#allocation2] sm:$0xff] }
 0x17b   : > { %2854 = vst.msk [vmem:[#allocation2 + $0x168] sm:$0xff] %vm535_vm1, %v7026_v17  ;;  %2855 = vst.msk [vmem:[#allocation2 + $0x170] sm:$0xff] %vm535_vm1, %v7026_v17 }
 0x17c   : > { %2857 = vst.msk [vmem:[#allocation2 + $0x180] sm:$0xff] %vm535_vm1, %v7026_v17  ;;  %2858 = vst.msk [vmem:[#allocation2 + $0x188] sm:$0xff] %vm535_vm1, %v7026_v17 }
 0x17d   : > { %2860 = vst.msk [vmem:[#allocation2 + $0x198] sm:$0xff] %vm535_vm1, %v7026_v17  ;;  %2861 = vst.msk [vmem:[#allocation2 + $0x1a0] sm:$0xff] %vm535_vm1, %v7026_v17 }
 0x17e   : > { %10728 = vst [vmem:[#allocation14_spill] sm:$0xff] %v8245_v58  ;;  %10729 = vst [vmem:[#allocation16_spill] sm:$0xff] %v8247_v43 }
 0x17f   : > { %10730 = vst [vmem:[#allocation22_spill] sm:$0xff] %v8250_v20  ;;  %10731 = vst [vmem:[#allocation33_spill] sm:$0xff] %v8252_v23  ;;  %v8287_v23 = vpop.f32.mrf.mxu1 }
 0x180   : > { %2817 = vst.msk [vmem:[#allocation2 + $0x40] sm:$0x3] %vm2810_vm3, %v7026_v17  ;;  %2811 = vst.msk [vmem:[#allocation2 + $0x10] sm:$0x3] %vm2810_vm3, %v7026_v17 }
 0x181   : > { %2814 = vst.msk [vmem:[#allocation2 + $0x28] sm:$0x3] %vm2810_vm3, %v7026_v17  ;;  %2820 = vst.msk [vmem:[#allocation2 + $0x58] sm:$0x3] %vm2810_vm3, %v7026_v17  ;;  %v8292_v51 = vpop.f32.mrf.mxu1 }
 0x182   : > { %2823 = vst.msk [vmem:[#allocation2 + $0x70] sm:$0x3] %vm2810_vm3, %v7026_v17  ;;  %2826 = vst.msk [vmem:[#allocation2 + $0x88] sm:$0x3] %vm2810_vm3, %v7026_v17 }
 0x183   : > { %2829 = vst.msk [vmem:[#allocation2 + $0xa0] sm:$0x3] %vm2810_vm3, %v7026_v17  ;;  %2832 = vst.msk [vmem:[#allocation2 + $0xb8] sm:$0x3] %vm2810_vm3, %v7026_v17  ;;  %v8300_v9 = vpop.f32.mrf.mxu1 }
 0x184   : > { %2835 = vst.msk [vmem:[#allocation2 + $0xd0] sm:$0x3] %vm2810_vm3, %v7026_v17  ;;  %2838 = vst.msk [vmem:[#allocation2 + $0xe8] sm:$0x3] %vm2810_vm3, %v7026_v17 }
 0x185   : > { %2841 = vst.msk [vmem:[#allocation2 + $0x100] sm:$0x3] %vm2810_vm3, %v7026_v17  ;;  %2844 = vst.msk [vmem:[#allocation2 + $0x118] sm:$0x3] %vm2810_vm3, %v7026_v17 }
 0x186   : > { %2847 = vst.msk [vmem:[#allocation2 + $0x130] sm:$0x3] %vm2810_vm3, %v7026_v17  ;;  %2850 = vst.msk [vmem:[#allocation2 + $0x148] sm:$0x3] %vm2810_vm3, %v7026_v17 }
 0x187   : > { %2853 = vst.msk [vmem:[#allocation2 + $0x160] sm:$0x3] %vm2810_vm3, %v7026_v17  ;;  %2856 = vst.msk [vmem:[#allocation2 + $0x178] sm:$0x3] %vm2810_vm3, %v7026_v17 }
 0x188   : > { %2859 = vst.msk [vmem:[#allocation2 + $0x190] sm:$0x3] %vm2810_vm3, %v7026_v17  ;;  %2862 = vst.msk [vmem:[#allocation2 + $0x1a8] sm:$0x3] %vm2810_vm3, %v7026_v17  ;;  %v1664_v17 = vpop.f32.mrf.mxu0 }
 0x189   : > { %10732 = vst [vmem:[#allocation39_spill] sm:$0xff] %v8273_v6  ;;  %10733 = vst [vmem:[#allocation26_spill] sm:$0xff] %v8275_v31  ;;  %v8290_v47 = vadd.f32 %v1664_v17, %v8086_v55  ;;  %v3018_v17 = vrot.slane %v8302_v13, 1 }
 0x18a   : > { %10734 = vst [vmem:[#allocation32_spill] sm:$0xff] %v8279_v49  ;;  %10735 = vst [vmem:[#allocation36_spill] sm:$0xff] %v8285_v0  ;;  %v6983_v49 = vld [vmem:[%s10524_s3] sm:$0xff]   ;;  %v6452_v31 = vpop.f32.mrf.mxu0 }
 0x18b   : > { %10736 = vst [vmem:[#allocation15_spill] sm:$0xff] %v8287_v23  ;;  %10737 = vst [vmem:[#allocation19_spill] sm:$0xff] %v8290_v47  ;;  %v8298_v6 = vadd.f32 %v6452_v31, %v8093_v26  ;;  %6655 = vmatprep.subr.bf16.mxu0 %v6983_v49  ;;  %v8304_v23 = vld [vmem:[#allocation2 + $0x8] sm:$0xff]  ;;  %v8312_v47 = vld [vmem:[#allocation2 + $0x10] sm:$0x3]  ;;  %v8314_v26 = vpop.f32.mrf.mxu1 }
 0x18c   : > { %10738 = vst [vmem:[#allocation25_spill] sm:$0xff] %v8292_v51  ;;  %10740 = vst [vmem:[#allocation34_spill] sm:$0xff] %v8300_v9  ;;  %v8306_v33 = vpop.f32.mrf.mxu0  ;;  %6656 = vmatpush3.bf16.msra.mxu0 %v6983_v49  ;;  %v2950_v55 = vpack.c.bf16 %v8304_v23, %v8302_v13  ;;  %v3019_v51 = vrot.slane %v8304_v23, 1  ;;  %v3021_v31 = vrot.slane %v8312_v47, 1 }
 0x18d   : > { %10739 = vst [vmem:[#allocation27_spill] sm:$0xff] %v8298_v6  ;;  %10741 = vst [vmem:[#allocation35_spill] sm:$0xff] %v8314_v26  ;;  %v8321_v49 = vpop.f32.mrf.mxu1 }
 0x18e   : > { %v6455_v9 = vpop.f32.mrf.mxu0  ;;  %6657 = vmatprep.mubr.msk.bf16.mxu0 %vm535_vm1, %v2950_v55  ;;  %v3020_v0 = vsel %vm389_vm0, %v3018_v17, %v3019_v51  ;;  %v3022_v43 = vsel %vm389_vm0, %v3019_v51, %v3021_v31 }
 0x18f   : > { %v8319_v6 = vadd.f32 %v6455_v9, %v8101_v35  ;;  %v3130_v12 = vpack.c.bf16 %v3022_v43, %v3020_v0  ;;  %v8328_v26 = vpop.f32.mrf.mxu1 }
 0x190   : > { %v1680_v20 = vpop.f32.mrf.mxu0 }
 0x191   : > { %v8326_v58 = vadd.f32 %v1680_v20, %v8107_v40  ;;  %6621 = vmatprep.mubr.msk.bf16.mxu1 %vm535_vm1, %v3130_v12  ;;  %v8334_v35 = vpop.f32.mrf.mxu1  ;;  %v8348_v12 = vld [vmem:[%s10524_s3 + $0x28] sm:$0xff]  }
 0x192   : > { %v6456_v3 = vpop.f32.mrf.mxu0  ;;  %10745 = vst [vmem:[#allocation58_spill] sm:$0xff] %v8348_v12  ;;  %6689 = vmatprep.subr.bf16.mxu1 %v8348_v12 }
 0x193   : > { %v8332_v55 = vadd.f32 %v6456_v3, %v8114_v15  ;;  %v8338_v17 = vpop.f32.mrf.mxu1 }
 0x194   : > { %v8336_v9 = vpop.f32.mrf.mxu0  ;;  %10742 = vst [vmem:[#allocation45_spill] sm:$0xff] %v8338_v17 }
 0x195   : > { %v8343_v40 = vpop.f32.mrf.mxu1 }
 0x196   : > { %v6459_v51 = vpop.f32.mrf.mxu0  ;;  %10744 = vst [vmem:[#allocation57_spill] sm:$0xff] %v8343_v40 }
 0x197   : > { %v8341_v43 = vadd.f32 %v6459_v51, %v8122_v60  ;;  %v8353_v3 = vpop.f32.mrf.mxu1 }
 0x198   : > { %v1696_v20 = vpop.f32.mrf.mxu0  ;;  %10747 = vst [vmem:[#allocation60_spill] sm:$0xff] %v8353_v3 }
 0x199   : > { %10743 = vst [vmem:[#allocation56_spill] sm:$0xff] %v8341_v43  ;;  %v8351_v15 = vadd.f32 %v1696_v20, %v8125_v39  ;;  %v8359_v60 = vpop.f32.mrf.mxu1 }
 0x19a   : > { %v6460_v0 = vpop.f32.mrf.mxu0  ;;  %10749 = vst [vmem:[#allocation62_spill] sm:$0xff] %v8359_v60 }
 0x19b   : > { %10746 = vst [vmem:[#allocation59_spill] sm:$0xff] %v8351_v15  ;;  %v8357_v31 = vadd.f32 %v6460_v0, %v8131_v36  ;;  %v8363_v40 = vpop.f32.mrf.mxu1 }
 0x19c   : > { %v8361_v51 = vpop.f32.mrf.mxu0  ;;  %10750 = vst [vmem:[#allocation63_spill] sm:$0xff] %v8363_v40 }
 0x19d   : > { %10748 = vst [vmem:[#allocation61_spill] sm:$0xff] %v8357_v31  ;;  %v8368_v39 = vpop.f32.mrf.mxu1 }
 0x19e   : > { %v6463_v17 = vpop.f32.mrf.mxu0  ;;  %10752 = vst [vmem:[#allocation65_spill] sm:$0xff] %v8368_v39 }
 0x19f   : > { %v8366_v43 = vadd.f32 %v6463_v17, %v8139_v34  ;;  %v8373_v12 = vpop.f32.mrf.mxu1 }
 0x1a0   : > { %v1712_v20 = vpop.f32.mrf.mxu0  ;;  %10754 = vst [vmem:[#allocation67_spill] sm:$0xff] %v8373_v12 }
 0x1a1   : > { %10751 = vst [vmem:[#allocation64_spill] sm:$0xff] %v8366_v43  ;;  %v8371_v3 = vadd.f32 %v1712_v20, %v8142_v56  ;;  %v8378_v60 = vpop.f32.mrf.mxu1 }
 0x1a2   : > { %v6464_v36 = vpop.f32.mrf.mxu0  ;;  %10756 = vst [vmem:[#allocation69_spill] sm:$0xff] %v8378_v60 }
 0x1a3   : > { %10753 = vst [vmem:[#allocation66_spill] sm:$0xff] %v8371_v3  ;;  %v8376_v0 = vadd.f32 %v6464_v36, %v8148_v22  ;;  %v8382_v40 = vpop.f32.mrf.mxu1 }
 0x1a4   : > { %v8380_v31 = vpop.f32.mrf.mxu0  ;;  %10757 = vst [vmem:[#allocation70_spill] sm:$0xff] %v8382_v40 }
 0x1a5   : > { %10755 = vst [vmem:[#allocation68_spill] sm:$0xff] %v8376_v0  ;;  %v1949_v39 = vpop.f32.mrf.mxu1 }
 0x1a6   : > { %v6467_v34 = vpop.f32.mrf.mxu0 }
 0x1a7   : > { %v8385_v17 = vadd.f32 %v6467_v34, %v8156_v63  ;;  %v6504_v20 = vpop.f32.mrf.mxu1 }
 0x1a8   : > { %v1728_v43 = vpop.f32.mrf.mxu0 }
 0x1a9   : > { %10758 = vst [vmem:[#allocation71_spill] sm:$0xff] %v8385_v17  ;;  %v1783_v56 = vadd.f32 %v1728_v43, %v8159_v10  ;;  %v8391_v36 = vpop.f32.mrf.mxu1 }
 0x1aa   : > { %v6468_v12 = vpop.f32.mrf.mxu0 }
 0x1ab   : > { %v1786_v3 = vadd.f32 %v6468_v12, %v8165_v30  ;;  %v8389_v22 = vadd.f32 %v1949_v39, %v1783_v56  ;;  %v8397_v40 = vpop.f32.mrf.mxu1 }
 0x1ac   : > { %v8393_v60 = vpop.f32.mrf.mxu0  ;;  %10759 = vst [vmem:[#allocation72_spill] sm:$0xff] %v8397_v40 }
 0x1ad   : > { %v8395_v0 = vadd.f32 %v6504_v20, %v1786_v3  ;;  %v1965_v17 = vpop.f32.mrf.mxu1 }
 0x1ae   : > { %v6471_v63 = vpop.f32.mrf.mxu0 }
 0x1af   : > { %v8400_v34 = vadd.f32 %v6471_v63, %v8173_v57  ;;  %v6508_v15 = vpop.f32.mrf.mxu1 }
 0x1b0   : > { %v1744_v10 = vpop.f32.mrf.mxu0 }
 0x1b1   : > { %10760 = vst [vmem:[#allocation73_spill] sm:$0xff] %v8400_v34  ;;  %v1787_v43 = vadd.f32 %v1744_v10, %v8179_v11  ;;  %v8406_v56 = vpop.f32.mrf.mxu1 }
 0x1b2   : > { %v6472_v30 = vpop.f32.mrf.mxu0 }
 0x1b3   : > { %v1790_v12 = vadd.f32 %v6472_v30, %v8185_v28  ;;  %v8404_v39 = vadd.f32 %v1965_v17, %v1787_v43  ;;  %v8412_v40 = vpop.f32.mrf.mxu1 }
 0x1b4   : > { %v8408_v3 = vpop.f32.mrf.mxu0  ;;  %10763 = vst [vmem:[#allocation76_spill] sm:$0xff] %v8412_v40 }
 0x1b5   : > { %10761 = vst [vmem:[#allocation74_spill] sm:$0xff] %v8404_v39  ;;  %v8410_v20 = vadd.f32 %v6508_v15, %v1790_v12  ;;  %v8416_v63 = vpop.f32.mrf.mxu1 }
 0x1b6   : > { %v8414_v57 = vpop.f32.mrf.mxu0  ;;  %10764 = vst [vmem:[#allocation77_spill] sm:$0xff] %v8416_v63 }
 0x1b7   : > { %10762 = vst [vmem:[#allocation75_spill] sm:$0xff] %v8410_v20  ;;  %v8420_v11 = vpop.f32.mrf.mxu1 }
 0x1b8   : > { %v8418_v34 = vpop.f32.mrf.mxu0  ;;  %10765 = vst [vmem:[#allocation78_spill] sm:$0xff] %v8420_v11 }
 0x1b9   : > { %v8424_v28 = vpop.f32.mrf.mxu1 }
 0x1ba   : > { %v8422_v10 = vpop.f32.mrf.mxu0  ;;  %10766 = vst [vmem:[#allocation79_spill] sm:$0xff] %v8424_v28 }
 0x1bb   : > { %v8428_v43 = vpop.f32.mrf.mxu1 }
 0x1bc   : > { %v8426_v17 = vpop.f32.mrf.mxu0  ;;  %10768 = vst [vmem:[#allocation81_spill] sm:$0xff] %v8428_v43 }
 0x1bd   : > { %10767 = vst [vmem:[#allocation80_spill] sm:$0xff] %v8426_v17  ;;  %v8432_v30 = vpop.f32.mrf.mxu1 }
 0x1be   : > { %v8430_v15 = vpop.f32.mrf.mxu0  ;;  %10770 = vst [vmem:[#allocation83_spill] sm:$0xff] %v8432_v30 }
 0x1bf   : > { %10769 = vst [vmem:[#allocation82_spill] sm:$0xff] %v8430_v15  ;;  %v8436_v20 = vpop.f32.mrf.mxu1 }
 0x1c0   : > { %v8434_v12 = vpop.f32.mrf.mxu0  ;;  %10772 = vst [vmem:[#allocation85_spill] sm:$0xff] %v8436_v20 }
 0x1c1   : > { %10771 = vst [vmem:[#allocation84_spill] sm:$0xff] %v8434_v12  ;;  %v8440_v63 = vpop.f32.mrf.mxu1 }
 0x1c2   : > { %v8438_v39 = vpop.f32.mrf.mxu0  ;;  %10774 = vst [vmem:[#allocation87_spill] sm:$0xff] %v8440_v63 }
 0x1c3   : > { %10773 = vst [vmem:[#allocation86_spill] sm:$0xff] %v8438_v39  ;;  %v8444_v40 = vpop.f32.mrf.mxu1 }
 0x1c4   : > { %v8442_v11 = vpop.f32.mrf.mxu0  ;;  %10775 = vst [vmem:[#allocation88_spill] sm:$0xff] %v8444_v40  ;;  %v8467_v40 = vld [vmem:[%s10524_s3 + $0x38] sm:$0xff]  }
 0x1c5   : > { %v8448_v17 = vpop.f32.mrf.mxu1  ;;  %10785 = vst [vmem:[#allocation98_spill] sm:$0xff] %v8467_v40  ;;  %6725 = vmatprep.subr.bf16.mxu0 %v8467_v40 }
 0x1c6   : > { %v8446_v28 = vpop.f32.mrf.mxu0  ;;  %10777 = vst [vmem:[#allocation90_spill] sm:$0xff] %v8448_v17 }
 0x1c7   : > { %10776 = vst [vmem:[#allocation89_spill] sm:$0xff] %v8446_v28  ;;  %v8452_v15 = vpop.f32.mrf.mxu1 }
 0x1c8   : > { %v8450_v43 = vpop.f32.mrf.mxu0  ;;  %10779 = vst [vmem:[#allocation92_spill] sm:$0xff] %v8452_v15 }
 0x1c9   : > { %10778 = vst [vmem:[#allocation91_spill] sm:$0xff] %v8450_v43  ;;  %v8456_v12 = vpop.f32.mrf.mxu1 }
 0x1ca   : > { %v8454_v30 = vpop.f32.mrf.mxu0  ;;  %10781 = vst [vmem:[#allocation94_spill] sm:$0xff] %v8456_v12  ;;  %v3593_v12 = vrot.slane %v8302_v13, 2 }
 0x1cb   : > { %10780 = vst [vmem:[#allocation93_spill] sm:$0xff] %v8454_v30  ;;  %v8460_v39 = vpop.f32.mrf.mxu1 }
 0x1cc   : > { %v8458_v20 = vpop.f32.mrf.mxu0  ;;  %10783 = vst [vmem:[#allocation96_spill] sm:$0xff] %v8460_v39 }
 0x1cd   : > { %10782 = vst [vmem:[#allocation95_spill] sm:$0xff] %v8458_v20  ;;  %v8469_v17 = vpop.f32.mrf.mxu1  ;;  %v3594_v20 = vrot.slane %v8304_v23, 2 }
 0x1ce   : > { %v8462_v63 = vpop.f32.mrf.mxu0  ;;  %10786 = vst [vmem:[#allocation99_spill] sm:$0xff] %v8469_v17 }
 0x1cf   : > { %10784 = vst [vmem:[#allocation97_spill] sm:$0xff] %v8462_v63  ;;  %v8474_v15 = vpop.f32.mrf.mxu1  ;;  %v8487_v17 = vsel %vm966_vm2, %v3593_v12, %v3594_v20 }
 0x1d0   : > { %v8471_v43 = vpop.f32.mrf.mxu0  ;;  %10788 = vst [vmem:[#allocation101_spill] sm:$0xff] %v8474_v15  ;;  %10793 = vst [vmem:[#allocation106_spill] sm:$0xff] %v8487_v17  ;;  %v10801_v17 = vld [vmem:[#allocation9_spill] sm:$0xff] }
 0x1d1   : > { %10787 = vst [vmem:[#allocation100_spill] sm:$0xff] %v8471_v43  ;;  %v8480_v63 = vpop.f32.mrf.mxu1  ;;  %v3596_v43 = vrot.slane %v8312_v47, 2 }
 0x1d2   : > { %v8478_v39 = vpop.f32.mrf.mxu0  ;;  %10790 = vst [vmem:[#allocation103_spill] sm:$0xff] %v8480_v63  ;;  %v939_v63 = vadd.f32 %v8023_v32, %v8025_v62  ;;  %v1540_v32 = vadd.f32 %v8070_v24, %v8073_v46 }
 0x1d3   : > { %10789 = vst [vmem:[#allocation102_spill] sm:$0xff] %v8478_v39  ;;  %v8484_v28 = vpop.f32.mrf.mxu1  ;;  %v8495_v13 = vsel %vm966_vm2, %v3594_v20, %v3596_v43  ;;  %v907_v20 = vadd.f32 %v7980_v7, %v7982_v61  ;;  %v923_v43 = vadd.f32 %v8001_v19, %v8003_v45 }
 0x1d4   : > { %v8482_v30 = vpop.f32.mrf.mxu0  ;;  %10792 = vst [vmem:[#allocation105_spill] sm:$0xff] %v8484_v28  ;;  %10796 = vst [vmem:[#allocation109_spill] sm:$0xff] %v8495_v13  ;;  %v955_v13 = vadd.f32 %v10801_v17, %v8039_v8  ;;  %v1346_v19 = vadd.f32 %v8163_v41, %v939_v63  ;;  %v1764_v41 = vadd.f32 %v8277_v2, %v1540_v32  ;;  %v8561_v2 = vstv %s2710_s13  ;;  %v10804_v63 = vld [vmem:[#allocation11_spill] sm:$0xff]  ;;  %v10805_v17 = vld [vmem:[#allocation22_spill] sm:$0xff] }
 0x1d5   : > { %10791 = vst [vmem:[#allocation104_spill] sm:$0xff] %v8482_v30  ;;  %v8492_v15 = vpop.f32.mrf.mxu1  ;;  %v1342_v7 = vadd.f32 %v8146_v27, %v923_v43  ;;  %v10810_v43 = vld [vmem:[#allocation36_spill] sm:$0xff] }
 0x1d6   : > { %v8490_v40 = vpop.f32.mrf.mxu0  ;;  %10795 = vst [vmem:[#allocation108_spill] sm:$0xff] %v8492_v15  ;;  %v1350_v45 = vadd.f32 %v8183_v42, %v955_v13  ;;  %v1560_v24 = vadd.f32 %v8161_v52, %v1346_v19  ;;  %v10803_v52 = vld [vmem:[#allocation14_spill] sm:$0xff]  ;;  %v10813_v19 = vld [vmem:[#allocation15_spill] sm:$0xff] }
 0x1d7   : > { %10794 = vst [vmem:[#allocation107_spill] sm:$0xff] %v8490_v40  ;;  %v8501_v30 = vpop.f32.mrf.mxu1  ;;  %v1556_v27 = vadd.f32 %v8144_v21, %v1342_v7  ;;  %v10812_v7 = vld [vmem:[#allocation19_spill] sm:$0xff] }
 0x1d8   : > { %v8497_v23 = vpop.f32.mrf.mxu0  ;;  %10797 = vst [vmem:[#allocation110_spill] sm:$0xff] %v8501_v30  ;;  %v1338_v30 = vadd.f32 %v8129_v5, %v907_v20  ;;  %v1564_v46 = vadd.f32 %v8181_v14, %v1350_v45  ;;  %v1986_v14 = vadd.f32 %v10804_v63, %v10803_v52  ;;  %v1988_v45 = vadd.f32 %v10813_v19, %v10812_v7  ;;  %v10816_v63 = vld [vmem:[#allocation34_spill] sm:$0xff] }
 0x1d9   : > { %v8505_v12 = vpop.f32.mrf.mxu1 }
 0x1da   : > { %v8503_v28 = vpop.f32.mrf.mxu0  ;;  %10798 = vst [vmem:[#allocation111_spill] sm:$0xff] %v8505_v12  ;;  %v1552_v5 = vadd.f32 %v8127_v37, %v1338_v30  ;;  %v10802_v37 = vld [vmem:[#allocation10_spill] sm:$0xff]  ;;  %v10806_v30 = vld [vmem:[#allocation16_spill] sm:$0xff] }
 0x1db   : > { %v8509_v47 = vpop.f32.mrf.mxu1 }
 0x1dc   : > { %v8507_v39 = vpop.f32.mrf.mxu0  ;;  %10799 = vst [vmem:[#allocation112_spill] sm:$0xff] %v8509_v47  ;;  %v1536_v47 = vadd.f32 %v8052_v50, %v8055_v25  ;;  %v1544_v50 = vadd.f32 %v8088_v16, %v8091_v1  ;;  %v1548_v25 = vadd.f32 %v8109_v29, %v8112_v53  ;;  %v1982_v16 = vadd.f32 %v8187_v54, %v8190_v48  ;;  %v10807_v48 = vld [vmem:[#allocation39_spill] sm:$0xff] }
 0x1dd   : > { %v8517_v15 = vpop.f32.mrf.mxu1  ;;  %v1980_v29 = vadd.f32 %v8192_v4, %v8195_v59  ;;  %v1983_v53 = vadd.f32 %v8197_v44, %v8200_v18  ;;  %v1984_v54 = vadd.f32 %v10806_v30, %v10805_v17  ;;  %v10809_v4 = vld [vmem:[#allocation26_spill] sm:$0xff]  ;;  %v10811_v44 = vld [vmem:[#allocation32_spill] sm:$0xff] }
 0x1de   : > { %v8511_v40 = vpop.f32.mrf.mxu0  ;;  %10800 = vst [vmem:[#allocation113_spill] sm:$0xff] %v8517_v15  ;;  %v1760_v62 = vadd.f32 %v8204_v38, %v1536_v47  ;;  %v1768_v1 = vadd.f32 %v8306_v33, %v1544_v50  ;;  %v10808_v33 = vld [vmem:[#allocation33_spill] sm:$0xff]  ;;  %v1772_v47 = vadd.f32 %v8336_v9, %v1548_v25  ;;  %v1985_v59 = vadd.f32 %v10809_v4, %v1764_v41  ;;  %v10814_v50 = vld [vmem:[#allocation27_spill] sm:$0xff] }
 0x1df   : > { %v8529_v61 = vpop.f32.mrf.mxu1  ;;  %v1987_v13 = vadd.f32 %v10808_v33, %v10807_v48  ;;  %v1990_v18 = vadd.f32 %v10811_v44, %v10810_v43  ;;  %v10817_v9 = vld [vmem:[#allocation35_spill] sm:$0xff]  ;;  %v1776_v41 = vadd.f32 %v8361_v51, %v1552_v5  ;;  %v1992_v48 = vadd.f32 %v8321_v49, %v8326_v58  ;;  %v10818_v43 = vld [vmem:[#allocation56_spill] sm:$0xff]  ;;  %v10819_v58 = vld [vmem:[#allocation45_spill] sm:$0xff] }
 0x1e0   : > { %v8523_v12 = vpop.f32.mrf.mxu0  ;;  %v1981_v21 = vadd.f32 %v10802_v37, %v1760_v62  ;;  %v10815_v37 = vld [vmem:[#allocation25_spill] sm:$0xff]  ;;  %v1989_v17 = vadd.f32 %v10816_v63, %v1768_v1  ;;  %v1994_v25 = vadd.f32 %v10817_v9, %v8319_v6  ;;  %v1780_v33 = vadd.f32 %v8380_v31, %v1556_v27  ;;  %v10820_v31 = vld [vmem:[#allocation59_spill] sm:$0xff]  ;;  %v10829_v63 = vld [vmem:[#allocation68_spill] sm:$0xff] }
 0x1e1   : > { %v8547_v42 = vpop.f32.mrf.mxu1  ;;  %v1991_v52 = vadd.f32 %v10815_v37, %v10814_v50  ;;  %v1995_v4 = vadd.f32 %v8328_v26, %v8332_v55  ;;  %v1993_v1 = vadd.f32 %v8334_v35, %v1772_v47  ;;  %v1788_v6 = vadd.f32 %v8408_v3, %v1564_v46  ;;  %v10821_v27 = vld [vmem:[#allocation57_spill] sm:$0xff]  ;;  %v10824_v55 = vld [vmem:[#allocation62_spill] sm:$0xff]  ;;  %v10825_v3 = vld [vmem:[#allocation64_spill] sm:$0xff] }
 0x1e2   : > { %v8533_v15 = vpop.f32.mrf.mxu0  ;;  %v2196_v51 = vadd.f32 %v8414_v57, %v1982_v16  ;;  %v1998_v49 = vadd.f32 %v10819_v58, %v10818_v43  ;;  %v2194_v7 = vadd.f32 %v8418_v34, %v1980_v29  ;;  %v1997_v35 = vadd.f32 %v10824_v55, %v1776_v41  ;;  %v10826_v46 = vld [vmem:[#allocation63_spill] sm:$0xff]  ;;  %v10827_v16 = vld [vmem:[#allocation66_spill] sm:$0xff]  ;;  %v10828_v47 = vld [vmem:[#allocation65_spill] sm:$0xff] }
 0x1e3   : > { %v8578_v62 = vpop.f32.mrf.mxu1  ;;  %v2002_v57 = vadd.f32 %v10826_v46, %v10825_v3  ;;  %v2000_v19 = vadd.f32 %v10828_v47, %v10827_v16  ;;  %v2197_v50 = vadd.f32 %v8422_v10, %v1983_v53  ;;  %v10830_v9 = vld [vmem:[#allocation67_spill] sm:$0xff]  ;;  %v10831_v43 = vld [vmem:[#allocation69_spill] sm:$0xff]  ;;  %v10833_v58 = vld [vmem:[#allocation70_spill] sm:$0xff]  ;;  %v8636_v10 = vadd.f32 %v8406_v56, %v1788_v6 }
 0x1e4   : > { %v8540_v8 = vpop.f32.mrf.mxu0  ;;  %v8622_v34 = vadd.f32 %v10831_v43, %v1780_v33  ;;  %v10832_v29 = vld [vmem:[#allocation71_spill] sm:$0xff]  ;;  %v10837_v53 = vld [vmem:[#allocation76_spill] sm:$0xff]  ;;  %v10839_v16 = vld [vmem:[#allocation77_spill] sm:$0xff] }
 0x1e5   : > { %v8607_v26 = vpop.f32.mrf.mxu1  ;;  %v8626_v41 = vadd.f32 %v10833_v58, %v10832_v29  ;;  %10836 = vst [vmem:[#allocation9_spill] sm:$0xff] %v8636_v10  ;;  %v2420_v55 = vadd.f32 %v10837_v53, %v2196_v51  ;;  %v10838_v3 = vld [vmem:[#allocation80_spill] sm:$0xff]  ;;  %v2418_v47 = vadd.f32 %v10839_v16, %v2194_v7  ;;  %v10846_v56 = vld [vmem:[#allocation86_spill] sm:$0xff]  ;;  %v2199_v51 = vadd.f32 %v8442_v11, %v1985_v59  ;;  %v10847_v53 = vld [vmem:[#allocation89_spill] sm:$0xff] }
 0x1e6   : > { %v8554_v38 = vpop.f32.mrf.mxu0  ;;  %v2195_v46 = vadd.f32 %v10838_v3, %v1981_v21  ;;  %v10841_v43 = vld [vmem:[#allocation84_spill] sm:$0xff]  ;;  %v2201_v6 = vadd.f32 %v10846_v56, %v1987_v13  ;;  %v2204_v21 = vadd.f32 %v10847_v53, %v1990_v18  ;;  %v10848_v10 = vld [vmem:[#allocation91_spill] sm:$0xff]  ;;  %v10849_v16 = vld [vmem:[#allocation93_spill] sm:$0xff] }
 0x1e7   : > { %v2198_v29 = vadd.f32 %v10841_v43, %v1984_v54  ;;  %v2202_v7 = vadd.f32 %v10848_v10, %v1988_v45  ;;  %v10851_v43 = vld [vmem:[#allocation75_spill] sm:$0xff]  ;;  %v10855_v56 = vld [vmem:[#allocation102_spill] sm:$0xff]  ;;  %v10856_v18 = vld [vmem:[#allocation81_spill] sm:$0xff] }
 0x1e8   : > { %v2163_v20 = vpop.f32.mrf.mxu0  ;;  %v2209_v11 = vadd.f32 %v10855_v56, %v1995_v4  ;;  %v10857_v45 = vld [vmem:[#allocation83_spill] sm:$0xff]  ;;  %v10862_v4 = vld [vmem:[#allocation88_spill] sm:$0xff]  ;;  %v10865_v56 = vld [vmem:[#allocation94_spill] sm:$0xff] }
 0x1e9   : > { %v8576_v32 = vadd.f32 %v2163_v20, %v8389_v22  ;;  %v1784_v22 = vadd.f32 %v8393_v60, %v1560_v24  ;;  %v1996_v60 = vadd.f32 %v10821_v27, %v10820_v31  ;;  %v10822_v24 = vld [vmem:[#allocation61_spill] sm:$0xff]  ;;  %v8666_v10 = vadd.f32 %v10857_v45, %v2198_v29 }
 0x1ea   : > { %v6540_v30 = vpop.f32.mrf.mxu0  ;;  %v10834_v27 = vld [vmem:[#allocation73_spill] sm:$0xff] }
 0x1eb   : > { %v8591_v20 = vadd.f32 %v6540_v30, %v8395_v0  ;;  %v10823_v0 = vld [vmem:[#allocation60_spill] sm:$0xff]  ;;  %v8619_v30 = vadd.f32 %v10830_v9, %v10829_v63  ;;  %v8629_v31 = vadd.f32 %v8391_v36, %v1784_v22  ;;  %v10840_v63 = vld [vmem:[#allocation82_spill] sm:$0xff]  ;;  %v8643_v36 = vpop.f32.mrf.mxu1 }
 0x1ec   : > { %v8598_v5 = vpop.f32.mrf.mxu0  ;;  %v1999_v44 = vadd.f32 %v10823_v0, %v10822_v24  ;;  %v10835_v24 = vld [vmem:[#allocation72_spill] sm:$0xff]  ;;  %v2200_v9 = vadd.f32 %v10840_v63, %v1986_v14  ;;  %10842 = vst [vmem:[#allocation10_spill] sm:$0xff] %v8643_v36  ;;  %v10843_v22 = vld [vmem:[#allocation74_spill] sm:$0xff]  ;;  %v2205_v14 = vadd.f32 %v10849_v16, %v1991_v52  ;;  %v10850_v63 = vld [vmem:[#allocation95_spill] sm:$0xff] }
 0x1ed   : > { %v8633_v0 = vadd.f32 %v10835_v24, %v10834_v27  ;;  %v10845_v27 = vld [vmem:[#allocation78_spill] sm:$0xff]  ;;  %v2203_v54 = vadd.f32 %v10850_v63, %v1989_v17  ;;  %v10858_v52 = vld [vmem:[#allocation104_spill] sm:$0xff]  ;;  %v10859_v16 = vld [vmem:[#allocation107_spill] sm:$0xff]  ;;  %v8670_v63 = vpop.f32.mrf.mxu1 }
 0x1ee   : > { %v8615_v37 = vpop.f32.mrf.mxu0  ;;  %v2421_v24 = vadd.f32 %v10845_v27, %v2197_v50  ;;  %v10854_v27 = vld [vmem:[#allocation100_spill] sm:$0xff]  ;;  %v2424_v53 = vadd.f32 %v10856_v18, %v2200_v9  ;;  %v2207_v17 = vadd.f32 %v10858_v52, %v1993_v1  ;;  %v2210_v9 = vadd.f32 %v8497_v23, %v1996_v60  ;;  %v10867_v23 = vld [vmem:[#allocation99_spill] sm:$0xff]  ;;  %v10868_v52 = vld [vmem:[#allocation101_spill] sm:$0xff] }
 0x1ef   : > { %v2206_v13 = vadd.f32 %v10854_v27, %v1992_v48  ;;  %v8685_v1 = vld [vmem:[%s10523_s2] ss:$0 sm:$0xff] }
 0x1f0   : > { %v2179_v33 = vpop.f32.mrf.mxu0  ;;  %v10864_v27 = vld [vmem:[#allocation92_spill] sm:$0xff] }
 0x1f1   : > { %v8646_v58 = vadd.f32 %v2179_v33, %v10843_v22  ;;  %v10852_v33 = vld [vmem:[#allocation79_spill] sm:$0xff]  ;;  %v8700_v60 = vadd.f32 %v10867_v23, %v2206_v13 }
 0x1f2   : > { %v6544_v3 = vpop.f32.mrf.mxu0  ;;  %v2419_v22 = vadd.f32 %v10852_v33, %v2195_v46  ;;  %v10860_v46 = vld [vmem:[#allocation85_spill] sm:$0xff] }
 0x1f3   : > { %10844 = vst [vmem:[#allocation14_spill] sm:$0xff] %v8646_v58  ;;  %v8656_v36 = vadd.f32 %v6544_v3, %v10851_v43  ;;  %v10853_v58 = vld [vmem:[#allocation97_spill] sm:$0xff]  ;;  %v2212_v3 = vadd.f32 %v10859_v16, %v1998_v49  ;;  %v8673_v43 = vadd.f32 %v10860_v46, %v2201_v6  ;;  %v10863_v49 = vld [vmem:[#allocation90_spill] sm:$0xff]  ;;  %v8691_v6 = vadd.f32 %v10864_v27, %v2205_v14 }
 0x1f4   : > { %v2208_v50 = vadd.f32 %v10853_v58, %v1994_v25  ;;  %v8662_v59 = vpop.f32.mrf.mxu0  ;;  %v10861_v25 = vld [vmem:[#allocation87_spill] sm:$0xff]  ;;  %v8679_v58 = vadd.f32 %v10862_v4, %v2204_v21  ;;  %v8688_v29 = vadd.f32 %v10863_v49, %v2202_v7  ;;  %v10866_v21 = vld [vmem:[#allocation96_spill] sm:$0xff]  ;;  %v8703_v16 = vadd.f32 %v10868_v52, %v2209_v11  ;;  %v10870_v14 = vld [vmem:[#allocation105_spill] sm:$0xff] }
 0x1f5   : > { %v8676_v48 = vadd.f32 %v10861_v25, %v2199_v51  ;;  %v8694_v51 = vadd.f32 %v10865_v56, %v2203_v54  ;;  %v2213_v46 = vadd.f32 %v8503_v28, %v1999_v44  ;;  %v10869_v25 = vld [vmem:[#allocation103_spill] sm:$0xff]  ;;  %v8710_v49 = vadd.f32 %v10870_v14, %v2212_v3  ;;  %v8712_v54 = vpop.f32.mrf.mxu1  ;;  %v10874_v52 = vld [vmem:[#allocation112_spill] sm:$0xff] }
 0x1f6   : > { %v6587_v33 = vpop.f32.mrf.mxu0  ;;  %v8697_v45 = vadd.f32 %v10866_v21, %v2208_v50  ;;  %v8707_v4 = vadd.f32 %v10869_v25, %v2207_v17  ;;  %v2211_v11 = vadd.f32 %v8507_v39, %v1997_v35  ;;  %v2216_v27 = vadd.f32 %v8511_v40, %v2002_v57  ;;  %v10872_v21 = vld [vmem:[#allocation110_spill] sm:$0xff] }
 0x1f7   : > { %v2641_v18 = vadd.f32 %v6587_v33, %v2420_v55  ;;  %v10871_v33 = vld [vmem:[#allocation108_spill] sm:$0xff]  ;;  %v2214_v28 = vadd.f32 %v8523_v12, %v2000_v19  ;;  %v8724_v23 = vadd.f32 %v10872_v21, %v2213_v46  ;;  %v2215_v39 = vadd.f32 %v8540_v8, %v8622_v34  ;;  %v2403_v35 = vpop.f32.mrf.mxu1 }
 0x1f8   : > { %v2512_v7 = vpop.f32.mrf.mxu0  ;;  %v8716_v13 = vadd.f32 %v10871_v33, %v2210_v9  ;;  %v2220_v40 = vadd.f32 %v8554_v38, %v8626_v41  ;;  %v10873_v9 = vld [vmem:[#allocation111_spill] sm:$0xff]  ;;  %v8738_v46 = vadd.f32 %v10874_v52, %v2216_v27 }
 0x1f9   : > { %v2680_v55 = vadd.f32 %v8685_v1, %v2641_v18  ;;  %v2639_v50 = vadd.f32 %v2512_v7, %v2418_v47  ;;  %v2217_v47 = vadd.f32 %v8533_v15, %v8619_v30  ;;  %v8735_v18 = vadd.f32 %v10873_v9, %v2211_v11  ;;  %v10875_v15 = vld [vmem:[#allocation113_spill] sm:$0xff]  ;;  %v6580_v11 = vpop.f32.mrf.mxu1 }
 0x1fa   : > { %v6588_v44 = vpop.f32.mrf.mxu0  ;;  %v8741_v30 = vadd.f32 %v10875_v15, %v2214_v28  ;;  %v8749_v14 = vadd.f32 %v8547_v42, %v2215_v39  ;;  %v8756_v33 = vadd.f32 %v8578_v62, %v2220_v40  ;;  %v8762_v42 = vadd.f32 %v8607_v26, %v8576_v32 }
 0x1fb   : > { %vm2713_vm4 = vcmp.ge.f32.partialorder %v2680_v55, 0.0  ;;  %v2746_v17 = vmul.f32 %v8561_v2, %v2680_v55  ;;  %v2678_v3 = vadd.f32 %v8685_v1, %v2639_v50  ;;  %v2642_v56 = vadd.f32 %v6588_v44, %v2421_v24  ;;  %v2406_v21 = vpop.f32.mrf.mxu1 }
 0x1fc   : > { %v2515_v12 = vpop.f32.mrf.mxu0  ;;  %v8746_v25 = vadd.f32 %v8529_v61, %v2217_v47 }
 0x1fd   : > { %v2778_v57 = vsel %vm2713_vm4, %v2680_v55, %v2746_v17  ;;  %vm2711_vm5 = vcmp.ge.f32.partialorder %v2678_v3, 0.0  ;;  %v2744_v19 = vmul.f32 %v8561_v2, %v2678_v3  ;;  %v2681_v24 = vadd.f32 %v8685_v1, %v2642_v56  ;;  %v10876_v17 = vld [vmem:[#allocation10_spill] sm:$0xff] }
 0x1fe   : > { %2866 = vst.msk [vmem:[#allocation2 + $0x31] sm:$0xff] %vm535_vm1, %v2778_v57  ;;  %v2640_v8 = vadd.f32 %v2515_v12, %v2419_v22  ;;  %v6591_v38 = vpop.f32.mrf.mxu0  ;;  %v2219_v55 = vadd.f32 %v8598_v5, %v8629_v31  ;;  %v2224_v5 = vadd.f32 %v8615_v37, %v8633_v0  ;;  %v8773_v32 = vadd.f32 %v10876_v17, %v8591_v20  ;;  %v10877_v37 = vld [vmem:[#allocation9_spill] sm:$0xff] }
 0x1ff   : > { %v2776_v34 = vsel %vm2711_vm5, %v2678_v3, %v2744_v19  ;;  %vm2714_vm6 = vcmp.ge.f32.partialorder %v2681_v24, 0.0  ;;  %v2747_v41 = vmul.f32 %v8561_v2, %v2681_v24  ;;  %v2645_v7 = vadd.f32 %v6591_v38, %v2424_v53 }
 0x200   : > { %2864 = vst.msk [vmem:[#allocation2 + $0x19] sm:$0xff] %vm535_vm1, %v2776_v34  ;;  %v2679_v50 = vadd.f32 %v8685_v1, %v2640_v8  ;;  %v2528_v22 = vpop.f32.mrf.mxu0  ;;  %v8776_v26 = vadd.f32 %v8670_v63, %v2219_v55  ;;  %v2223_v0 = vadd.f32 %v8662_v59, %v10877_v37  ;;  %v8786_v20 = vadd.f32 %v8712_v54, %v2224_v5  ;;  %v10878_v63 = vld [vmem:[#allocation14_spill] sm:$0xff] }
 0x201   : > { %v2779_v27 = vsel %vm2714_vm6, %v2681_v24, %v2747_v41  ;;  %v2684_v53 = vadd.f32 %v8685_v1, %v2645_v7  ;;  %v2643_v61 = vadd.f32 %v2528_v22, %v8666_v10  ;;  %v8789_v12 = vadd.f32 %v2403_v35, %v10878_v63 }
 0x202   : > { %2867 = vst.msk [vmem:[#allocation2 + $0x39] sm:$0xff] %vm535_vm1, %v2779_v27  ;;  %vm2712_vm7 = vcmp.ge.f32.partialorder %v2679_v50, 0.0  ;;  %v2745_v31 = vmul.f32 %v8561_v2, %v2679_v50  ;;  %v6592_v62 = vpop.f32.mrf.mxu0  ;;  %v8792_v59 = vadd.f32 %v6580_v11, %v8656_v36  ;;  %v8800_v54 = vadd.f32 %v2406_v21, %v2223_v0 }
 0x203   : > { %vm2717_vm8 = vcmp.ge.f32.partialorder %v2684_v53, 0.0  ;;  %v2750_v28 = vmul.f32 %v8561_v2, %v2684_v53  ;;  %v2682_v44 = vadd.f32 %v8685_v1, %v2643_v61  ;;  %v2646_v10 = vadd.f32 %v6592_v62, %v8673_v43 }
 0x204   : > { %v2777_v3 = vsel %vm2712_vm7, %v2679_v50, %v2745_v31  ;;  %v2531_v56 = vpop.f32.mrf.mxu0 }
 0x205   : > { %2865 = vst.msk [vmem:[#allocation2 + $0x21] sm:$0xff] %vm535_vm1, %v2777_v3  ;;  %v2782_v47 = vsel %vm2717_vm8, %v2684_v53, %v2750_v28  ;;  %vm2715_vm9 = vcmp.ge.f32.partialorder %v2682_v44, 0.0  ;;  %v2748_v39 = vmul.f32 %v8561_v2, %v2682_v44  ;;  %v2685_v43 = vadd.f32 %v8685_v1, %v2646_v10  ;;  %v8783_v40 = vld [vmem:[#allocation2 + $0x30] sm:$0xff] }
 0x206   : > { %2870 = vst.msk [vmem:[#allocation2 + $0x61] sm:$0xff] %vm535_vm1, %v2782_v47  ;;  %v2644_v57 = vadd.f32 %v2531_v56, %v8676_v48  ;;  %v6595_v19 = vpop.f32.mrf.mxu0  ;;  %v3028_v8 = vrot.slane %v8783_v40, 1 }
 0x207   : > { %v2780_v24 = vsel %vm2715_vm9, %v2682_v44, %v2748_v39  ;;  %vm2718_vm10 = vcmp.ge.f32.partialorder %v2685_v43, 0.0  ;;  %v2751_v9 = vmul.f32 %v8561_v2, %v2685_v43  ;;  %v2649_v52 = vadd.f32 %v6595_v19, %v8679_v58  ;;  %v8798_v15 = vld [vmem:[#allocation2 + $0x18] sm:$0xff]  ;;  %v6987_v19 = vld [vmem:[%s10524_s3 + $0x30] sm:$0xff]  }
 0x208   : > { %2868 = vst.msk [vmem:[#allocation2 + $0x49] sm:$0xff] %vm535_vm1, %v2780_v24  ;;  %v2683_v36 = vadd.f32 %v8685_v1, %v2644_v57  ;;  %v2544_v35 = vpop.f32.mrf.mxu0  ;;  %v3023_v58 = vrot.slane %v8798_v15, 1 }
 0x209   : > { %v2783_v38 = vsel %vm2718_vm10, %v2685_v43, %v2751_v9  ;;  %v2688_v34 = vadd.f32 %v8685_v1, %v2649_v52  ;;  %v2647_v41 = vadd.f32 %v2544_v35, %v8688_v29  ;;  %v8809_v7 = vld [vmem:[#allocation2 + $0x38] sm:$0xff]  ;;  %v8811_v55 = vld [vmem:[#allocation2 + $0x40] sm:$0x3] }
 0x20a   : > { %2871 = vst.msk [vmem:[#allocation2 + $0x69] sm:$0xff] %vm535_vm1, %v2783_v38  ;;  %vm2716_vm11 = vcmp.ge.f32.partialorder %v2683_v36, 0.0  ;;  %v2749_v50 = vmul.f32 %v8561_v2, %v2683_v36  ;;  %v6596_v22 = vpop.f32.mrf.mxu0  ;;  %v3029_v27 = vrot.slane %v8809_v7, 1  ;;  %v8824_v28 = vpack.c.bf16 %v8809_v7, %v8783_v40 }
 0x20b   : > { %vm2721_vm12 = vcmp.ge.f32.partialorder %v2688_v34, 0.0  ;;  %v2754_v53 = vmul.f32 %v8561_v2, %v2688_v34  ;;  %v2686_v29 = vadd.f32 %v8685_v1, %v2647_v41  ;;  %v2650_v61 = vadd.f32 %v6596_v22, %v8691_v6 }
 0x20c   : > { %v2781_v5 = vsel %vm2716_vm11, %v2683_v36, %v2749_v50  ;;  %v2547_v31 = vpop.f32.mrf.mxu0  ;;  %v8820_v62 = vld [vmem:[#allocation2 + $0x20] sm:$0xff]  ;;  %v3031_v10 = vrot.slane %v8811_v55, 1  ;;  %v8831_v0 = vld [vmem:[#allocation2 + $0x28] sm:$0x3]  ;;  %v3030_v39 = vsel %vm389_vm0, %v3028_v8, %v3029_v27 }
 0x20d   : > { %2869 = vst.msk [vmem:[#allocation2 + $0x51] sm:$0xff] %vm535_vm1, %v2781_v5  ;;  %v2786_v17 = vsel %vm2721_vm12, %v2688_v34, %v2754_v53  ;;  %vm2719_vm13 = vcmp.ge.f32.partialorder %v2686_v29, 0.0  ;;  %v2752_v37 = vmul.f32 %v8561_v2, %v2686_v29  ;;  %v2689_v6 = vadd.f32 %v8685_v1, %v2650_v61  ;;  %v6985_v5 = vld [vmem:[%s10524_s3 + $0x20] sm:$0xff]  }
 0x20e   : > { %2874 = vst.msk [vmem:[#allocation2 + $0x91] sm:$0xff] %vm535_vm1, %v2786_v17  ;;  %v2648_v3 = vadd.f32 %v2547_v31, %v8694_v51  ;;  %v6599_v56 = vpop.f32.mrf.mxu0  ;;  %v8837_v21 = vpack.c.bf16 %v8820_v62, %v8798_v15  ;;  %v3024_v47 = vrot.slane %v8820_v62, 1  ;;  %v3026_v52 = vrot.slane %v8831_v0, 1 }
 0x20f   : > { %v2784_v43 = vsel %vm2719_vm13, %v2686_v29, %v2752_v37  ;;  %vm2722_vm14 = vcmp.ge.f32.partialorder %v2689_v6, 0.0  ;;  %v2755_v63 = vmul.f32 %v8561_v2, %v2689_v6  ;;  %v2653_v57 = vadd.f32 %v6599_v56, %v8697_v45  ;;  %v8858_v34 = vld [vmem:[#allocation2 + $0x48] sm:$0xff]  ;;  %v8883_v56 = vld [vmem:[%s10524_s3 + $0x58] sm:$0xff]  }
 0x210   : > { %2872 = vst.msk [vmem:[#allocation2 + $0x79] sm:$0xff] %vm535_vm1, %v2784_v43  ;;  %v2687_v51 = vadd.f32 %v8685_v1, %v2648_v3  ;;  %6658 = vmatmul.mubr.msk.bf16.vlgmr.msra.gmra.mxu0 %vm535_vm1, %v8837_v21  ;;  %v2560_v24 = vpop.f32.mrf.mxu0  ;;  %v3025_v9 = vsel %vm389_vm0, %v3023_v58, %v3024_v47  ;;  %v3032_v36 = vsel %vm389_vm0, %v3029_v27, %v3031_v10  ;;  %v10880_v27 = vld [vmem:[#allocation98_spill] sm:$0xff]  ;;  %10882 = vst [vmem:[#allocation16_spill] sm:$0xff] %v8883_v56  ;;  %v8890_v43 = vld [vmem:[#allocation2 + $0x60] sm:$0xff] }
 0x211   : > { %v2787_v35 = vsel %vm2722_vm14, %v2689_v6, %v2755_v63  ;;  %v2692_v45 = vadd.f32 %v8685_v1, %v2653_v57  ;;  %6661 = vmatprep.mubr.msk.bf16.mxu0 %vm535_vm1, %v8824_v28  ;;  %v2651_v38 = vadd.f32 %v2560_v24, %v8700_v60  ;;  %v3027_v58 = vsel %vm389_vm0, %v3024_v47, %v3026_v52  ;;  %v8870_v61 = vld [vmem:[#allocation2 + $0x68] sm:$0xff]  ;;  %v10883_v63 = vld [vmem:[#allocation58_spill] sm:$0xff] }
 0x212   : > { %2875 = vst.msk [vmem:[#allocation2 + $0x99] sm:$0xff] %vm535_vm1, %v2787_v35  ;;  %vm2720_vm15 = vcmp.ge.f32.partialorder %v2687_v51, 0.0  ;;  %v2753_v41 = vmul.f32 %v8561_v2, %v2687_v51  ;;  %v6600_v50 = vpop.f32.mrf.mxu0  ;;  %v8863_v22 = vpack.c.bf16 %v3032_v36, %v3030_v39  ;;  %6726 = vmatpush3.bf16.msra.mxu0 %v10880_v27  ;;  %v8868_v60 = vpack.c.bf16 %v3027_v58, %v3025_v9 }
 0x213   : > { %vm2725_vm3 = vcmp.ge.f32.partialorder %v2692_v45, 0.0  ;;  %v2758_v53 = vmul.f32 %v8561_v2, %v2692_v45  ;;  %v2690_v29 = vadd.f32 %v8685_v1, %v2651_v38  ;;  %6727 = vmatprep.subr.bf16.mxu0 %v6987_v19  ;;  %v2654_v10 = vadd.f32 %v6600_v50, %v8703_v16 }
 0x214   : > { %10879 = vst [vmem:[#allocation11_spill] sm:$0xff] %v8863_v22  ;;  %10881 = vst [vmem:[#allocation22_spill] sm:$0xff] %v8868_v60  ;;  %v2785_v31 = vsel %vm2720_vm15, %v2687_v51, %v2753_v41  ;;  %v2563_v17 = vpop.f32.mrf.mxu0  ;;  %v8876_v37 = vld [vmem:[#allocation2 + $0x50] sm:$0xff]  ;;  %v3033_v6 = vrot.slane %v8858_v34, 1  ;;  %6622 = vmatmul.mubr.msk.bf16.vlgmr.msra.gmra.mxu1 %vm535_vm1, %v8868_v60  ;;  %v8909_v38 = vld [vmem:[#allocation2 + $0x58] sm:$0x3] }
 0x215   : > { %2873 = vst.msk [vmem:[#allocation2 + $0x81] sm:$0xff] %vm535_vm1, %v2785_v31  ;;  %v2790_v47 = vsel %vm2725_vm3, %v2692_v45, %v2758_v53  ;;  %vm2723_vm4 = vcmp.ge.f32.partialorder %v2690_v29, 0.0  ;;  %v2756_v39 = vmul.f32 %v8561_v2, %v2690_v29  ;;  %v2652_v16 = vadd.f32 %v2563_v17, %v8707_v4  ;;  %6690 = vmatpush3.bf16.msra.mxu1 %v10883_v63  ;;  %v8914_v41 = vld [vmem:[%s10524_s3 + $0x48] sm:$0xff]   ;;  %v8928_v31 = vld [vmem:[#allocation2 + $0x70] sm:$0x3] }
 0x216   : > { %2878 = vst.msk [vmem:[#allocation2 + $0xc1] sm:$0xff] %vm535_vm1, %v2790_v47  ;;  %v2693_v57 = vadd.f32 %v8685_v1, %v2654_v10  ;;  %6625 = vmatprep.mubr.msk.bf16.mxu1 %vm535_vm1, %v8863_v22  ;;  %v6603_v51 = vpop.f32.mrf.mxu0  ;;  %v8899_v24 = vpack.c.bf16 %v8876_v37, %v8858_v34  ;;  %v3034_v9 = vrot.slane %v8876_v37, 1  ;;  %v8904_v4 = vpack.c.bf16 %v8870_v61, %v8890_v43 }
 0x217   : > { %v2788_v52 = vsel %vm2723_vm4, %v2690_v29, %v2756_v39  ;;  %v2691_v36 = vadd.f32 %v8685_v1, %v2652_v16  ;;  %v2657_v35 = vadd.f32 %v6603_v51, %v8710_v49  ;;  %6691 = vmatprep.subr.bf16.mxu1 %v6985_v5  ;;  %6728 = vmatpush3.bf16.msra.mxu0 %v6987_v19  ;;  %v3038_v49 = vrot.slane %v8890_v43, 1 }
 0x218   : > { %10884 = vst [vmem:[#allocation39_spill] sm:$0xff] %v8904_v4  ;;  %10885 = vst [vmem:[#allocation33_spill] sm:$0xff] %v8914_v41  ;;  %vm2726_vm5 = vcmp.ge.f32.partialorder %v2693_v57, 0.0  ;;  %v2759_v58 = vmul.f32 %v8561_v2, %v2693_v57  ;;  %6662 = vmatmul.mubr.msk.bf16.gmra.mxu0 %vm535_vm1, %v8899_v24  ;;  %v3039_v50 = vrot.slane %v8870_v61, 1  ;;  %v2576_v27 = vpop.f32.mrf.mxu0  ;;  %6797 = vmatprep.subr.bf16.mxu0 %v8883_v56  ;;  %v3036_v39 = vrot.slane %v8909_v38, 1 }
 0x219   : > { %2876 = vst.msk [vmem:[#allocation2 + $0xa9] sm:$0xff] %vm535_vm1, %v2788_v52  ;;  %vm2724_vm6 = vcmp.ge.f32.partialorder %v2691_v36, 0.0  ;;  %v2757_v19 = vmul.f32 %v8561_v2, %v2691_v36  ;;  %v2696_v53 = vadd.f32 %v8685_v1, %v2657_v35  ;;  %6665 = vmatprep.mubr.msk.bf16.mxu0 %vm535_vm1, %v8904_v4  ;;  %v2655_v17 = vadd.f32 %v2576_v27, %v8716_v13 }
 0x21a   : > { %v2791_v10 = vsel %vm2726_vm5, %v2693_v57, %v2759_v58  ;;  %v3035_v47 = vsel %vm389_vm0, %v3033_v6, %v3034_v9  ;;  %v6604_v16 = vpop.f32.mrf.mxu0  ;;  %6692 = vmatpush3.bf16.msra.mxu1 %v6985_v5  ;;  %v3037_v6 = vsel %vm389_vm0, %v3034_v9, %v3036_v39  ;;  %v3040_v57 = vsel %vm389_vm0, %v3038_v49, %v3039_v50 }
 0x21b   : > { %2879 = vst.msk [vmem:[#allocation2 + $0xc9] sm:$0xff] %vm535_vm1, %v2791_v10  ;;  %v2789_v63 = vsel %vm2724_vm6, %v2691_v36, %v2757_v19  ;;  %vm2729_vm7 = vcmp.ge.f32.partialorder %v2696_v53, 0.0  ;;  %v2762_v51 = vmul.f32 %v8561_v2, %v2696_v53  ;;  %v2658_v52 = vadd.f32 %v6604_v16, %v8724_v23  ;;  %6761 = vmatprep.subr.bf16.mxu1 %v8914_v41  ;;  %v8948_v10 = vld [vmem:[#allocation2 + $0x78] sm:$0xff] }
 0x21c   : > { %2877 = vst.msk [vmem:[#allocation2 + $0xb1] sm:$0xff] %vm535_vm1, %v2789_v63  ;;  %v2694_v13 = vadd.f32 %v8685_v1, %v2655_v17  ;;  %v3041_v5 = vrot.slane %v8928_v31, 1  ;;  %v2579_v35 = vpop.f32.mrf.mxu0  ;;  %v8942_v58 = vld [vmem:[#allocation2 + $0x80] sm:$0xff]  ;;  %v8944_v27 = vpack.c.bf16 %v3037_v6, %v3035_v47  ;;  %v8963_v16 = vld [vmem:[#allocation2 + $0x98] sm:$0xff]  ;;  %v8970_v6 = vld [vmem:[#allocation2 + $0x90] sm:$0xff] }
 0x21d   : > { %v2794_v36 = vsel %vm2729_vm7, %v2696_v53, %v2762_v51  ;;  %v2697_v23 = vadd.f32 %v8685_v1, %v2658_v52  ;;  %v2656_v19 = vadd.f32 %v2579_v35, %v8735_v18  ;;  %v8955_v39 = vpack.c.bf16 %v8942_v58, %v8948_v10 }
 0x21e   : > { %10886 = vst [vmem:[#allocation26_spill] sm:$0xff] %v8944_v27  ;;  %2882 = vst.msk [vmem:[#allocation2 + $0xf1] sm:$0xff] %vm535_vm1, %v2794_v36  ;;  %vm2727_vm8 = vcmp.ge.f32.partialorder %v2694_v13, 0.0  ;;  %v2760_v9 = vmul.f32 %v8561_v2, %v2694_v13  ;;  %v3042_v49 = vsel %vm389_vm0, %v3039_v50, %v3041_v5  ;;  %v6607_v17 = vpop.f32.mrf.mxu0  ;;  %6626 = vmatmul.mubr.msk.bf16.gmra.mxu1 %vm535_vm1, %v8944_v27  ;;  %v3044_v52 = vrot.slane %v8942_v58, 1 }
 0x21f   : > { %10887 = vst [vmem:[#allocation36_spill] sm:$0xff] %v8955_v39  ;;  %vm2730_vm9 = vcmp.ge.f32.partialorder %v2697_v23, 0.0  ;;  %v2763_v18 = vmul.f32 %v8561_v2, %v2697_v23  ;;  %v8960_v53 = vpack.c.bf16 %v3042_v49, %v3040_v57  ;;  %v2695_v47 = vadd.f32 %v8685_v1, %v2656_v19 }
 0x220   : > { %v2792_v50 = vsel %vm2727_vm8, %v2694_v13, %v2760_v9  ;;  %v2661_v51 = vadd.f32 %v6607_v17, %v8738_v46  ;;  %6666 = vmatmul.mubr.msk.bf16.gmra.mxu0 %vm535_vm1, %v8955_v39  ;;  %v2592_v5 = vpop.f32.mrf.mxu0  ;;  %v3043_v13 = vrot.slane %v8948_v10, 1  ;;  %v8983_v9 = vpack.c.bf16 %v8963_v16, %v8970_v6  ;;  %v8987_v17 = vld [vmem:[#allocation2 + $0xa0] sm:$0x3] }
 0x221   : > { %10888 = vst [vmem:[#allocation32_spill] sm:$0xff] %v8960_v53  ;;  %2880 = vst.msk [vmem:[#allocation2 + $0xd9] sm:$0xff] %vm535_vm1, %v2792_v50  ;;  %v2795_v57 = vsel %vm2730_vm9, %v2697_v23, %v2763_v18  ;;  %6629 = vmatprep.mubr.msk.bf16.mxu1 %vm535_vm1, %v8960_v53  ;;  %vm2728_vm10 = vcmp.ge.f32.partialorder %v2695_v47, 0.0  ;;  %v2761_v35 = vmul.f32 %v8561_v2, %v2695_v47  ;;  %v8985_v23 = vld [vmem:[#allocation2 + $0x88] sm:$0x3]  ;;  %v3048_v50 = vrot.slane %v8970_v6, 1 }
 0x222   : > { %2883 = vst.msk [vmem:[#allocation2 + $0xf9] sm:$0xff] %vm535_vm1, %v2795_v57  ;;  %v2700_v46 = vadd.f32 %v8685_v1, %v2661_v51  ;;  %10889 = vst [vmem:[#allocation19_spill] sm:$0xff] %v8983_v9  ;;  %v6608_v49 = vpop.f32.mrf.mxu0  ;;  %v3049_v57 = vrot.slane %v8963_v16, 1  ;;  %6669 = vmatprep.mubr.msk.bf16.mxu0 %vm535_vm1, %v8983_v9  ;;  %v2659_v19 = vadd.f32 %v2592_v5, %v8741_v30  ;;  %v3046_v63 = vrot.slane %v8985_v23, 1 }
 0x223   : > { %v2793_v18 = vsel %vm2728_vm10, %v2695_v47, %v2761_v35  ;;  %v8992_v29 = vld [vmem:[#allocation2 + $0xb0] sm:$0xff]  ;;  %v3045_v47 = vsel %vm389_vm0, %v3043_v13, %v3044_v52  ;;  %v2662_v3 = vadd.f32 %v6608_v49, %v8746_v25  ;;  %v3051_v45 = vrot.slane %v8987_v17, 1 }
 0x224   : > { %2881 = vst.msk [vmem:[#allocation2 + $0xe1] sm:$0xff] %vm535_vm1, %v2793_v18  ;;  %vm2733_vm11 = vcmp.ge.f32.partialorder %v2700_v46, 0.0  ;;  %v2766_v36 = vmul.f32 %v8561_v2, %v2700_v46  ;;  %v2595_v35 = vpop.f32.mrf.mxu0  ;;  %v3050_v51 = vsel %vm389_vm0, %v3048_v50, %v3049_v57  ;;  %v9004_v18 = vld [vmem:[#allocation2 + $0xa8] sm:$0xff]  ;;  %v2698_v44 = vadd.f32 %v8685_v1, %v2659_v19 }
 0x225   : > { %v2660_v11 = vadd.f32 %v2595_v35, %v8749_v14  ;;  %v9010_v30 = vpack.c.bf16 %v8992_v29, %v9004_v18  ;;  %v3047_v25 = vsel %vm389_vm0, %v3044_v52, %v3046_v63  ;;  %v2701_v5 = vadd.f32 %v8685_v1, %v2662_v3  ;;  %v9027_v63 = vld [vmem:[#allocation2 + $0xc8] sm:$0xff] }
 0x226   : > { %v2798_v48 = vsel %vm2733_vm11, %v2700_v46, %v2766_v36  ;;  %v6611_v8 = vpop.f32.mrf.mxu0  ;;  %v3052_v13 = vsel %vm389_vm0, %v3049_v57, %v3051_v45  ;;  %vm2731_vm12 = vcmp.ge.f32.partialorder %v2698_v44, 0.0  ;;  %v2764_v46 = vmul.f32 %v8561_v2, %v2698_v44  ;;  %v9034_v57 = vld [vmem:[#allocation2 + $0xc0] sm:$0xff] }
 0x227   : > { %10890 = vst [vmem:[#allocation15_spill] sm:$0xff] %v9010_v30  ;;  %2886 = vst.msk [vmem:[#allocation2 + $0x121] sm:$0xff] %vm535_vm1, %v2798_v48  ;;  %v2665_v49 = vadd.f32 %v6611_v8, %v8756_v33  ;;  %v9018_v36 = vpack.c.bf16 %v3047_v25, %v3045_v47  ;;  %v9020_v14 = vpack.c.bf16 %v3052_v13, %v3050_v51  ;;  %vm2734_vm13 = vcmp.ge.f32.partialorder %v2701_v5, 0.0 }
 0x228   : > { %6670 = vmatmul.mubr.msk.bf16.gmra.mxu0 %vm535_vm1, %v9010_v30  ;;  %v2608_v19 = vpop.f32.mrf.mxu0  ;;  %v2767_v48 = vmul.f32 %v8561_v2, %v2701_v5  ;;  %v2699_v3 = vadd.f32 %v8685_v1, %v2660_v11  ;;  %v2796_v8 = vsel %vm2731_vm12, %v2698_v44, %v2764_v46  ;;  %v3053_v52 = vrot.slane %v9004_v18, 1  ;;  %v9040_v44 = vld [vmem:[#allocation2 + $0xb8] sm:$0x3] }
 0x229   : > { %10891 = vst [vmem:[#allocation27_spill] sm:$0xff] %v9018_v36  ;;  %10892 = vst [vmem:[#allocation25_spill] sm:$0xff] %v9020_v14  ;;  %v2704_v45 = vadd.f32 %v8685_v1, %v2665_v49  ;;  %6630 = vmatmul.mubr.msk.bf16.gmra.mxu1 %vm535_vm1, %v9018_v36  ;;  %v3054_v50 = vrot.slane %v8992_v29, 1  ;;  %v9050_v49 = vld [vmem:[#allocation2 + $0xd0] sm:$0x3]  ;;  %v3059_v33 = vrot.slane %v9027_v63, 1  ;;  %v2663_v13 = vadd.f32 %v2608_v19, %v8762_v42 }
 0x22a   : > { %v6612_v51 = vpop.f32.mrf.mxu0  ;;  %2884 = vst.msk [vmem:[#allocation2 + $0x109] sm:$0xff] %vm535_vm1, %v2796_v8  ;;  %v2799_v11 = vsel %vm2734_vm13, %v2701_v5, %v2767_v48  ;;  %6633 = vmatprep.mubr.msk.bf16.mxu1 %vm535_vm1, %v9020_v14  ;;  %vm2732_vm14 = vcmp.ge.f32.partialorder %v2699_v3, 0.0  ;;  %v2765_v47 = vmul.f32 %v8561_v2, %v2699_v3  ;;  %v9048_v5 = vpack.c.bf16 %v9027_v63, %v9034_v57 }
 0x22b   : > { %vm2737_vm15 = vcmp.ge.f32.partialorder %v2704_v45, 0.0  ;;  %2887 = vst.msk [vmem:[#allocation2 + $0x129] sm:$0xff] %vm535_vm1, %v2799_v11  ;;  %v2770_v35 = vmul.f32 %v8561_v2, %v2704_v45  ;;  %v3058_v8 = vrot.slane %v9034_v57, 1  ;;  %v9055_v14 = vld [vmem:[#allocation2 + $0xe0] sm:$0xff]  ;;  %v3055_v36 = vsel %vm389_vm0, %v3053_v52, %v3054_v50 }
 0x22c   : > { %10893 = vst [vmem:[#allocation34_spill] sm:$0xff] %v9048_v5  ;;  %v2611_v46 = vpop.f32.mrf.mxu0  ;;  %v2797_v48 = vsel %vm2732_vm14, %v2699_v3, %v2765_v47  ;;  %6673 = vmatprep.mubr.msk.bf16.mxu0 %vm535_vm1, %v9048_v5  ;;  %v3056_v3 = vrot.slane %v9040_v44, 1  ;;  %v2666_v53 = vadd.f32 %v6612_v51, %v8773_v32  ;;  %v3061_v27 = vrot.slane %v9050_v49, 1 }
 0x22d   : > { %2885 = vst.msk [vmem:[#allocation2 + $0x111] sm:$0xff] %vm535_vm1, %v2797_v48  ;;  %v2802_v25 = vsel %vm2737_vm15, %v2704_v45, %v2770_v35  ;;  %v3060_v11 = vsel %vm389_vm0, %v3058_v8, %v3059_v33  ;;  %v2664_v45 = vadd.f32 %v2611_v46, %v8776_v26  ;;  %v9068_v35 = vld [vmem:[#allocation2 + $0xd8] sm:$0xff]  ;;  %v2702_v48 = vadd.f32 %v8685_v1, %v2663_v13 }
 0x22e   : > { %v6615_v47 = vpop.f32.mrf.mxu0  ;;  %2890 = vst.msk [vmem:[#allocation2 + $0x151] sm:$0xff] %vm535_vm1, %v2802_v25  ;;  %v3057_v42 = vsel %vm389_vm0, %v3054_v50, %v3056_v3  ;;  %v9075_v52 = vpack.c.bf16 %v9055_v14, %v9068_v35  ;;  %v2705_v51 = vadd.f32 %v8685_v1, %v2666_v53  ;;  %v3062_v8 = vsel %vm389_vm0, %v3059_v33, %v3061_v27  ;;  %v9105_v33 = vld [vmem:[#allocation2 + $0x100] sm:$0x3] }
 0x22f   : > { %v2669_v19 = vadd.f32 %v6615_v47, %v8786_v20  ;;  %v9077_v32 = vpack.c.bf16 %v3057_v42, %v3055_v36  ;;  %v2703_v26 = vadd.f32 %v8685_v1, %v2664_v45  ;;  %vm2735_vm3 = vcmp.ge.f32.partialorder %v2702_v48, 0.0  ;;  %v9092_v36 = vld [vmem:[#allocation2 + $0xf8] sm:$0xff]  ;;  %v9098_v47 = vld [vmem:[#allocation2 + $0xf0] sm:$0xff] }
 0x230   : > { %10894 = vst [vmem:[#allocation35_spill] sm:$0xff] %v9075_v52  ;;  %v2624_v25 = vpop.f32.mrf.mxu0  ;;  %v2768_v13 = vmul.f32 %v8561_v2, %v2702_v48  ;;  %v9083_v46 = vpack.c.bf16 %v3062_v8, %v3060_v11  ;;  %6674 = vmatmul.mubr.msk.bf16.gmra.mxu0 %vm535_vm1, %v9075_v52  ;;  %vm2738_vm4 = vcmp.ge.f32.partialorder %v2705_v51, 0.0  ;;  %v2771_v53 = vmul.f32 %v8561_v2, %v2705_v51 }
 0x231   : > { %10895 = vst [vmem:[#allocation56_spill] sm:$0xff] %v9077_v32  ;;  %v2708_v20 = vadd.f32 %v8685_v1, %v2669_v19  ;;  %6634 = vmatmul.mubr.msk.bf16.gmra.mxu1 %vm535_vm1, %v9077_v32  ;;  %vm2736_vm5 = vcmp.ge.f32.partialorder %v2703_v26, 0.0  ;;  %v2769_v27 = vmul.f32 %v8561_v2, %v2703_v26  ;;  %v3063_v19 = vrot.slane %v9068_v35, 1  ;;  %v9103_v32 = vld [vmem:[#allocation2 + $0xe8] sm:$0x3] }
 0x232   : > { %10896 = vst [vmem:[#allocation45_spill] sm:$0xff] %v9083_v46  ;;  %v6616_v50 = vpop.f32.mrf.mxu0  ;;  %v2800_v11 = vsel %vm2735_vm3, %v2702_v48, %v2768_v13  ;;  %6637 = vmatprep.mubr.msk.bf16.mxu1 %vm535_vm1, %v9083_v46  ;;  %v2803_v45 = vsel %vm2738_vm4, %v2705_v51, %v2771_v53  ;;  %v3064_v8 = vrot.slane %v9055_v14, 1  ;;  %v9113_v51 = vpack.c.bf16 %v9092_v36, %v9098_v47 }
 0x233   : > { %vm2741_vm6 = vcmp.ge.f32.partialorder %v2708_v20, 0.0  ;;  %v2774_v3 = vmul.f32 %v8561_v2, %v2708_v20  ;;  %2888 = vst.msk [vmem:[#allocation2 + $0x139] sm:$0xff] %vm535_vm1, %v2800_v11  ;;  %v2801_v42 = vsel %vm2736_vm5, %v2703_v26, %v2769_v27  ;;  %2891 = vst.msk [vmem:[#allocation2 + $0x159] sm:$0xff] %vm535_vm1, %v2803_v45  ;;  %v3068_v27 = vrot.slane %v9098_v47, 1 }
 0x234   : > { %2889 = vst.msk [vmem:[#allocation2 + $0x141] sm:$0xff] %vm535_vm1, %v2801_v42  ;;  %10897 = vst [vmem:[#allocation59_spill] sm:$0xff] %v9113_v51  ;;  %v2627_v26 = vpop.f32.mrf.mxu0  ;;  %v9115_v53 = vld [vmem:[#allocation2 + $0x110] sm:$0xff]  ;;  %v3069_v11 = vrot.slane %v9092_v36, 1  ;;  %6677 = vmatprep.mubr.msk.bf16.mxu0 %vm535_vm1, %v9113_v51  ;;  %v3066_v42 = vrot.slane %v9103_v32, 1  ;;  %v2670_v13 = vadd.f32 %v6616_v50, %v8792_v59  ;;  %v3071_v46 = vrot.slane %v9105_v33, 1 }
 0x235   : > { %v2806_v48 = vsel %vm2741_vm6, %v2708_v20, %v2774_v3  ;;  %v2667_v20 = vadd.f32 %v2624_v25, %v8789_v12  ;;  %v3065_v3 = vsel %vm389_vm0, %v3063_v19, %v3064_v8  ;;  %v2668_v45 = vadd.f32 %v2627_v26, %v8800_v54  ;;  %v9141_v51 = vld [vmem:[#allocation2 + $0x128] sm:$0xff] }
 0x236   : > { %2894 = vst.msk [vmem:[#allocation2 + $0x181] sm:$0xff] %vm535_vm1, %v2806_v48  ;;  %v9128_v48 = vld [vmem:[#allocation2 + $0x108] sm:$0xff]  ;;  %v3070_v60 = vsel %vm389_vm0, %v3068_v27, %v3069_v11  ;;  %v3067_v19 = vsel %vm389_vm0, %v3064_v8, %v3066_v42  ;;  %v2709_v59 = vadd.f32 %v8685_v1, %v2670_v13  ;;  %v3072_v50 = vsel %vm389_vm0, %v3069_v11, %v3071_v46  ;;  %v9153_v46 = vld [vmem:[#allocation2 + $0x120] sm:$0xff]  ;;  %v9155_v11 = vld [vmem:[#allocation2 + $0x130] sm:$0x3] }
 0x237   : > { %v2706_v22 = vadd.f32 %v8685_v1, %v2667_v20  ;;  %v9135_v12 = vpack.c.bf16 %v9115_v53, %v9128_v48  ;;  %v9144_v27 = vpack.c.bf16 %v3067_v19, %v3065_v3  ;;  %v9146_v54 = vpack.c.bf16 %v3072_v50, %v3070_v60  ;;  %v9165_v50 = vld [vmem:[#allocation2 + $0x118] sm:$0x3] }
 0x238   : > { %vm2742_vm8 = vcmp.ge.f32.partialorder %v2709_v59, 0.0  ;;  %v2775_v26 = vmul.f32 %v8561_v2, %v2709_v59  ;;  %v2707_v8 = vadd.f32 %v8685_v1, %v2668_v45  ;;  %v3074_v13 = vrot.slane %v9115_v53, 1 }
 0x239   : > { %10898 = vst [vmem:[#allocation57_spill] sm:$0xff] %v9135_v12  ;;  %vm2739_vm7 = vcmp.ge.f32.partialorder %v2706_v22, 0.0  ;;  %v2772_v20 = vmul.f32 %v8561_v2, %v2706_v22  ;;  %10899 = vst [vmem:[#allocation61_spill] sm:$0xff] %v9144_v27  ;;  %6678 = vmatmul.mubr.msk.bf16.gmra.mxu0 %vm535_vm1, %v9135_v12  ;;  %6638 = vmatmul.mubr.msk.bf16.gmra.mxu1 %vm535_vm1, %v9144_v27  ;;  %v3073_v60 = vrot.slane %v9128_v48, 1  ;;  %v3078_v25 = vrot.slane %v9153_v46, 1  ;;  %v9191_v12 = vld [vmem:[#allocation2 + $0x150] sm:$0xff] }
 0x23a   : > { %10900 = vst [vmem:[#allocation60_spill] sm:$0xff] %v9146_v54  ;;  %v9163_v19 = vpack.c.bf16 %v9141_v51, %v9153_v46  ;;  %v2807_v45 = vsel %vm2742_vm8, %v2709_v59, %v2775_v26  ;;  %6641 = vmatprep.mubr.msk.bf16.mxu1 %vm535_vm1, %v9146_v54  ;;  %vm2740_vm9 = vcmp.ge.f32.partialorder %v2707_v8, 0.0  ;;  %v9174_v3 = vld [vmem:[#allocation2 + $0x138] sm:$0xff]  ;;  %v3079_v27 = vrot.slane %v9141_v51, 1 }
 0x23b   : > { %v2804_v42 = vsel %vm2739_vm7, %v2706_v22, %v2772_v20  ;;  %v9167_v1 = vld [vmem:[#allocation2 + $0x140] sm:$0xff]  ;;  %v2773_v22 = vmul.f32 %v8561_v2, %v2707_v8  ;;  %2895 = vst.msk [vmem:[#allocation2 + $0x189] sm:$0xff] %vm535_vm1, %v2807_v45  ;;  %v3075_v26 = vsel %vm389_vm0, %v3073_v60, %v3074_v13  ;;  %v3076_v20 = vrot.slane %v9165_v50, 1 }
 0x23c   : > { %10901 = vst [vmem:[#allocation62_spill] sm:$0xff] %v9163_v19  ;;  %2892 = vst.msk [vmem:[#allocation2 + $0x169] sm:$0xff] %vm535_vm1, %v2804_v42  ;;  %6681 = vmatprep.mubr.msk.bf16.mxu0 %vm535_vm1, %v9163_v19  ;;  %v9183_v42 = vld [vmem:[#allocation2 + $0x158] sm:$0xff]  ;;  %v3081_v54 = vrot.slane %v9155_v11, 1  ;;  %v9189_v45 = vpack.c.bf16 %v9167_v1, %v9174_v3  ;;  %v3080_v59 = vsel %vm389_vm0, %v3078_v25, %v3079_v27  ;;  %v3083_v60 = vrot.slane %v9174_v3, 1 }
 0x23d   : > { %v2805_v2 = vsel %vm2740_vm9, %v2707_v8, %v2773_v22  ;;  %v3084_v8 = vrot.slane %v9167_v1, 1  ;;  %v9198_v22 = vld [vmem:[#allocation2 + $0x148] sm:$0x3]  ;;  %v3077_v52 = vsel %vm389_vm0, %v3074_v13, %v3076_v20  ;;  %v9205_v9 = vpack.c.bf16 %v9183_v42, %v9191_v12 }
 0x23e   : > { %10902 = vst [vmem:[#allocation64_spill] sm:$0xff] %v9189_v45  ;;  %2893 = vst.msk [vmem:[#allocation2 + $0x171] sm:$0xff] %vm535_vm1, %v2805_v2  ;;  %v3082_v5 = vsel %vm389_vm0, %v3079_v27, %v3081_v54  ;;  %v9207_v2 = vld [vmem:[#allocation2 + $0x160] sm:$0x3]  ;;  %v9209_v19 = vpack.c.bf16 %v3077_v52, %v3075_v26  ;;  %v3088_v41 = vrot.slane %v9191_v12, 1  ;;  %v3089_v13 = vrot.slane %v9183_v42, 1 }
 0x23f   : > { %10903 = vst [vmem:[#allocation63_spill] sm:$0xff] %v9205_v9  ;;  %v9216_v27 = vpack.c.bf16 %v3082_v5, %v3080_v59  ;;  %v3085_v20 = vsel %vm389_vm0, %v3083_v60, %v3084_v8  ;;  %v3086_v52 = vrot.slane %v9198_v22, 1  ;;  %v3091_v30 = vrot.slane %v9207_v2, 1 }
 0x240   : > { %10904 = vst [vmem:[#allocation66_spill] sm:$0xff] %v9209_v19  ;;  %v3090_v26 = vsel %vm389_vm0, %v3088_v41, %v3089_v13  ;;  %v10906_v5 = vrot.slane %v8820_v62, 2  ;;  %v10907_v59 = vrot.slane %v8798_v15, 2  ;;  %v3601_v54 = vrot.slane %v8831_v0, 2 }
 0x241   : > { %6682 = vmatmul.mubr.msk.bf16.gmra.mxu0 %vm535_vm1, %v9189_v45  ;;  %10905 = vst [vmem:[#allocation65_spill] sm:$0xff] %v9216_v27  ;;  %6642 = vmatmul.mubr.msk.bf16.gmra.mxu1 %vm535_vm1, %v9209_v19  ;;  %v3087_v19 = vsel %vm389_vm0, %v3084_v8, %v3086_v52  ;;  %v10908_v45 = vrot.slane %v8809_v7, 2  ;;  %v10909_v39 = vrot.slane %v8783_v40, 2  ;;  %v10910_v0 = vrot.slane %v8820_v62, 2 }
 0x242   : > { %6685 = vmatprep.mubr.msk.bf16.mxu0 %vm535_vm1, %v9205_v9  ;;  %v3600_v9 = vsel %vm966_vm2, %v10907_v59, %v10906_v5  ;;  %6645 = vmatprep.mubr.msk.bf16.mxu1 %vm535_vm1, %v9216_v27  ;;  %v9245_v15 = vpack.c.bf16 %v3087_v19, %v3085_v20  ;;  %v3092_v5 = vsel %vm389_vm0, %v3089_v13, %v3091_v30  ;;  %v3606_v60 = vrot.slane %v8811_v55, 2 }
 0x243   : > { %v9227_v25 = vld [vmem:[#allocation2 + $0x168] sm:$0xff]  ;;  %v3605_v4 = vsel %vm966_vm2, %v10909_v39, %v10908_v45  ;;  %v3602_v59 = vsel %vm966_vm2, %v10910_v0, %v3601_v54  ;;  %v9252_v27 = vpack.c.bf16 %v3092_v5, %v3090_v26  ;;  %v10911_v40 = vrot.slane %v8876_v37, 2 }
 0x244   : > { %v3093_v41 = vrot.slane %v9227_v25, 1  ;;  %v9258_v56 = vpack.c.bf16 %v3602_v59, %v3600_v9  ;;  %v10912_v39 = vrot.slane %v8858_v34, 2  ;;  %v3611_v62 = vrot.slane %v8909_v38, 2 }
 0x245   : > { %v9254_v8 = vld [vmem:[#allocation2 + $0x170] sm:$0xff]  ;;  %v9256_v52 = vld [vmem:[#allocation2 + $0x178] sm:$0x3]  ;;  %v10913_v9 = vrot.slane %v8809_v7, 2  ;;  %v10914_v34 = vmov %v10911_v40  ;;  %v10915_v38 = vrot.slane %v8870_v61, 2  ;;  %v10916_v26 = vrot.slane %v8890_v43, 2 }
 0x246   : > { %v3610_v30 = vsel %vm966_vm2, %v10912_v39, %v10911_v40  ;;  %v9268_v19 = vpack.c.bf16 %v9254_v8, %v9227_v25  ;;  %v3094_v55 = vrot.slane %v9254_v8, 1  ;;  %v3669_v45 = vrot.slane %v9254_v8, 2  ;;  %v10954_v8 = vld [vmem:[#allocation33_spill] sm:$0xff] }
 0x247   : > { %v3096_v13 = vrot.slane %v9256_v52, 1  ;;  %v3607_v54 = vsel %vm966_vm2, %v10913_v9, %v3606_v60  ;;  %v3612_v20 = vsel %vm966_vm2, %v10914_v34, %v3611_v62  ;;  %v3615_v5 = vsel %vm966_vm2, %v10916_v26, %v10915_v38 }
 0x248   : > { %v3616_v0 = vrot.slane %v8928_v31, 2  ;;  %v3095_v59 = vsel %vm389_vm0, %v3093_v41, %v3094_v55  ;;  %v9289_v60 = vpack.c.bf16 %v3607_v54, %v3605_v4  ;;  %v9291_v37 = vpack.c.bf16 %v3612_v20, %v3610_v30 }
 0x249   : > { %6686 = vmatmul.mubr.msk.bf16.gmra.mxu0 %vm535_vm1, %v9268_v19  ;;  %v3097_v7 = vsel %vm389_vm0, %v3094_v55, %v3096_v13  ;;  %v10917_v43 = vmov %v10915_v38  ;;  %v10918_v39 = vrot.slane %v8942_v58, 2  ;;  %v10919_v62 = vrot.slane %v8948_v10, 2  ;;  %6646 = vmatmul.mubr.msk.bf16.gmra.mxu1 %vm535_vm1, %v9245_v15 }
 0x24a   : > { %6729 = vmatprep.mubr.msk.bf16.mxu0 %vm535_vm1, %v8837_v21  ;;  %v9295_v40 = vpack.c.bf16 %v3097_v7, %v3095_v59  ;;  %v3617_v31 = vsel %vm966_vm2, %v10917_v43, %v3616_v0  ;;  %v3621_v4 = vrot.slane %v8985_v23, 2  ;;  %v10920_v21 = vrot.slane %v8963_v16, 2  ;;  %6649 = vmatprep.mubr.msk.bf16.mxu1 %vm535_vm1, %v9252_v27 }
 0x24b   : > { %v3620_v41 = vsel %vm966_vm2, %v10919_v62, %v10918_v39  ;;  %v9308_v30 = vpack.c.bf16 %v3617_v31, %v3615_v5  ;;  %v10921_v55 = vrot.slane %v8970_v6, 2  ;;  %v3626_v13 = vrot.slane %v8987_v17, 2 }
 0x24c   : > { %v10922_v9 = vrot.slane %v8992_v29, 2  ;;  %v10923_v10 = vrot.slane %v9004_v18, 2  ;;  %v10924_v23 = vmov %v10918_v39  ;;  %v3631_v20 = vrot.slane %v9040_v44, 2 }
 0x24d   : > { %v3625_v61 = vsel %vm966_vm2, %v10921_v55, %v10920_v21  ;;  %v3622_v34 = vsel %vm966_vm2, %v10924_v23, %v3621_v4  ;;  %v10925_v6 = vrot.slane %v9027_v63, 2  ;;  %v10926_v38 = vrot.slane %v9034_v57, 2 }
 0x24e   : > { %v3630_v54 = vsel %vm966_vm2, %v10923_v10, %v10922_v9  ;;  %v3636_v26 = vrot.slane %v9050_v49, 2  ;;  %v9333_v18 = vpack.c.bf16 %v3622_v34, %v3620_v41  ;;  %v10927_v5 = vmov %v10920_v21 }
 0x24f   : > { %v3635_v17 = vsel %vm966_vm2, %v10926_v38, %v10925_v6  ;;  %v3627_v0 = vsel %vm966_vm2, %v10927_v5, %v3626_v13  ;;  %v10928_v58 = vrot.slane %v9055_v14, 2  ;;  %v10929_v59 = vrot.slane %v9068_v35, 2  ;;  %v9406_v5 = vld [vmem:[#allocation2 + $0x180] sm:$0xff] }
 0x250   : > { %v3641_v7 = vrot.slane %v9103_v32, 2  ;;  %v9344_v43 = vpack.c.bf16 %v3627_v0, %v3625_v61  ;;  %v10930_v57 = vmov %v10922_v9  ;;  %v10931_v31 = vmov %v10925_v6  ;;  %v10945_v0 = vld [vmem:[#allocation16_spill] sm:$0xff] }
 0x251   : > { %v3640_v44 = vsel %vm966_vm2, %v10929_v59, %v10928_v58  ;;  %v3632_v49 = vsel %vm966_vm2, %v10930_v57, %v3631_v20  ;;  %v3637_v16 = vsel %vm966_vm2, %v10931_v31, %v3636_v26  ;;  %v10932_v39 = vrot.slane %v9092_v36, 2  ;;  %6730 = vmatmul.mubr.msk.bf16.vlgmr.msra.gmra.mxu0 %vm535_vm1, %v8824_v28  ;;  %6650 = vmatmul.mubr.msk.bf16.gmra.mxu1 %vm535_vm1, %v9295_v40  ;;  %v10949_v31 = vld [vmem:[#allocation106_spill] sm:$0xff] }
 0x252   : > { %v10933_v62 = vrot.slane %v9098_v47, 2  ;;  %v9357_v41 = vpack.c.bf16 %v3632_v49, %v3630_v54  ;;  %v9359_v4 = vpack.c.bf16 %v3637_v16, %v3635_v17  ;;  %v10934_v32 = vmov %v10928_v58  ;;  %6733 = vmatprep.mubr.msk.bf16.mxu0 %vm535_vm1, %v8899_v24  ;;  %6798 = vmatpush3.bf16.msra.mxu0 %v10945_v0  ;;  %v10948_v49 = vld [vmem:[#allocation109_spill] sm:$0xff] }
 0x253   : > { %v3642_v29 = vsel %vm966_vm2, %v10934_v32, %v3641_v7  ;;  %v3646_v21 = vrot.slane %v9105_v33, 2  ;;  %v10935_v63 = vrot.slane %v9115_v53, 2  ;;  %v10936_v61 = vrot.slane %v9128_v48, 2  ;;  %v6991_v33 = vld [vmem:[%s10524_s3 + $0x50] sm:$0xff]   ;;  %v6994_v7 = vld [vmem:[%s10524_s3 + $0x78] sm:$0xff]   ;;  %v9548_v0 = vld [vmem:[%s10524_s3 + $0x88] sm:$0xff]  }
 0x254   : > { %v3645_v35 = vsel %vm966_vm2, %v10933_v62, %v10932_v39  ;;  %v9365_v55 = vpack.c.bf16 %v3642_v29, %v3640_v44  ;;  %v3651_v13 = vrot.slane %v9165_v50, 2  ;;  %v10937_v9 = vrot.slane %v9141_v51, 2  ;;  %6799 = vmatprep.subr.bf16.mxu0 %v6991_v33 }
 0x255   : > { %v3650_v47 = vsel %vm966_vm2, %v10936_v61, %v10935_v63  ;;  %v10938_v10 = vrot.slane %v9153_v46, 2  ;;  %v10939_v54 = vmov %v10932_v39  ;;  %v3656_v23 = vrot.slane %v9155_v11, 2 }
 0x256   : > { %v3647_v48 = vsel %vm966_vm2, %v10939_v54, %v3646_v21  ;;  %v10940_v50 = vrot.slane %v9167_v1, 2  ;;  %v10941_v34 = vrot.slane %v9174_v3, 2  ;;  %v3661_v20 = vrot.slane %v9198_v22, 2  ;;  %v9408_v22 = vld [vmem:[#allocation2 + $0x188] sm:$0xff]  ;;  %6800 = vmatpush3.bf16.msra.mxu0 %v6991_v33  ;;  %v10955_v33 = vld [vmem:[#allocation19_spill] sm:$0xff] }
 0x257   : > { %v3655_v14 = vsel %vm966_vm2, %v10938_v10, %v10937_v9  ;;  %v9395_v6 = vpack.c.bf16 %v3647_v48, %v3645_v35  ;;  %v10942_v38 = vmov %v10935_v63  ;;  %v10943_v17 = vrot.slane %v9183_v42, 2  ;;  %6869 = vmatprep.subr.bf16.mxu0 %v6994_v7  ;;  %v10956_v54 = vld [vmem:[#allocation15_spill] sm:$0xff]  ;;  %v10957_v48 = vld [vmem:[#allocation34_spill] sm:$0xff] }
 0x258   : > { %v3660_v46 = vsel %vm966_vm2, %v10941_v34, %v10940_v50  ;;  %v3652_v36 = vsel %vm966_vm2, %v10942_v38, %v3651_v13  ;;  %v10944_v11 = vrot.slane %v9191_v12, 2  ;;  %v3666_v3 = vrot.slane %v9207_v2, 2  ;;  %v9421_v2 = vld [vmem:[#allocation2 + $0x190] sm:$0x3]  ;;  %v10952_v13 = vld [vmem:[#allocation39_spill] sm:$0xff]  ;;  %v10960_v34 = vld [vmem:[#allocation57_spill] sm:$0xff] }
 0x259   : > { %v9413_v53 = vpack.c.bf16 %v3652_v36, %v3650_v47  ;;  %v10946_v58 = vmov %v10937_v9  ;;  %v10947_v12 = vmov %v10940_v50  ;;  %v3668_v57 = vrot.slane %v9227_v25, 2  ;;  %6734 = vmatmul.mubr.msk.bf16.gmra.mxu0 %vm535_vm1, %v10952_v13  ;;  %v6989_v9 = vld [vmem:[%s10524_s3 + $0x40] sm:$0xff]   ;;  %v10959_v50 = vld [vmem:[#allocation59_spill] sm:$0xff] }
 0x25a   : > { %v3665_v26 = vsel %vm966_vm2, %v10944_v11, %v10943_v17  ;;  %v3657_v59 = vsel %vm966_vm2, %v10946_v58, %v3656_v23  ;;  %v3662_v44 = vsel %vm966_vm2, %v10947_v12, %v3661_v20  ;;  %v10950_v16 = vpack.c.bf16 %v10948_v49, %v10949_v31  ;;  %v10958_v23 = vld [vmem:[#allocation35_spill] sm:$0xff]  ;;  %v10962_v20 = vld [vmem:[#allocation64_spill] sm:$0xff]  ;;  %v10969_v12 = vld [vmem:[#allocation25_spill] sm:$0xff] }
 0x25b   : > { %v9431_v51 = vpack.c.bf16 %v3657_v59, %v3655_v14  ;;  %v9433_v39 = vpack.c.bf16 %v3662_v44, %v3660_v46  ;;  %v10951_v1 = vmov %v10943_v17  ;;  %v4196_v32 = vrot.slane %v9406_v5, 1  ;;  %v10953_v14 = vld [vmem:[#allocation36_spill] sm:$0xff]  ;;  %v10961_v46 = vld [vmem:[#allocation62_spill] sm:$0xff]  ;;  %v10963_v38 = vld [vmem:[#allocation63_spill] sm:$0xff] }
 0x25c   : > { %6693 = vmatprep.mubr.msk.bf16.mxu1 %vm535_vm1, %v10950_v16  ;;  %v3667_v62 = vsel %vm966_vm2, %v10951_v1, %v3666_v3  ;;  %v4197_v25 = vrot.slane %v9408_v22, 1  ;;  %v3670_v29 = vsel %vm966_vm2, %v3668_v57, %v3669_v45  ;;  %v3671_v21 = vrot.slane %v9256_v52, 2  ;;  %6737 = vmatprep.mubr.msk.bf16.mxu0 %vm535_vm1, %v10953_v14  ;;  %v6995_v17 = vld [vmem:[%s10524_s3 + $0x70] sm:$0xff]   ;;  %v6993_v11 = vld [vmem:[%s10524_s3 + $0x60] sm:$0xff]   ;;  %v10968_v59 = vld [vmem:[#allocation27_spill] sm:$0xff] }
 0x25d   : > { %v9438_v35 = vpack.c.bf16 %v3667_v62, %v3665_v26  ;;  %v4199_v63 = vrot.slane %v9421_v2, 1  ;;  %6694 = vmatmul.mubr.msk.bf16.vlgmr.msra.gmra.mxu1 %vm535_vm1, %v9258_v56  ;;  %v9513_v36 = vpack.c.bf16 %v9408_v22, %v9406_v5  ;;  %v10965_v26 = vld [vmem:[#allocation11_spill] sm:$0xff]  ;;  %v10966_v3 = vld [vmem:[#allocation26_spill] sm:$0xff]  ;;  %v10967_v58 = vld [vmem:[#allocation32_spill] sm:$0xff]  ;;  %v4418_v16 = vrot.slane %v9408_v22, 2 }
 0x25e   : > { %v4198_v42 = vsel %vm389_vm0, %v4196_v32, %v4197_v25  ;;  %v3672_v61 = vsel %vm966_vm2, %v3669_v45, %v3671_v21  ;;  %6762 = vmatpush3.bf16.msra.mxu1 %v10954_v8  ;;  %6697 = vmatprep.mubr.msk.bf16.mxu1 %vm535_vm1, %v9289_v60  ;;  %v6992_v45 = vld [vmem:[%s10524_s3 + $0x68] sm:$0xff]   ;;  %v10970_v44 = vld [vmem:[#allocation56_spill] sm:$0xff]  ;;  %v10974_v31 = vld [vmem:[#allocation66_spill] sm:$0xff]  ;;  %v4420_v1 = vrot.slane %v9421_v2, 2  ;;  %v4417_v62 = vrot.slane %v9406_v5, 2 }
 0x25f   : > { %v4200_v47 = vsel %vm389_vm0, %v4197_v25, %v4199_v63  ;;  %v9457_v52 = vpack.c.bf16 %v3672_v61, %v3670_v29  ;;  %6763 = vmatprep.subr.bf16.mxu1 %v6989_v9  ;;  %v10972_v57 = vld [vmem:[#allocation61_spill] sm:$0xff]  ;;  %v10973_v49 = vld [vmem:[#allocation60_spill] sm:$0xff]  ;;  %v9606_v2 = vld [vmem:[#allocation2 + $0x198] sm:$0xff] }
 0x260   : > { %v9459_v10 = vpack.c.bf16 %v4200_v47, %v4198_v42  ;;  %v10975_v32 = vld [vmem:[#allocation65_spill] sm:$0xff]  ;;  %v4419_v25 = vsel %vm966_vm2, %v4417_v62, %v4418_v16  ;;  %v4421_v22 = vsel %vm966_vm2, %v4418_v16, %v4420_v1  ;;  %v9608_v21 = vld [vmem:[#allocation2 + $0x1a0] sm:$0xff]  ;;  %v5076_v42 = vrot.slane %v9606_v2, 2 }
 0x261   : > { %6738 = vmatmul.mubr.msk.bf16.gmra.mxu0 %vm535_vm1, %v10955_v33  ;;  %v9596_v29 = vpack.c.bf16 %v4421_v22, %v4419_v25  ;;  %v5077_v61 = vrot.slane %v9608_v21, 2  ;;  %v9618_v8 = vld [vmem:[#allocation2 + $0x1a8] sm:$0x3] }
 0x262   : > { %6764 = vmatpush3.bf16.msra.mxu1 %v6989_v9  ;;  %6741 = vmatprep.mubr.msk.bf16.mxu0 %vm535_vm1, %v10956_v54 }
 0x263   : > { %6833 = vmatprep.subr.bf16.mxu1 %v6992_v45 }
 0x265   : > { %6698 = vmatmul.mubr.msk.bf16.gmra.mxu1 %vm535_vm1, %v9291_v37 }
 0x266   : > { %6701 = vmatprep.mubr.msk.bf16.mxu1 %vm535_vm1, %v9308_v30 }
 0x269   : > { %6742 = vmatmul.mubr.msk.bf16.gmra.mxu0 %vm535_vm1, %v10957_v48 }
 0x26a   : > { %6745 = vmatprep.mubr.msk.bf16.mxu0 %vm535_vm1, %v10958_v23 }
 0x26d   : > { %6702 = vmatmul.mubr.msk.bf16.gmra.mxu1 %vm535_vm1, %v9333_v18 }
 0x26e   : > { %6705 = vmatprep.mubr.msk.bf16.mxu1 %vm535_vm1, %v9344_v43 }
 0x271   : > { %6746 = vmatmul.mubr.msk.bf16.gmra.mxu0 %vm535_vm1, %v10959_v50 }
 0x272   : > { %6749 = vmatprep.mubr.msk.bf16.mxu0 %vm535_vm1, %v10960_v34 }
 0x275   : > { %6706 = vmatmul.mubr.msk.bf16.gmra.mxu1 %vm535_vm1, %v9357_v41 }
 0x276   : > { %6709 = vmatprep.mubr.msk.bf16.mxu1 %vm535_vm1, %v9359_v4 }
 0x279   : > { %6750 = vmatmul.mubr.msk.bf16.gmra.mxu0 %vm535_vm1, %v10961_v46 }
 0x27a   : > { %6753 = vmatprep.mubr.msk.bf16.mxu0 %vm535_vm1, %v10962_v20 }
 0x27d   : > { %6710 = vmatmul.mubr.msk.bf16.gmra.mxu1 %vm535_vm1, %v9365_v55 }
 0x27e   : > { %6713 = vmatprep.mubr.msk.bf16.mxu1 %vm535_vm1, %v9395_v6 }
 0x281   : > { %6754 = vmatmul.mubr.msk.bf16.gmra.mxu0 %vm535_vm1, %v10963_v38 }
 0x282   : > { %6757 = vmatprep.mubr.msk.bf16.mxu0 %vm535_vm1, %v9268_v19 }
 0x285   : > { %6714 = vmatmul.mubr.msk.bf16.gmra.mxu1 %vm535_vm1, %v9413_v53 }
 0x286   : > { %6717 = vmatprep.mubr.msk.bf16.mxu1 %vm535_vm1, %v9431_v51 }
 0x289   : > { %6758 = vmatmul.mubr.msk.bf16.gmra.mxu0 %vm535_vm1, %v9513_v36 }
 0x28a   : > { %6801 = vmatprep.mubr.msk.bf16.mxu0 %vm535_vm1, %v9258_v56  ;;  %v10964_v56 = vld [vmem:[#allocation22_spill] sm:$0xff] }
 0x28d   : > { %6718 = vmatmul.mubr.msk.bf16.gmra.mxu1 %vm535_vm1, %v9433_v39 }
 0x28e   : > { %6721 = vmatprep.mubr.msk.bf16.mxu1 %vm535_vm1, %v9438_v35 }
 0x291   : > { %6802 = vmatmul.mubr.msk.bf16.vlgmr.msra.gmra.mxu0 %vm535_vm1, %v9289_v60 }
 0x292   : > { %6805 = vmatprep.mubr.msk.bf16.mxu0 %vm535_vm1, %v9291_v37  ;;  %6870 = vmatpush3.bf16.msra.mxu0 %v6994_v7  ;;  %v10971_v7 = vld [vmem:[#allocation45_spill] sm:$0xff] }
 0x293   : > { %6871 = vmatprep.subr.bf16.mxu0 %v6995_v17 }
 0x295   : > { %6722 = vmatmul.mubr.msk.bf16.gmra.mxu1 %vm535_vm1, %v9457_v52 }
 0x296   : > { %6765 = vmatprep.mubr.msk.bf16.mxu1 %vm535_vm1, %v10964_v56  ;;  %6872 = vmatpush3.bf16.msra.mxu0 %v6995_v17  ;;  %v9625_v56 = vsel %vm966_vm2, %v5076_v42, %v5077_v61 }
 0x299   : > { %6806 = vmatmul.mubr.msk.bf16.gmra.mxu0 %vm535_vm1, %v9308_v30 }
 0x29a   : > { %6809 = vmatprep.mubr.msk.bf16.mxu0 %vm535_vm1, %v9333_v18 }
 0x29d   : > { %6766 = vmatmul.mubr.msk.bf16.vlgmr.msra.gmra.mxu1 %vm535_vm1, %v10965_v26 }
 0x29e   : > { %6834 = vmatpush3.bf16.msra.mxu1 %v6992_v45  ;;  %6769 = vmatprep.mubr.msk.bf16.mxu1 %vm535_vm1, %v10966_v3 }
 0x29f   : > { %6835 = vmatprep.subr.bf16.mxu1 %v6993_v11 }
 0x2a1   : > { %6810 = vmatmul.mubr.msk.bf16.gmra.mxu0 %vm535_vm1, %v9344_v43 }
 0x2a2   : > { %6836 = vmatpush3.bf16.msra.mxu1 %v6993_v11  ;;  %6813 = vmatprep.mubr.msk.bf16.mxu0 %vm535_vm1, %v9357_v41  ;;  %v5079_v11 = vrot.slane %v9618_v8, 2 }
 0x2a3   : > { %6905 = vmatprep.subr.bf16.mxu1 %v9548_v0 }
 0x2a4   : > { %v9631_v16 = vsel %vm966_vm2, %v5077_v61, %v5079_v11 }
 0x2a5   : > { %6770 = vmatmul.mubr.msk.bf16.gmra.mxu1 %vm535_vm1, %v10967_v58 }
 0x2a6   : > { %6773 = vmatprep.mubr.msk.bf16.mxu1 %vm535_vm1, %v10968_v59 }
 0x2a9   : > { %6814 = vmatmul.mubr.msk.bf16.gmra.mxu0 %vm535_vm1, %v9359_v4 }
 0x2aa   : > { %6817 = vmatprep.mubr.msk.bf16.mxu0 %vm535_vm1, %v9365_v55 }
 0x2ad   : > { %6774 = vmatmul.mubr.msk.bf16.gmra.mxu1 %vm535_vm1, %v10969_v12 }
 0x2ae   : > { %6777 = vmatprep.mubr.msk.bf16.mxu1 %vm535_vm1, %v10970_v44 }
 0x2b1   : > { %6818 = vmatmul.mubr.msk.bf16.gmra.mxu0 %vm535_vm1, %v9395_v6 }
 0x2b2   : > { %6821 = vmatprep.mubr.msk.bf16.mxu0 %vm535_vm1, %v9413_v53 }
 0x2b5   : > { %6778 = vmatmul.mubr.msk.bf16.gmra.mxu1 %vm535_vm1, %v10971_v7 }
 0x2b6   : > { %6781 = vmatprep.mubr.msk.bf16.mxu1 %vm535_vm1, %v10972_v57 }
 0x2b9   : > { %6822 = vmatmul.mubr.msk.bf16.gmra.mxu0 %vm535_vm1, %v9431_v51 }
 0x2ba   : > { %6825 = vmatprep.mubr.msk.bf16.mxu0 %vm535_vm1, %v9433_v39 }
 0x2bd   : > { %6782 = vmatmul.mubr.msk.bf16.gmra.mxu1 %vm535_vm1, %v10973_v49 }
 0x2be   : > { %6785 = vmatprep.mubr.msk.bf16.mxu1 %vm535_vm1, %v10974_v31 }
 0x2c1   : > { %6826 = vmatmul.mubr.msk.bf16.gmra.mxu0 %vm535_vm1, %v9438_v35 }
 0x2c2   : > { %6829 = vmatprep.mubr.msk.bf16.mxu0 %vm535_vm1, %v9457_v52 }
 0x2c5   : > { %6786 = vmatmul.mubr.msk.bf16.gmra.mxu1 %vm535_vm1, %v10975_v32 }
 0x2c6   : > { %6789 = vmatprep.mubr.msk.bf16.mxu1 %vm535_vm1, %v9245_v15 }
 0x2c9   : > { %6830 = vmatmul.mubr.msk.bf16.gmra.mxu0 %vm535_vm1, %v9596_v29 }
 0x2ca   : > { %6873 = vmatprep.mubr.msk.bf16.mxu0 %vm535_vm1, %v10965_v26 }
 0x2cd   : > { %6790 = vmatmul.mubr.msk.bf16.gmra.mxu1 %vm535_vm1, %v9252_v27 }
 0x2ce   : > { %6793 = vmatprep.mubr.msk.bf16.mxu1 %vm535_vm1, %v9295_v40 }
 0x2d0   : > { %v6659_v5 = vpop.f32.mrf.mxu0 }
 0x2d1   : > { %6874 = vmatmul.mubr.msk.bf16.vlgmr.msra.gmra.mxu0 %vm535_vm1, %v10966_v3 }
 0x2d2   : > { %v3466_v63 = vpop.f32.mrf.mxu0  ;;  %6877 = vmatprep.mubr.msk.bf16.mxu0 %vm535_vm1, %v10967_v58 }
 0x2d4   : > { %v6660_v47 = vpop.f32.mrf.mxu0  ;;  %v6623_v9 = vpop.f32.mrf.mxu1 }
 0x2d5   : > { %6794 = vmatmul.mubr.msk.bf16.gmra.mxu1 %vm535_vm1, %v9459_v10  ;;  %v9622_v45 = vadd.f32 %v6659_v5, %v6623_v9  ;;  %v6997_v5 = vld [vmem:[%s10524_s3 + $0x80] sm:$0xff]  }
 0x2d6   : > { %6837 = vmatprep.mubr.msk.bf16.mxu1 %vm535_vm1, %v8824_v28  ;;  %v3469_v17 = vpop.f32.mrf.mxu0  ;;  %v3245_v26 = vpop.f32.mrf.mxu1 }
 0x2d7   : > { %v9628_v3 = vadd.f32 %v3466_v63, %v3245_v26 }
 0x2d8   : > { %v6663_v58 = vpop.f32.mrf.mxu0  ;;  %v6624_v1 = vpop.f32.mrf.mxu1 }
 0x2d9   : > { %v9635_v28 = vadd.f32 %v6660_v47, %v6624_v1  ;;  %6878 = vmatmul.mubr.msk.bf16.gmra.mxu0 %vm535_vm1, %v10968_v59 }
 0x2da   : > { %v3482_v25 = vpop.f32.mrf.mxu0  ;;  %v3248_v22 = vpop.f32.mrf.mxu1  ;;  %6881 = vmatprep.mubr.msk.bf16.mxu0 %vm535_vm1, %v10969_v12 }
 0x2db   : > { %v9642_v63 = vadd.f32 %v3469_v17, %v3248_v22 }
 0x2dc   : > { %v6664_v42 = vpop.f32.mrf.mxu0 }
 0x2dd   : > { %6838 = vmatmul.mubr.msk.bf16.vlgmr.msra.gmra.mxu1 %vm535_vm1, %v8899_v24 }
 0x2de   : > { %6906 = vmatpush3.bf16.msra.mxu1 %v9548_v0  ;;  %6841 = vmatprep.mubr.msk.bf16.mxu1 %vm535_vm1, %v10952_v13  ;;  %v3485_v59 = vpop.f32.mrf.mxu0  ;;  %v6627_v61 = vpop.f32.mrf.mxu1 }
 0x2df   : > { %6907 = vmatprep.subr.bf16.mxu1 %v6997_v5  ;;  %v9651_v47 = vadd.f32 %v6663_v58, %v6627_v61 }
 0x2e0   : > { %v6667_v9 = vpop.f32.mrf.mxu0  ;;  %v3261_v17 = vpop.f32.mrf.mxu1 }
 0x2e1   : > { %v9653_v11 = vadd.f32 %v3482_v25, %v3261_v17  ;;  %6882 = vmatmul.mubr.msk.bf16.gmra.mxu0 %vm535_vm1, %v10970_v44 }
 0x2e2   : > { %v3498_v26 = vpop.f32.mrf.mxu0  ;;  %6908 = vmatpush3.bf16.msra.mxu1 %v6997_v5  ;;  %v6628_v12 = vpop.f32.mrf.mxu1  ;;  %6885 = vmatprep.mubr.msk.bf16.mxu0 %vm535_vm1, %v10971_v7 }
 0x2e3   : > { %v9657_v24 = vadd.f32 %v6664_v42, %v6628_v12 }
 0x2e4   : > { %v6668_v13 = vpop.f32.mrf.mxu0  ;;  %v3264_v0 = vpop.f32.mrf.mxu1 }
 0x2e5   : > { %6842 = vmatmul.mubr.msk.bf16.gmra.mxu1 %vm535_vm1, %v10953_v14  ;;  %v9665_v58 = vadd.f32 %v3485_v59, %v3264_v0 }
 0x2e6   : > { %6845 = vmatprep.mubr.msk.bf16.mxu1 %vm535_vm1, %v10955_v33  ;;  %v3501_v1 = vpop.f32.mrf.mxu0 }
 0x2e8   : > { %v6671_v25 = vpop.f32.mrf.mxu0 }
 0x2e9   : > { %v6631_v22 = vpop.f32.mrf.mxu1  ;;  %6886 = vmatmul.mubr.msk.bf16.gmra.mxu0 %vm535_vm1, %v10972_v57 }
 0x2ea   : > { %v3514_v5 = vpop.f32.mrf.mxu0  ;;  %v9667_v44 = vadd.f32 %v6667_v9, %v6631_v22  ;;  %6889 = vmatprep.mubr.msk.bf16.mxu0 %vm535_vm1, %v10973_v49 }
 0x2eb   : > { %v3277_v7 = vpop.f32.mrf.mxu1 }
 0x2ec   : > { %v6672_v14 = vpop.f32.mrf.mxu0  ;;  %v9675_v33 = vadd.f32 %v3498_v26, %v3277_v7 }
 0x2ed   : > { %6846 = vmatmul.mubr.msk.bf16.gmra.mxu1 %vm535_vm1, %v10956_v54  ;;  %v6632_v42 = vpop.f32.mrf.mxu1 }
 0x2ee   : > { %6849 = vmatprep.mubr.msk.bf16.mxu1 %vm535_vm1, %v10957_v48  ;;  %v3517_v59 = vpop.f32.mrf.mxu0  ;;  %v9679_v61 = vadd.f32 %v6668_v13, %v6632_v42 }
 0x2ef   : > { %v3280_v9 = vpop.f32.mrf.mxu1 }
 0x2f0   : > { %v9681_v17 = vadd.f32 %v3501_v1, %v3280_v9  ;;  %v6675_v57 = vpop.f32.mrf.mxu0 }
 0x2f1   : > { %v6635_v12 = vpop.f32.mrf.mxu1  ;;  %6890 = vmatmul.mubr.msk.bf16.gmra.mxu0 %vm535_vm1, %v10974_v31 }
 0x2f2   : > { %v9685_v49 = vadd.f32 %v6671_v25, %v6635_v12  ;;  %6893 = vmatprep.mubr.msk.bf16.mxu0 %vm535_vm1, %v10975_v32  ;;  %v3530_v54 = vpop.f32.mrf.mxu0 }
 0x2f3   : > { %v3293_v48 = vpop.f32.mrf.mxu1 }
 0x2f4   : > { %v9693_v26 = vadd.f32 %v3514_v5, %v3293_v48  ;;  %v6676_v13 = vpop.f32.mrf.mxu0 }
 0x2f5   : > { %6850 = vmatmul.mubr.msk.bf16.gmra.mxu1 %vm535_vm1, %v10958_v23  ;;  %v6636_v0 = vpop.f32.mrf.mxu1 }
 0x2f6   : > { %6853 = vmatprep.mubr.msk.bf16.mxu1 %vm535_vm1, %v10959_v50  ;;  %v9695_v1 = vadd.f32 %v6672_v14, %v6636_v0  ;;  %v3533_v31 = vpop.f32.mrf.mxu0 }
 0x2f7   : > { %v3296_v25 = vpop.f32.mrf.mxu1 }
 0x2f8   : > { %v9697_v22 = vadd.f32 %v3517_v59, %v3296_v25  ;;  %v4855_v59 = vrot.slane %v9606_v2, 1 }
 0x2f9   : > { %v6679_v7 = vpop.f32.mrf.mxu0  ;;  %6894 = vmatmul.mubr.msk.bf16.gmra.mxu0 %vm535_vm1, %v9245_v15  ;;  %v6639_v23 = vpop.f32.mrf.mxu1  ;;  %v4856_v15 = vrot.slane %v9608_v21, 1 }
 0x2fa   : > { %6897 = vmatprep.mubr.msk.bf16.mxu0 %vm535_vm1, %v9252_v27  ;;  %v9705_v32 = vadd.f32 %v6675_v57, %v6639_v23  ;;  %v4858_v27 = vrot.slane %v9618_v8, 1 }
 0x2fb   : > { %v3546_v50 = vpop.f32.mrf.mxu0  ;;  %v3309_v5 = vpop.f32.mrf.mxu1 }
 0x2fc   : > { %v9709_v42 = vadd.f32 %v3530_v54, %v3309_v5  ;;  %v4857_v54 = vsel %vm389_vm0, %v4855_v59, %v4856_v15  ;;  %v4859_v0 = vsel %vm389_vm0, %v4856_v15, %v4858_v27 }
 0x2fd   : > { %6854 = vmatmul.mubr.msk.bf16.gmra.mxu1 %vm535_vm1, %v10960_v34  ;;  %v6680_v14 = vpop.f32.mrf.mxu0  ;;  %v6640_v9 = vpop.f32.mrf.mxu1  ;;  %v4862_v23 = vpack.c.bf16 %v4859_v0, %v4857_v54 }
 0x2fe   : > { %6857 = vmatprep.mubr.msk.bf16.mxu1 %vm535_vm1, %v10961_v46  ;;  %v9714_v48 = vadd.f32 %v6676_v13, %v6640_v9 }
 0x2ff   : > { %v3549_v12 = vpop.f32.mrf.mxu0  ;;  %v3312_v34 = vpop.f32.mrf.mxu1 }
 0x300   : > { %v9718_v46 = vadd.f32 %v3533_v31, %v3312_v34 }
 0x301   : > { %v6683_v57 = vpop.f32.mrf.mxu0  ;;  %6898 = vmatmul.mubr.msk.bf16.gmra.mxu0 %vm535_vm1, %v9295_v40  ;;  %v6643_v25 = vpop.f32.mrf.mxu1 }
 0x302   : > { %6901 = vmatprep.mubr.msk.bf16.mxu0 %vm535_vm1, %v9459_v10  ;;  %v9726_v13 = vadd.f32 %v6679_v7, %v6643_v25  ;;  %v4638_v25 = vpack.c.bf16 %v9608_v21, %v9606_v2 }
 0x303   : > { %v3562_v8 = vpop.f32.mrf.mxu0  ;;  %v3325_v40 = vpop.f32.mrf.mxu1 }
 0x304   : > { %v9730_v5 = vadd.f32 %v3546_v50, %v3325_v40 }
 0x305   : > { %6858 = vmatmul.mubr.msk.bf16.gmra.mxu1 %vm535_vm1, %v10962_v20  ;;  %v6684_v31 = vpop.f32.mrf.mxu0  ;;  %v6644_v10 = vpop.f32.mrf.mxu1 }
 0x306   : > { %6861 = vmatprep.mubr.msk.bf16.mxu1 %vm535_vm1, %v10963_v38  ;;  %v9732_v59 = vadd.f32 %v6680_v14, %v6644_v10 }
 0x307   : > { %v3565_v9 = vpop.f32.mrf.mxu0  ;;  %v3328_v15 = vpop.f32.mrf.mxu1 }
 0x308   : > { %v9735_v20 = vadd.f32 %v3549_v12, %v3328_v15 }
 0x309   : > { %v6687_v27 = vpop.f32.mrf.mxu0  ;;  %6902 = vmatmul.mubr.msk.bf16.gmra.mxu0 %vm535_vm1, %v4862_v23  ;;  %v6647_v7 = vpop.f32.mrf.mxu1 }
 0x30a   : > { %v9739_v34 = vadd.f32 %v6683_v57, %v6647_v7 }
 0x30b   : > { %v3578_v38 = vpop.f32.mrf.mxu0  ;;  %v3341_v50 = vpop.f32.mrf.mxu1 }
 0x30c   : > { %v9743_v14 = vadd.f32 %v3562_v8, %v3341_v50 }
 0x30d   : > { %6862 = vmatmul.mubr.msk.bf16.gmra.mxu1 %vm535_vm1, %v9268_v19  ;;  %v6688_v54 = vpop.f32.mrf.mxu0  ;;  %v6648_v0 = vpop.f32.mrf.mxu1 }
 0x30e   : > { %6865 = vmatprep.mubr.msk.bf16.mxu1 %vm535_vm1, %v9513_v36  ;;  %v9747_v40 = vadd.f32 %v6684_v31, %v6648_v0 }
 0x30f   : > { %v3581_v12 = vpop.f32.mrf.mxu0  ;;  %v3344_v23 = vpop.f32.mrf.mxu1 }
 0x310   : > { %v9749_v19 = vadd.f32 %v3565_v9, %v3344_v23 }
 0x311   : > { %v6731_v10 = vpop.f32.mrf.mxu0  ;;  %v6651_v57 = vpop.f32.mrf.mxu1 }
 0x312   : > { %v9752_v36 = vadd.f32 %v6687_v27, %v6651_v57 }
 0x313   : > { %v4034_v15 = vpop.f32.mrf.mxu0  ;;  %v3357_v8 = vpop.f32.mrf.mxu1 }
 0x314   : > { %v9756_v50 = vadd.f32 %v3578_v38, %v3357_v8 }
 0x315   : > { %6866 = vmatmul.mubr.msk.bf16.gmra.mxu1 %vm535_vm1, %v4638_v25  ;;  %v6732_v7 = vpop.f32.mrf.mxu0  ;;  %v6652_v2 = vpop.f32.mrf.mxu1 }
 0x316   : > { %6909 = vmatprep.mubr.msk.bf16.mxu1 %vm535_vm1, %v9289_v60  ;;  %v9758_v31 = vadd.f32 %v6688_v54, %v6652_v2 }
 0x317   : > { %v4037_v21 = vpop.f32.mrf.mxu0  ;;  %v3360_v0 = vpop.f32.mrf.mxu1 }
 0x318   : > { %10976 = vst [vmem:[#allocation68_spill] sm:$0xff] %v9758_v31  ;;  %v9760_v23 = vadd.f32 %v3581_v12, %v3360_v0 }
 0x319   : > { %v6735_v9 = vpop.f32.mrf.mxu0 }
 0x31a   : > { %10977 = vst [vmem:[#allocation67_spill] sm:$0xff] %v9760_v23 }
 0x31b   : > { %v4050_v27 = vpop.f32.mrf.mxu0 }
 0x31d   : > { %v6695_v62 = vpop.f32.mrf.mxu1  ;;  %6910 = vmatmul.mubr.msk.bf16.vlgmr.msra.gmra.mxu1 %vm535_vm1, %v9291_v37  ;;  %v6736_v38 = vpop.f32.mrf.mxu0 }
 0x31e   : > { %v3949_v25 = vadd.f32 %v6695_v62, %v9622_v45  ;;  %6913 = vmatprep.mubr.msk.bf16.mxu1 %vm535_vm1, %v9308_v30 }
 0x31f   : > { %v3820_v60 = vpop.f32.mrf.mxu1  ;;  %v4053_v2 = vpop.f32.mrf.mxu0 }
 0x320   : > { %v3947_v57 = vadd.f32 %v3820_v60, %v9628_v3  ;;  %v9768_v54 = vadd.f32 %v6731_v10, %v3949_v25 }
 0x321   : > { %v6696_v8 = vpop.f32.mrf.mxu1  ;;  %v6739_v37 = vpop.f32.mrf.mxu0 }
 0x322   : > { %v3950_v12 = vadd.f32 %v6696_v8, %v9635_v28  ;;  %v9771_v0 = vadd.f32 %v4034_v15, %v3947_v57 }
 0x323   : > { %v3823_v23 = vpop.f32.mrf.mxu1  ;;  %v4066_v30 = vpop.f32.mrf.mxu0 }
 0x324   : > { %v3948_v31 = vadd.f32 %v3823_v23, %v9642_v63  ;;  %v9774_v45 = vadd.f32 %v6732_v7, %v3950_v12 }
 0x325   : > { %v6699_v62 = vpop.f32.mrf.mxu1  ;;  %6914 = vmatmul.mubr.msk.bf16.gmra.mxu1 %vm535_vm1, %v9333_v18  ;;  %v6740_v15 = vpop.f32.mrf.mxu0 }
 0x326   : > { %v3953_v3 = vadd.f32 %v6699_v62, %v9651_v47  ;;  %6917 = vmatprep.mubr.msk.bf16.mxu1 %vm535_vm1, %v9344_v43  ;;  %v9781_v10 = vadd.f32 %v4037_v21, %v3948_v31 }
 0x327   : > { %v3836_v28 = vpop.f32.mrf.mxu1  ;;  %v4069_v7 = vpop.f32.mrf.mxu0 }
 0x328   : > { %v3951_v25 = vadd.f32 %v3836_v28, %v9653_v11  ;;  %v9784_v60 = vadd.f32 %v6735_v9, %v3953_v3 }
 0x329   : > { %v6700_v63 = vpop.f32.mrf.mxu1  ;;  %v6743_v8 = vpop.f32.mrf.mxu0 }
 0x32a   : > { %v3954_v23 = vadd.f32 %v6700_v63, %v9657_v24  ;;  %v9787_v57 = vadd.f32 %v4050_v27, %v3951_v25 }
 0x32b   : > { %v3839_v18 = vpop.f32.mrf.mxu1  ;;  %v4082_v21 = vpop.f32.mrf.mxu0 }
 0x32c   : > { %v3952_v47 = vadd.f32 %v3839_v18, %v9665_v58  ;;  %v9790_v12 = vadd.f32 %v6736_v38, %v3954_v23 }
 0x32d   : > { %v6703_v43 = vpop.f32.mrf.mxu1  ;;  %6918 = vmatmul.mubr.msk.bf16.gmra.mxu1 %vm535_vm1, %v9357_v41  ;;  %v6744_v9 = vpop.f32.mrf.mxu0 }
 0x32e   : > { %v3957_v11 = vadd.f32 %v6703_v43, %v9667_v44  ;;  %6921 = vmatprep.mubr.msk.bf16.mxu1 %vm535_vm1, %v9359_v4  ;;  %v9797_v31 = vadd.f32 %v4053_v2, %v3952_v47 }
 0x32f   : > { %v3852_v24 = vpop.f32.mrf.mxu1  ;;  %v4085_v38 = vpop.f32.mrf.mxu0 }
 0x330   : > { %v3955_v27 = vadd.f32 %v3852_v24, %v9675_v33  ;;  %v9800_v62 = vadd.f32 %v6739_v37, %v3957_v11 }
 0x331   : > { %v6704_v58 = vpop.f32.mrf.mxu1  ;;  %v6747_v25 = vpop.f32.mrf.mxu0 }
 0x332   : > { %v3958_v3 = vadd.f32 %v6704_v58, %v9679_v61  ;;  %v9803_v28 = vadd.f32 %v4066_v30, %v3955_v27 }
 0x333   : > { %v3855_v41 = vpop.f32.mrf.mxu1  ;;  %v4098_v2 = vpop.f32.mrf.mxu0 }
 0x334   : > { %v3956_v44 = vadd.f32 %v3855_v41, %v9681_v17  ;;  %v9806_v63 = vadd.f32 %v6740_v15, %v3958_v3 }
 0x335   : > { %v6707_v4 = vpop.f32.mrf.mxu1  ;;  %6922 = vmatmul.mubr.msk.bf16.gmra.mxu1 %vm535_vm1, %v9365_v55  ;;  %v6748_v30 = vpop.f32.mrf.mxu0 }
 0x336   : > { %v3961_v33 = vadd.f32 %v6707_v4, %v9685_v49  ;;  %6925 = vmatprep.mubr.msk.bf16.mxu1 %vm535_vm1, %v9395_v6  ;;  %v9813_v37 = vadd.f32 %v4069_v7, %v3956_v44 }
 0x337   : > { %v3868_v61 = vpop.f32.mrf.mxu1  ;;  %v4101_v15 = vpop.f32.mrf.mxu0 }
 0x338   : > { %v3959_v23 = vadd.f32 %v3868_v61, %v9693_v26  ;;  %v9816_v18 = vadd.f32 %v6743_v8, %v3961_v33 }
 0x339   : > { %v6708_v17 = vpop.f32.mrf.mxu1  ;;  %v6751_v11 = vpop.f32.mrf.mxu0 }
 0x33a   : > { %v3962_v47 = vadd.f32 %v6708_v17, %v9695_v1  ;;  %v9819_v43 = vadd.f32 %v4082_v21, %v3959_v23 }
 0x33b   : > { %v3871_v55 = vpop.f32.mrf.mxu1  ;;  %v4114_v7 = vpop.f32.mrf.mxu0 }
 0x33c   : > { %v3960_v49 = vadd.f32 %v3871_v55, %v9697_v22  ;;  %v9822_v24 = vadd.f32 %v6744_v9, %v3962_v47 }
 0x33d   : > { %v6711_v6 = vpop.f32.mrf.mxu1  ;;  %6926 = vmatmul.mubr.msk.bf16.gmra.mxu1 %vm535_vm1, %v9413_v53  ;;  %v6752_v21 = vpop.f32.mrf.mxu0 }
 0x33e   : > { %v3965_v26 = vadd.f32 %v6711_v6, %v9705_v32  ;;  %6929 = vmatprep.mubr.msk.bf16.mxu1 %vm535_vm1, %v9431_v51  ;;  %v9829_v8 = vadd.f32 %v4085_v38, %v3960_v49 }
 0x33f   : > { %v3884_v1 = vpop.f32.mrf.mxu1  ;;  %v4117_v9 = vpop.f32.mrf.mxu0 }
 0x340   : > { %v3963_v27 = vadd.f32 %v3884_v1, %v9709_v42  ;;  %v9832_v58 = vadd.f32 %v6747_v25, %v3965_v26 }
 0x341   : > { %v6712_v22 = vpop.f32.mrf.mxu1  ;;  %v6755_v44 = vpop.f32.mrf.mxu0 }
 0x342   : > { %v3966_v3 = vadd.f32 %v6712_v22, %v9714_v48  ;;  %v9835_v41 = vadd.f32 %v4098_v2, %v3963_v27 }
 0x343   : > { %v3887_v53 = vpop.f32.mrf.mxu1  ;;  %v4130_v38 = vpop.f32.mrf.mxu0 }
 0x344   : > { %v3964_v32 = vadd.f32 %v3887_v53, %v9718_v46  ;;  %v9838_v4 = vadd.f32 %v6748_v30, %v3966_v3 }
 0x345   : > { %v6715_v51 = vpop.f32.mrf.mxu1  ;;  %6930 = vmatmul.mubr.msk.bf16.gmra.mxu1 %vm535_vm1, %v9433_v39  ;;  %v6756_v2 = vpop.f32.mrf.mxu0 }
 0x346   : > { %v3969_v42 = vadd.f32 %v6715_v51, %v9726_v13  ;;  %6933 = vmatprep.mubr.msk.bf16.mxu1 %vm535_vm1, %v9438_v35  ;;  %v9845_v25 = vadd.f32 %v4101_v15, %v3964_v32 }
 0x347   : > { %v3900_v48 = vpop.f32.mrf.mxu1  ;;  %v4133_v30 = vpop.f32.mrf.mxu0 }
 0x348   : > { %v3967_v33 = vadd.f32 %v3900_v48, %v9730_v5  ;;  %v9848_v61 = vadd.f32 %v6751_v11, %v3969_v42  ;;  %v10979_v42 = vld [vmem:[#allocation68_spill] sm:$0xff] }
 0x349   : > { %v6716_v46 = vpop.f32.mrf.mxu1  ;;  %v6759_v47 = vpop.f32.mrf.mxu0 }
 0x34a   : > { %v3970_v23 = vadd.f32 %v6716_v46, %v9732_v59  ;;  %v9851_v17 = vadd.f32 %v4114_v7, %v3967_v33 }
 0x34b   : > { %v3903_v39 = vpop.f32.mrf.mxu1  ;;  %v4146_v15 = vpop.f32.mrf.mxu0 }
 0x34c   : > { %v3968_v13 = vadd.f32 %v3903_v39, %v9735_v20  ;;  %v9854_v55 = vadd.f32 %v6752_v21, %v3970_v23 }
 0x34d   : > { %v6719_v35 = vpop.f32.mrf.mxu1  ;;  %6934 = vmatmul.mubr.msk.bf16.gmra.mxu1 %vm535_vm1, %v9457_v52  ;;  %v6760_v49 = vpop.f32.mrf.mxu0 }
 0x34e   : > { %v3973_v5 = vadd.f32 %v6719_v35, %v9739_v34  ;;  %6937 = vmatprep.mubr.msk.bf16.mxu1 %vm535_vm1, %v9596_v29  ;;  %v9861_v11 = vadd.f32 %v4117_v9, %v3968_v13  ;;  %v10978_v9 = vpack.c.bf16 %v9631_v16, %v9625_v56 }
 0x34f   : > { %v3916_v59 = vpop.f32.mrf.mxu1  ;;  %v4149_v26 = vpop.f32.mrf.mxu0 }
 0x350   : > { %v3971_v6 = vadd.f32 %v3916_v59, %v9743_v14  ;;  %v9864_v7 = vadd.f32 %v6755_v44, %v3973_v5 }
 0x351   : > { %v6720_v20 = vpop.f32.mrf.mxu1  ;;  %v9869_v27 = vpop.f32.mrf.mxu0 }
 0x352   : > { %v3974_v1 = vadd.f32 %v6720_v20, %v9747_v40  ;;  %v9867_v21 = vadd.f32 %v4130_v38, %v3971_v6 }
 0x353   : > { %v3919_v52 = vpop.f32.mrf.mxu1  ;;  %v9878_v14 = vpop.f32.mrf.mxu0 }
 0x354   : > { %v3972_v34 = vadd.f32 %v3919_v52, %v9749_v19  ;;  %v9872_v29 = vadd.f32 %v6756_v2, %v3974_v1 }
 0x355   : > { %v6723_v22 = vpop.f32.mrf.mxu1  ;;  %6938 = vmatmul.mubr.msk.bf16.gmra.mxu1 %vm535_vm1, %v10978_v9  ;;  %v9883_v44 = vpop.f32.mrf.mxu0 }
 0x356   : > { %v3977_v3 = vadd.f32 %v6723_v22, %v9752_v36  ;;  %v9881_v40 = vadd.f32 %v4133_v30, %v3972_v34  ;;  %v10980_v36 = vld [vmem:[#allocation67_spill] sm:$0xff] }
 0x357   : > { %v3932_v53 = vpop.f32.mrf.mxu1  ;;  %v9888_v38 = vpop.f32.mrf.mxu0 }
 0x358   : > { %v3975_v32 = vadd.f32 %v3932_v53, %v9756_v50  ;;  %v9886_v19 = vadd.f32 %v6759_v47, %v3977_v3 }
 0x359   : > { %v6724_v51 = vpop.f32.mrf.mxu1  ;;  %v9893_v2 = vpop.f32.mrf.mxu0 }
 0x35a   : > { %v3978_v56 = vadd.f32 %v6724_v51, %v10979_v42  ;;  %v9891_v16 = vadd.f32 %v4146_v15, %v3975_v32 }
 0x35b   : > { %v3935_v48 = vpop.f32.mrf.mxu1  ;;  %v9898_v23 = vpop.f32.mrf.mxu0 }
 0x35c   : > { %v3976_v33 = vadd.f32 %v3935_v48, %v10980_v36  ;;  %v9896_v46 = vadd.f32 %v6760_v49, %v3978_v56 }
 0x35d   : > { %v6767_v30 = vpop.f32.mrf.mxu1  ;;  %v9905_v13 = vpop.f32.mrf.mxu0 }
 0x35e   : > { %v9901_v50 = vadd.f32 %v6767_v30, %v9768_v54  ;;  %v9903_v39 = vadd.f32 %v4149_v26, %v3976_v33 }
 0x35f   : > { %v4258_v47 = vpop.f32.mrf.mxu1  ;;  %v9910_v5 = vpop.f32.mrf.mxu0 }
 0x360   : > { %v9908_v35 = vadd.f32 %v4258_v47, %v9771_v0 }
 0x361   : > { %v6768_v15 = vpop.f32.mrf.mxu1  ;;  %v9915_v6 = vpop.f32.mrf.mxu0 }
 0x362   : > { %v9913_v59 = vadd.f32 %v6768_v15, %v9774_v45 }
 0x363   : > { %v4261_v49 = vpop.f32.mrf.mxu1  ;;  %v9920_v26 = vpop.f32.mrf.mxu0 }
 0x364   : > { %v9918_v54 = vadd.f32 %v4261_v49, %v9781_v10 }
 0x365   : > { %v6771_v20 = vpop.f32.mrf.mxu1  ;;  %v9925_v52 = vpop.f32.mrf.mxu0 }
 0x366   : > { %v9923_v1 = vadd.f32 %v6771_v20, %v9784_v60 }
 0x367   : > { %v4274_v0 = vpop.f32.mrf.mxu1  ;;  %v9930_v22 = vpop.f32.mrf.mxu0 }
 0x368   : > { %v9928_v34 = vadd.f32 %v4274_v0, %v9787_v57 }
 0x369   : > { %v6772_v45 = vpop.f32.mrf.mxu1  ;;  %v9935_v3 = vpop.f32.mrf.mxu0 }
 0x36a   : > { %v9933_v9 = vadd.f32 %v6772_v45, %v9790_v12 }
 0x36b   : > { %v4277_v10 = vpop.f32.mrf.mxu1  ;;  %v9940_v32 = vpop.f32.mrf.mxu0 }
 0x36c   : > { %v9938_v53 = vadd.f32 %v4277_v10, %v9797_v31 }
 0x36d   : > { %v6775_v60 = vpop.f32.mrf.mxu1  ;;  %v9945_v42 = vpop.f32.mrf.mxu0 }
 0x36e   : > { %v9943_v51 = vadd.f32 %v6775_v60, %v9800_v62 }
 0x36f   : > { %v4290_v57 = vpop.f32.mrf.mxu1  ;;  %v9950_v48 = vpop.f32.mrf.mxu0 }
 0x370   : > { %v9948_v56 = vadd.f32 %v4290_v57, %v9803_v28 }
 0x371   : > { %v6776_v12 = vpop.f32.mrf.mxu1  ;;  %v9955_v33 = vpop.f32.mrf.mxu0 }
 0x372   : > { %v9953_v36 = vadd.f32 %v6776_v12, %v9806_v63 }
 0x373   : > { %v4293_v31 = vpop.f32.mrf.mxu1  ;;  %v9960_v47 = vpop.f32.mrf.mxu0 }
 0x374   : > { %v9958_v30 = vadd.f32 %v4293_v31, %v9813_v37 }
 0x375   : > { %v6779_v62 = vpop.f32.mrf.mxu1  ;;  %v9965_v49 = vpop.f32.mrf.mxu0 }
 0x376   : > { %v9963_v15 = vadd.f32 %v6779_v62, %v9816_v18 }
 0x377   : > { %v4306_v28 = vpop.f32.mrf.mxu1  ;;  %v9970_v0 = vpop.f32.mrf.mxu0 }
 0x378   : > { %v9968_v20 = vadd.f32 %v4306_v28, %v9819_v43 }
 0x379   : > { %v6780_v63 = vpop.f32.mrf.mxu1  ;;  %v9975_v10 = vpop.f32.mrf.mxu0 }
 0x37a   : > { %v9973_v45 = vadd.f32 %v6780_v63, %v9822_v24 }
 0x37b   : > { %v4309_v37 = vpop.f32.mrf.mxu1  ;;  %v9980_v57 = vpop.f32.mrf.mxu0 }
 0x37c   : > { %v9978_v60 = vadd.f32 %v4309_v37, %v9829_v8  ;;  %10981 = vst [vmem:[#allocation69_spill] sm:$0xff] %v9980_v57 }
 0x37d   : > { %v6783_v18 = vpop.f32.mrf.mxu1  ;;  %v9985_v31 = vpop.f32.mrf.mxu0 }
 0x37e   : > { %v9983_v12 = vadd.f32 %v6783_v18, %v9832_v58  ;;  %10982 = vst [vmem:[#allocation71_spill] sm:$0xff] %v9985_v31 }
 0x37f   : > { %v4322_v43 = vpop.f32.mrf.mxu1  ;;  %v9990_v28 = vpop.f32.mrf.mxu0 }
 0x380   : > { %v9988_v62 = vadd.f32 %v4322_v43, %v9835_v41  ;;  %10983 = vst [vmem:[#allocation70_spill] sm:$0xff] %v9990_v28 }
 0x381   : > { %v6784_v24 = vpop.f32.mrf.mxu1  ;;  %v9995_v37 = vpop.f32.mrf.mxu0 }
 0x382   : > { %v9993_v63 = vadd.f32 %v6784_v24, %v9838_v4  ;;  %10984 = vst [vmem:[#allocation73_spill] sm:$0xff] %v9995_v37 }
 0x383   : > { %v4325_v8 = vpop.f32.mrf.mxu1  ;;  %v10000_v18 = vpop.f32.mrf.mxu0 }
 0x384   : > { %v9998_v57 = vadd.f32 %v4325_v8, %v9845_v25  ;;  %10985 = vst [vmem:[#allocation72_spill] sm:$0xff] %v10000_v18 }
 0x385   : > { %v6787_v58 = vpop.f32.mrf.mxu1  ;;  %v10005_v43 = vpop.f32.mrf.mxu0 }
 0x386   : > { %v10003_v31 = vadd.f32 %v6787_v58, %v9848_v61  ;;  %10986 = vst [vmem:[#allocation76_spill] sm:$0xff] %v10005_v43 }
 0x387   : > { %v4338_v41 = vpop.f32.mrf.mxu1  ;;  %v10010_v24 = vpop.f32.mrf.mxu0 }
 0x388   : > { %v10008_v28 = vadd.f32 %v4338_v41, %v9851_v17  ;;  %10987 = vst [vmem:[#allocation80_spill] sm:$0xff] %v10010_v24 }
 0x389   : > { %v6788_v4 = vpop.f32.mrf.mxu1  ;;  %v10018_v18 = vpop.f32.mrf.mxu0 }
 0x38a   : > { %v10013_v37 = vadd.f32 %v6788_v4, %v9854_v55  ;;  %10988 = vst [vmem:[#allocation77_spill] sm:$0xff] %v10018_v18 }
 0x38b   : > { %v4341_v25 = vpop.f32.mrf.mxu1  ;;  %v10026_v41 = vpop.f32.mrf.mxu0 }
 0x38c   : > { %v10016_v8 = vadd.f32 %v4341_v25, %v9861_v11  ;;  %10990 = vst [vmem:[#allocation84_spill] sm:$0xff] %v10026_v41 }
 0x38d   : > { %v6791_v61 = vpop.f32.mrf.mxu1  ;;  %v10034_v25 = vpop.f32.mrf.mxu0 }
 0x38e   : > { %v10021_v58 = vadd.f32 %v6791_v61, %v9864_v7  ;;  %10993 = vst [vmem:[#allocation86_spill] sm:$0xff] %v10034_v25 }
 0x38f   : > { %v4354_v43 = vpop.f32.mrf.mxu1 }
 0x390   : > { %v10024_v17 = vadd.f32 %v4354_v43, %v9867_v21  ;;  %v10042_v43 = vpop.f32.mrf.mxu0 }
 0x391   : > { %v6792_v24 = vpop.f32.mrf.mxu1  ;;  %10996 = vst [vmem:[#allocation93_spill] sm:$0xff] %v10042_v43 }
 0x392   : > { %10989 = vst [vmem:[#allocation82_spill] sm:$0xff] %v10024_v17  ;;  %v10029_v55 = vadd.f32 %v6792_v24, %v9872_v29 }
 0x393   : > { %v4357_v4 = vpop.f32.mrf.mxu1 }
 0x394   : > { %10991 = vst [vmem:[#allocation74_spill] sm:$0xff] %v10029_v55  ;;  %v10032_v11 = vadd.f32 %v4357_v4, %v9881_v40  ;;  %v10047_v55 = vpop.f32.mrf.mxu0 }
 0x395   : > { %v6795_v18 = vpop.f32.mrf.mxu1 }
 0x396   : > { %10992 = vst [vmem:[#allocation78_spill] sm:$0xff] %v10032_v11  ;;  %v10037_v7 = vadd.f32 %v6795_v18, %v9886_v19  ;;  %v10052_v19 = vpop.f32.mrf.mxu0 }
 0x397   : > { %v4370_v61 = vpop.f32.mrf.mxu1 }
 0x398   : > { %10994 = vst [vmem:[#allocation89_spill] sm:$0xff] %v10037_v7  ;;  %v10040_v21 = vadd.f32 %v4370_v61, %v9891_v16  ;;  %v10056_v16 = vpop.f32.mrf.mxu0 }
 0x399   : > { %v6796_v41 = vpop.f32.mrf.mxu1  ;;  %10999 = vst [vmem:[#allocation79_spill] sm:$0xff] %v10056_v16 }
 0x39a   : > { %10995 = vst [vmem:[#allocation91_spill] sm:$0xff] %v10040_v21  ;;  %v10045_v29 = vadd.f32 %v6796_v41, %v9896_v46  ;;  %v10062_v46 = vpop.f32.mrf.mxu0 }
 0x39b   : > { %v4373_v24 = vpop.f32.mrf.mxu1  ;;  %11001 = vst [vmem:[#allocation100_spill] sm:$0xff] %v10062_v46 }
 0x39c   : > { %10997 = vst [vmem:[#allocation95_spill] sm:$0xff] %v10045_v29  ;;  %v10050_v40 = vadd.f32 %v4373_v24, %v9903_v39  ;;  %v10068_v39 = vpop.f32.mrf.mxu0 }
 0x39d   : > { %v6839_v4 = vpop.f32.mrf.mxu1  ;;  %11004 = vst [vmem:[#allocation83_spill] sm:$0xff] %v10068_v39 }
 0x39e   : > { %10998 = vst [vmem:[#allocation75_spill] sm:$0xff] %v10050_v40  ;;  %v10074_v21 = vpop.f32.mrf.mxu0 }
 0x39f   : > { %v4693_v25 = vpop.f32.mrf.mxu1  ;;  %11007 = vst [vmem:[#allocation85_spill] sm:$0xff] %v10074_v21 }
 0x3a0   : > { %v10080_v16 = vpop.f32.mrf.mxu0 }
 0x3a1   : > { %v6840_v18 = vpop.f32.mrf.mxu1  ;;  %11010 = vst [vmem:[#allocation90_spill] sm:$0xff] %v10080_v16 }
 0x3a3   : > { %v10054_v7 = vpop.f32.mrf.mxu1 }
 0x3a5   : > { %v10058_v61 = vpop.f32.mrf.mxu1 }
 0x3a7   : > { %v10060_v43 = vpop.f32.mrf.mxu1 }
 0x3a8   : > { %11000 = vst [vmem:[#allocation97_spill] sm:$0xff] %v10060_v43 }
 0x3a9   : > { %v10064_v41 = vpop.f32.mrf.mxu1 }
 0x3aa   : > { %11002 = vst [vmem:[#allocation102_spill] sm:$0xff] %v10064_v41  ;;  %v10086_v41 = vpop.f32.mrf.mxu0 }
 0x3ab   : > { %v10066_v29 = vpop.f32.mrf.mxu1  ;;  %11013 = vst [vmem:[#allocation96_spill] sm:$0xff] %v10086_v41 }
 0x3ac   : > { %11003 = vst [vmem:[#allocation81_spill] sm:$0xff] %v10066_v29 }
 0x3ad   : > { %v10070_v24 = vpop.f32.mrf.mxu1 }
 0x3ae   : > { %11005 = vst [vmem:[#allocation104_spill] sm:$0xff] %v10070_v24  ;;  %v10092_v24 = vpop.f32.mrf.mxu0 }
 0x3af   : > { %v10072_v40 = vpop.f32.mrf.mxu1  ;;  %11016 = vst [vmem:[#allocation103_spill] sm:$0xff] %v10092_v24 }
 0x3b0   : > { %11006 = vst [vmem:[#allocation107_spill] sm:$0xff] %v10072_v40 }
 0x3b1   : > { %v10076_v11 = vpop.f32.mrf.mxu1 }
 0x3b2   : > { %11008 = vst [vmem:[#allocation87_spill] sm:$0xff] %v10076_v11  ;;  %v10098_v11 = vpop.f32.mrf.mxu0 }
 0x3b3   : > { %v10078_v17 = vpop.f32.mrf.mxu1  ;;  %11019 = vst [vmem:[#allocation110_spill] sm:$0xff] %v10098_v11 }
 0x3b4   : > { %11009 = vst [vmem:[#allocation88_spill] sm:$0xff] %v10078_v17 }
 0x3b5   : > { %v10082_v43 = vpop.f32.mrf.mxu1 }
 0x3b6   : > { %11011 = vst [vmem:[#allocation92_spill] sm:$0xff] %v10082_v43  ;;  %v10104_v43 = vpop.f32.mrf.mxu0 }
 0x3b7   : > { %v10084_v46 = vpop.f32.mrf.mxu1 }
 0x3b8   : > { %11012 = vst [vmem:[#allocation94_spill] sm:$0xff] %v10084_v46 }
 0x3b9   : > { %v10088_v29 = vpop.f32.mrf.mxu1 }
 0x3ba   : > { %11014 = vst [vmem:[#allocation99_spill] sm:$0xff] %v10088_v29  ;;  %v10110_v29 = vpop.f32.mrf.mxu0 }
 0x3bb   : > { %v10090_v39 = vpop.f32.mrf.mxu1  ;;  %11024 = vst [vmem:[#allocation9_spill] sm:$0xff] %v10110_v29 }
 0x3bc   : > { %11015 = vst [vmem:[#allocation101_spill] sm:$0xff] %v10090_v39 }
 0x3bd   : > { %v10094_v40 = vpop.f32.mrf.mxu1 }
 0x3be   : > { %11017 = vst [vmem:[#allocation105_spill] sm:$0xff] %v10094_v40  ;;  %v10116_v40 = vpop.f32.mrf.mxu0 }
 0x3bf   : > { %v10096_v21 = vpop.f32.mrf.mxu1  ;;  %11027 = vst [vmem:[#allocation58_spill] sm:$0xff] %v10116_v40 }
 0x3c0   : > { %11018 = vst [vmem:[#allocation108_spill] sm:$0xff] %v10096_v21 }
 0x3c1   : > { %v10100_v17 = vpop.f32.mrf.mxu1 }
 0x3c2   : > { %11020 = vst [vmem:[#allocation111_spill] sm:$0xff] %v10100_v17  ;;  %v10122_v17 = vpop.f32.mrf.mxu0 }
 0x3c3   : > { %v10102_v16 = vpop.f32.mrf.mxu1 }
 0x3c4   : > { %11021 = vst [vmem:[#allocation112_spill] sm:$0xff] %v10102_v16 }
 0x3c5   : > { %v10106_v46 = vpop.f32.mrf.mxu1 }
 0x3c6   : > { %11022 = vst [vmem:[#allocation113_spill] sm:$0xff] %v10106_v46 }
 0x3c7   : > { %v10108_v41 = vpop.f32.mrf.mxu1 }
 0x3c8   : > { %11023 = vst [vmem:[#allocation10_spill] sm:$0xff] %v10108_v41  ;;  %v10128_v41 = vpop.f32.mrf.mxu0 }
 0x3c9   : > { %v10112_v39 = vpop.f32.mrf.mxu1 }
 0x3ca   : > { %11025 = vst [vmem:[#allocation14_spill] sm:$0xff] %v10112_v39 }
 0x3cb   : > { %v10114_v24 = vpop.f32.mrf.mxu1 }
 0x3cc   : > { %11026 = vst [vmem:[#allocation98_spill] sm:$0xff] %v10114_v24  ;;  %v4608_v24 = vadd.f32 %v9869_v27, %v9901_v50  ;;  %v4610_v27 = vadd.f32 %v9898_v23, %v9928_v34  ;;  %v4613_v50 = vadd.f32 %v9905_v13, %v9933_v9  ;;  %v10162_v23 = vadd.f32 %v9925_v52, %v9953_v36 }
 0x3cd   : > { %v10118_v21 = vpop.f32.mrf.mxu1  ;;  %v10166_v13 = vadd.f32 %v9930_v22, %v9958_v30  ;;  %v10186_v52 = vadd.f32 %v9950_v48, %v9978_v60  ;;  %v10191_v22 = vadd.f32 %v9955_v33, %v9983_v12  ;;  %v10195_v9 = vadd.f32 %v9960_v47, %v9988_v62  ;;  %v11036_v60 = vld [vmem:[#allocation73_spill] sm:$0xff]  ;;  %v11037_v62 = vld [vmem:[#allocation79_spill] sm:$0xff] }
 0x3ce   : > { %11028 = vst [vmem:[#allocation16_spill] sm:$0xff] %v10118_v21  ;;  %v4822_v40 = vadd.f32 %v6839_v4, %v4608_v24  ;;  %v4609_v21 = vadd.f32 %v9883_v44, %v9913_v59  ;;  %v4611_v44 = vadd.f32 %v9910_v5, %v9938_v53  ;;  %v10170_v59 = vadd.f32 %v9935_v3, %v9963_v15  ;;  %v11034_v15 = vld [vmem:[#allocation71_spill] sm:$0xff]  ;;  %v11047_v24 = vld [vmem:[#allocation17_spill] sm:$0xff] }
 0x3cf   : > { %v10120_v11 = vpop.f32.mrf.mxu1  ;;  %v10174_v5 = vadd.f32 %v9940_v32, %v9968_v20  ;;  %v10199_v3 = vadd.f32 %v9965_v49, %v9993_v63  ;;  %v10203_v53 = vadd.f32 %v9970_v0, %v9998_v57  ;;  %v10223_v49 = vadd.f32 %v11034_v15, %v10013_v37  ;;  %v11035_v20 = vld [vmem:[#allocation70_spill] sm:$0xff]  ;;  %v11038_v63 = vld [vmem:[#allocation97_spill] sm:$0xff]  ;;  %v11051_v15 = vld [vmem:[#allocation100_spill] sm:$0xff] }
 0x3d0   : > { %11029 = vst [vmem:[#allocation109_spill] sm:$0xff] %v10120_v11  ;;  %v4606_v11 = vadd.f32 %v9878_v14, %v9908_v35  ;;  %v10152_v14 = vstv %s5965_s19  ;;  %v5046_v34 = vadd.f32 %v10047_v55, %v4822_v40  ;;  %v10227_v0 = vadd.f32 %v11035_v20, %v10016_v8  ;;  %v11039_v37 = vld [vmem:[#allocation82_spill] sm:$0xff]  ;;  %v11044_v40 = vld [vmem:[#allocation80_spill] sm:$0xff] }
 0x3d1   : > { %v10124_v16 = vpop.f32.mrf.mxu1  ;;  %v10233_v57 = vadd.f32 %v11036_v60, %v10021_v58  ;;  %v4824_v55 = vadd.f32 %v11038_v63, %v4610_v27  ;;  %v11041_v8 = vld [vmem:[#allocation74_spill] sm:$0xff]  ;;  %v11052_v60 = vld [vmem:[#allocation83_spill] sm:$0xff] }
 0x3d2   : > { %11030 = vst [vmem:[#allocation106_spill] sm:$0xff] %v10124_v16  ;;  %v4607_v16 = vadd.f32 %v9888_v38, %v9918_v54  ;;  %v4820_v35 = vadd.f32 %v4693_v25, %v4606_v11  ;;  %v4616_v38 = vadd.f32 %v9915_v6, %v9943_v51  ;;  %v4823_v54 = vadd.f32 %v6840_v18, %v4609_v21  ;;  %v10208_v51 = vld [vmem:[%s10525_s4] ss:$0 sm:$0xff]  ;;  %v11045_v18 = vld [vmem:[#allocation89_spill] sm:$0xff] }
 0x3d3   : > { %v10126_v46 = vpop.f32.mrf.mxu1  ;;  %v11040_v11 = vld [vmem:[#allocation72_spill] sm:$0xff] }
 0x3d4   : > { %11031 = vst [vmem:[#allocation39_spill] sm:$0xff] %v10126_v46  ;;  %v10142_v46 = vpop.f32.mrf.mxu0  ;;  %v5044_v33 = vadd.f32 %v10052_v19, %v4820_v35  ;;  %v4821_v30 = vadd.f32 %v10054_v7, %v4607_v16  ;;  %v10240_v25 = vadd.f32 %v11040_v11, %v11039_v37  ;;  %v11042_v7 = vld [vmem:[#allocation76_spill] sm:$0xff]  ;;  %v11046_v16 = vld [vmem:[#allocation77_spill] sm:$0xff] }
 0x3d5   : > { %v10130_v29 = vpop.f32.mrf.mxu1  ;;  %v10244_v21 = vadd.f32 %v11042_v7, %v11041_v8  ;;  %v11054_v37 = vld [vmem:[#allocation81_spill] sm:$0xff]  ;;  %v11055_v11 = vld [vmem:[#allocation104_spill] sm:$0xff] }
 0x3d6   : > { %11032 = vst [vmem:[#allocation36_spill] sm:$0xff] %v10130_v29  ;;  %v4612_v29 = vadd.f32 %v9893_v2, %v9923_v1  ;;  %v4614_v2 = vadd.f32 %v9920_v26, %v9948_v56  ;;  %v10180_v26 = vadd.f32 %v9945_v42, %v9973_v45  ;;  %v10182_v1 = vpop.f32.mrf.mxu0  ;;  %v10212_v42 = vadd.f32 %v9975_v10, %v10003_v31  ;;  %v11033_v56 = vld [vmem:[#allocation69_spill] sm:$0xff] }
 0x3d7   : > { %v10134_v39 = vpop.f32.mrf.mxu1  ;;  %v10216_v48 = vadd.f32 %v11033_v56, %v10008_v28  ;;  %v5047_v28 = vadd.f32 %v11037_v62, %v4823_v54  ;;  %v11049_v56 = vld [vmem:[#allocation91_spill] sm:$0xff]  ;;  %v5045_v20 = vadd.f32 %v11051_v15, %v4821_v30  ;;  %v4825_v30 = vadd.f32 %v11054_v37, %v4611_v44 }
 0x3d8   : > { %v4826_v47 = vadd.f32 %v10058_v61, %v4612_v29  ;;  %v10229_v10 = vpop.f32.mrf.mxu0  ;;  %v11043_v29 = vld [vmem:[#allocation78_spill] sm:$0xff]  ;;  %v10253_v61 = vadd.f32 %v11046_v16, %v11045_v18  ;;  %v4830_v8 = vadd.f32 %v11055_v11, %v4616_v38 }
 0x3d9   : > { %v10150_v4 = vpop.f32.mrf.mxu1  ;;  %v10248_v19 = vadd.f32 %v11044_v40, %v11043_v29  ;;  %v11056_v29 = vld [vmem:[#allocation85_spill] sm:$0xff]  ;;  %v11057_v16 = vld [vmem:[#allocation18_spill] sm:$0xff] }
 0x3da   : > { %v5050_v62 = vadd.f32 %v11052_v60, %v4826_v47  ;;  %v10264_v63 = vpop.f32.mrf.mxu0  ;;  %v5048_v40 = vadd.f32 %v11056_v29, %v4824_v55  ;;  %v11059_v38 = vld [vmem:[#allocation90_spill] sm:$0xff]  ;;  %v11064_v29 = vld [vmem:[#allocation23_spill] sm:$0xff] }
 0x3db   : > { %v10176_v6 = vpop.f32.mrf.mxu1 }
 0x3dc   : > { %v10284_v15 = vpop.f32.mrf.mxu0 }
 0x3dd   : > { %v6911_v32 = vpop.f32.mrf.mxu1 }
 0x3de   : > { %v5267_v36 = vadd.f32 %v6911_v32, %v5046_v34  ;;  %v11048_v34 = vld [vmem:[#allocation102_spill] sm:$0xff] }
 0x3df   : > { %v5138_v45 = vpop.f32.mrf.mxu1  ;;  %v4827_v32 = vadd.f32 %v11048_v34, %v4613_v50  ;;  %v11058_v34 = vld [vmem:[#allocation107_spill] sm:$0xff] }
 0x3e0   : > { %v5306_v12 = vadd.f32 %v10208_v51, %v5267_v36  ;;  %v5265_v31 = vadd.f32 %v5138_v45, %v5044_v33  ;;  %v11050_v36 = vld [vmem:[#allocation84_spill] sm:$0xff] }
 0x3e1   : > { %v6912_v58 = vpop.f32.mrf.mxu1  ;;  %v10260_v33 = vadd.f32 %v11050_v36, %v11049_v56  ;;  %v4828_v56 = vadd.f32 %v11058_v34, %v4614_v2  ;;  %v5051_v36 = vadd.f32 %v11059_v38, %v4827_v32  ;;  %v11061_v2 = vld [vmem:[#allocation13_spill] sm:$0xff]  ;;  %v11066_v34 = vld [vmem:[#allocation88_spill] sm:$0xff] }
 0x3e2   : > { %v5338_v27 = vadd.f32 %v5306_v12, %v11047_v24  ;;  %v5304_v35 = vadd.f32 %v10208_v51, %v5265_v31  ;;  %v5268_v54 = vadd.f32 %v6912_v58, %v5047_v28  ;;  %v11053_v12 = vld [vmem:[#allocation12_spill] sm:$0xff] }
 0x3e3   : > { %v5141_v45 = vpop.f32.mrf.mxu1 }
 0x3e4   : > { %vm5371_vm0 = vcmp.ge.f32.partialorder %v5338_v27, 0.0  ;;  %v5404_v50 = vmul.f32 %v10152_v14, %v5338_v27  ;;  %v5336_v31 = vadd.f32 %v5304_v35, %v11053_v12  ;;  %v5307_v28 = vadd.f32 %v10208_v51, %v5268_v54 }
 0x3e5   : > { %v5266_v47 = vadd.f32 %v5141_v45, %v5045_v20  ;;  %v6915_v7 = vpop.f32.mrf.mxu1  ;;  %v11060_v45 = vld [vmem:[#allocation87_spill] sm:$0xff] }
 0x3e6   : > { %v5436_v58 = vsel %vm5371_vm0, %v5338_v27, %v5404_v50  ;;  %vm5369_vm2 = vcmp.ge.f32.partialorder %v5336_v31, 0.0  ;;  %v5402_v18 = vmul.f32 %v10152_v14, %v5336_v31  ;;  %v5339_v24 = vadd.f32 %v5307_v28, %v11057_v16  ;;  %v11062_v28 = vld [vmem:[#allocation96_spill] sm:$0xff] }
 0x3e7   : > { %5468 = vst.msk [vmem:[%s10269_s25 + $0x10] sm:$0xff] %vm535_vm1, %v5436_v58  ;;  %v5305_v35 = vadd.f32 %v10208_v51, %v5266_v47  ;;  %v5271_v44 = vadd.f32 %v6915_v7, %v5050_v62  ;;  %v5154_v54 = vpop.f32.mrf.mxu1  ;;  %v4831_v60 = vadd.f32 %v11060_v45, %v10162_v23  ;;  %v5049_v32 = vadd.f32 %v11062_v28, %v4825_v30  ;;  %v11063_v47 = vld [vmem:[#allocation103_spill] sm:$0xff] }
 0x3e8   : > { %v5434_v55 = vsel %vm5369_vm2, %v5336_v31, %v5402_v18  ;;  %vm5372_vm10 = vcmp.ge.f32.partialorder %v5339_v24, 0.0  ;;  %v5405_v27 = vmul.f32 %v10152_v14, %v5339_v24  ;;  %v5269_v20 = vadd.f32 %v5154_v54, %v5048_v40  ;;  %v11065_v18 = vld [vmem:[#allocation110_spill] sm:$0xff] }
 0x3e9   : > { %5466 = vst.msk [vmem:[%s10269_s25] sm:$0xff] %vm535_vm1, %v5434_v55  ;;  %v5337_v50 = vadd.f32 %v5305_v35, %v11061_v2  ;;  %v5310_v62 = vadd.f32 %v10208_v51, %v5271_v44  ;;  %v6916_v12 = vpop.f32.mrf.mxu1  ;;  %v5054_v7 = vadd.f32 %v11063_v47, %v4830_v8  ;;  %v5052_v16 = vadd.f32 %v11065_v18, %v4828_v56  ;;  %v11067_v35 = vld [vmem:[#allocation20_spill] sm:$0xff] }
 0x3ea   : > { %v5437_v37 = vsel %vm5372_vm10, %v5339_v24, %v5405_v27  ;;  %v5308_v11 = vadd.f32 %v10208_v51, %v5269_v20  ;;  %v5272_v31 = vadd.f32 %v6916_v12, %v5051_v36  ;;  %v4829_v30 = vadd.f32 %v11066_v34, %v10166_v13  ;;  %v10303_v24 = vpop.f32.mrf.mxu0  ;;  %v11068_v56 = vld [vmem:[#allocation24_spill] sm:$0xff] }
 0x3eb   : > { %5469 = vst.msk [vmem:[%s10269_s25 + $0x18] sm:$0xff] %vm535_vm1, %v5437_v37  ;;  %vm5370_vm11 = vcmp.ge.f32.partialorder %v5337_v50, 0.0  ;;  %v5403_v23 = vmul.f32 %v10152_v14, %v5337_v50  ;;  %v5342_v40 = vadd.f32 %v5310_v62, %v11064_v29  ;;  %v5157_v58 = vpop.f32.mrf.mxu1  ;;  %v5055_v27 = vadd.f32 %v10104_v43, %v4831_v60  ;;  %v11069_v2 = vld [vmem:[#allocation92_spill] sm:$0xff]  ;;  %v11070_v62 = vld [vmem:[#allocation94_spill] sm:$0xff] }
 0x3ec   : > { %v5340_v44 = vadd.f32 %v5308_v11, %v11067_v35  ;;  %v5311_v8 = vadd.f32 %v10208_v51, %v5272_v31  ;;  %v5270_v54 = vadd.f32 %v5157_v58, %v5049_v32  ;;  %v4832_v12 = vadd.f32 %v11070_v62, %v10174_v5  ;;  %v10318_v43 = vpop.f32.mrf.mxu0  ;;  %v11071_v31 = vld [vmem:[#allocation21_spill] sm:$0xff] }
 0x3ed   : > { %v5435_v38 = vsel %vm5370_vm11, %v5337_v50, %v5403_v23  ;;  %vm5375_vm12 = vcmp.ge.f32.partialorder %v5342_v40, 0.0  ;;  %v5408_v36 = vmul.f32 %v10152_v14, %v5342_v40  ;;  %v6919_v55 = vpop.f32.mrf.mxu1  ;;  %v4834_v50 = vadd.f32 %v11069_v2, %v10170_v59  ;;  %v11072_v23 = vld [vmem:[#allocation99_spill] sm:$0xff] }
 0x3ee   : > { %5467 = vst.msk [vmem:[%s10269_s25 + $0x8] sm:$0xff] %vm535_vm1, %v5435_v38  ;;  %vm5373_vm13 = vcmp.ge.f32.partialorder %v5340_v44, 0.0  ;;  %v5406_v13 = vmul.f32 %v10152_v14, %v5340_v44  ;;  %v5343_v20 = vadd.f32 %v5311_v8, %v11068_v56  ;;  %v5309_v45 = vadd.f32 %v10208_v51, %v5270_v54 }
 0x3ef   : > { %v5440_v28 = vsel %vm5375_vm12, %v5342_v40, %v5408_v36  ;;  %v5275_v32 = vadd.f32 %v6919_v55, %v5054_v7  ;;  %v5170_v37 = vpop.f32.mrf.mxu1  ;;  %v4835_v59 = vadd.f32 %v11072_v23, %v10180_v26  ;;  %v11073_v40 = vld [vmem:[#allocation9_spill] sm:$0xff]  ;;  %v11075_v26 = vld [vmem:[#allocation30_spill] sm:$0xff] }
 0x3f0   : > { %5472 = vst.msk [vmem:[%s10269_s25 + $0x30] sm:$0xff] %vm535_vm1, %v5440_v28  ;;  %v5438_v60 = vsel %vm5373_vm13, %v5340_v44, %v5406_v13  ;;  %vm5376_vm14 = vcmp.ge.f32.partialorder %v5343_v20, 0.0  ;;  %v5409_v11 = vmul.f32 %v10152_v14, %v5343_v20  ;;  %v5341_v47 = vadd.f32 %v5309_v45, %v11071_v31  ;;  %v11074_v44 = vld [vmem:[#allocation101_spill] sm:$0xff]  ;;  %v10338_v13 = vpop.f32.mrf.mxu0  ;;  %v11077_v45 = vld [vmem:[#allocation28_spill] sm:$0xff] }
 0x3f1   : > { %5470 = vst.msk [vmem:[%s10269_s25 + $0x20] sm:$0xff] %vm535_vm1, %v5438_v60  ;;  %v5314_v5 = vadd.f32 %v10208_v51, %v5275_v32  ;;  %v5273_v7 = vadd.f32 %v5170_v37, %v5052_v16  ;;  %v6920_v29 = vpop.f32.mrf.mxu1  ;;  %v5053_v58 = vadd.f32 %v11073_v40, %v4829_v30  ;;  %v4833_v8 = vadd.f32 %v11074_v44, %v10186_v52  ;;  %v11076_v16 = vld [vmem:[#allocation58_spill] sm:$0xff]  ;;  %v11079_v37 = vld [vmem:[#allocation31_spill] sm:$0xff] }
 0x3f2   : > { %v5441_v18 = vsel %vm5376_vm14, %v5343_v20, %v5409_v11  ;;  %vm5374_vm15 = vcmp.ge.f32.partialorder %v5341_v47, 0.0  ;;  %v5407_v34 = vmul.f32 %v10152_v14, %v5341_v47  ;;  %v5276_v35 = vadd.f32 %v6920_v29, %v5055_v27  ;;  %v11081_v29 = vld [vmem:[#allocation108_spill] sm:$0xff] }
 0x3f3   : > { %5473 = vst.msk [vmem:[%s10269_s25 + $0x38] sm:$0xff] %vm535_vm1, %v5441_v18  ;;  %v5346_v54 = vadd.f32 %v5314_v5, %v11075_v26  ;;  %v5312_v38 = vadd.f32 %v10208_v51, %v5273_v7  ;;  %v5173_v36 = vpop.f32.mrf.mxu1  ;;  %v5058_v55 = vadd.f32 %v11076_v16, %v4834_v50  ;;  %v5056_v27 = vadd.f32 %v10122_v17, %v4832_v12  ;;  %v11078_v50 = vld [vmem:[#allocation105_spill] sm:$0xff]  ;;  %v10353_v5 = vpop.f32.mrf.mxu0  ;;  %v11083_v26 = vld [vmem:[#allocation40_spill] sm:$0xff] }
 0x3f4   : > { %v5439_v30 = vsel %vm5374_vm15, %v5341_v47, %v5407_v34  ;;  %v5315_v56 = vadd.f32 %v10208_v51, %v5276_v35  ;;  %v5274_v20 = vadd.f32 %v5173_v36, %v5053_v58  ;;  %v5059_v28 = vadd.f32 %v10128_v41, %v4835_v59  ;;  %v11082_v58 = vld [vmem:[#allocation111_spill] sm:$0xff] }
 0x3f5   : > { %5471 = vst.msk [vmem:[%s10269_s25 + $0x28] sm:$0xff] %vm535_vm1, %v5439_v30  ;;  %vm5379_vm3 = vcmp.ge.f32.partialorder %v5346_v54, 0.0  ;;  %v5412_v52 = vmul.f32 %v10152_v14, %v5346_v54  ;;  %v5344_v2 = vadd.f32 %v5312_v38, %v11077_v45  ;;  %v6923_v62 = vpop.f32.mrf.mxu1  ;;  %v4838_v32 = vadd.f32 %v11078_v50, %v10191_v22  ;;  %v11080_v22 = vld [vmem:[#allocation29_spill] sm:$0xff]  ;;  %v11084_v38 = vld [vmem:[#allocation112_spill] sm:$0xff]  ;;  %v10374_v30 = vpop.f32.mrf.mxu0 }
 0x3f6   : > { %v5347_v60 = vadd.f32 %v5315_v56, %v11079_v37  ;;  %v5313_v11 = vadd.f32 %v10208_v51, %v5274_v20  ;;  %v5279_v31 = vadd.f32 %v6923_v62, %v5058_v55  ;;  %v5057_v23 = vadd.f32 %v10142_v46, %v4833_v8 }
 0x3f7   : > { %v5444_v17 = vsel %vm5379_vm3, %v5346_v54, %v5412_v52  ;;  %vm5377_vm4 = vcmp.ge.f32.partialorder %v5344_v2, 0.0  ;;  %v5410_v12 = vmul.f32 %v10152_v14, %v5344_v2  ;;  %v5186_v47 = vpop.f32.mrf.mxu1  ;;  %v4836_v40 = vadd.f32 %v11081_v29, %v10195_v9  ;;  %v11085_v52 = vld [vmem:[#allocation113_spill] sm:$0xff] }
 0x3f8   : > { %5476 = vst.msk [vmem:[%s10269_s25 + $0x50] sm:$0xff] %vm535_vm1, %v5444_v17  ;;  %vm5380_vm5 = vcmp.ge.f32.partialorder %v5347_v60, 0.0  ;;  %v5413_v41 = vmul.f32 %v10152_v14, %v5347_v60  ;;  %v5345_v59 = vadd.f32 %v5313_v11, %v11080_v22  ;;  %v5318_v7 = vadd.f32 %v10208_v51, %v5279_v31  ;;  %v11087_v11 = vld [vmem:[#allocation41_spill] sm:$0xff] }
 0x3f9   : > { %v4839_v18 = vadd.f32 %v11082_v58, %v10199_v3  ;;  %v5442_v34 = vsel %vm5377_vm4, %v5344_v2, %v5410_v12  ;;  %v5277_v46 = vadd.f32 %v5186_v47, %v5056_v27  ;;  %v6924_v35 = vpop.f32.mrf.mxu1  ;;  %v4837_v36 = vadd.f32 %v11084_v38, %v10203_v53  ;;  %v11086_v53 = vld [vmem:[#allocation37_spill] sm:$0xff]  ;;  %v11088_v47 = vld [vmem:[#allocation10_spill] sm:$0xff] }
 0x3fa   : > { %5474 = vst.msk [vmem:[%s10269_s25 + $0x40] sm:$0xff] %vm535_vm1, %v5442_v34  ;;  %v5445_v44 = vsel %vm5380_vm5, %v5347_v60, %v5413_v41  ;;  %vm5378_vm6 = vcmp.ge.f32.partialorder %v5345_v59, 0.0  ;;  %v5411_v8 = vmul.f32 %v10152_v14, %v5345_v59  ;;  %v5350_v54 = vadd.f32 %v5318_v7, %v11083_v26  ;;  %v11089_v41 = vld [vmem:[#allocation38_spill] sm:$0xff] }
 0x3fb   : > { %5477 = vst.msk [vmem:[%s10269_s25 + $0x58] sm:$0xff] %vm535_vm1, %v5445_v44  ;;  %v5316_v9 = vadd.f32 %v10208_v51, %v5277_v46  ;;  %v5280_v3 = vadd.f32 %v6924_v35, %v5059_v28  ;;  %v5189_v16 = vpop.f32.mrf.mxu1  ;;  %v5062_v55 = vadd.f32 %v10182_v1, %v4838_v32  ;;  %v4842_v45 = vadd.f32 %v11085_v52, %v10212_v42  ;;  %v11091_v46 = vld [vmem:[#allocation14_spill] sm:$0xff] }
 0x3fc   : > { %v5443_v56 = vsel %vm5378_vm6, %v5345_v59, %v5411_v8  ;;  %vm5383_vm7 = vcmp.ge.f32.partialorder %v5350_v54, 0.0  ;;  %v5416_v20 = vmul.f32 %v10152_v14, %v5350_v54  ;;  %v5278_v27 = vadd.f32 %v5189_v16, %v5057_v23  ;;  %v10393_v23 = vpop.f32.mrf.mxu0  ;;  %v11092_v44 = vld [vmem:[#allocation98_spill] sm:$0xff] }
 0x3fd   : > { %5475 = vst.msk [vmem:[%s10269_s25 + $0x48] sm:$0xff] %vm535_vm1, %v5443_v56  ;;  %v5348_v2 = vadd.f32 %v5316_v9, %v11086_v53  ;;  %v5319_v62 = vadd.f32 %v10208_v51, %v5280_v3  ;;  %v6927_v28 = vpop.f32.mrf.mxu1  ;;  %v5060_v1 = vadd.f32 %v10229_v10, %v4836_v40  ;;  %v5063_v60 = vadd.f32 %v10264_v63, %v4839_v18  ;;  %v11093_v3 = vld [vmem:[#allocation42_spill] sm:$0xff] }
 0x3fe   : > { %v5448_v50 = vsel %vm5383_vm7, %v5350_v54, %v5416_v20  ;;  %v5317_v32 = vadd.f32 %v10208_v51, %v5278_v27  ;;  %v5283_v37 = vadd.f32 %v6927_v28, %v5062_v55  ;;  %v5061_v12 = vadd.f32 %v10284_v15, %v4837_v36  ;;  %v11090_v15 = vld [vmem:[#allocation46_spill] sm:$0xff]  ;;  %v11094_v55 = vld [vmem:[#allocation16_spill] sm:$0xff] }
 0x3ff   : > { %5480 = vst.msk [vmem:[%s10269_s25 + $0x70] sm:$0xff] %vm535_vm1, %v5448_v50  ;;  %vm5381_vm8 = vcmp.ge.f32.partialorder %v5348_v2, 0.0  ;;  %v5414_v42 = vmul.f32 %v10152_v14, %v5348_v2  ;;  %v5351_v31 = vadd.f32 %v5319_v62, %v11087_v11  ;;  %v5202_v17 = vpop.f32.mrf.mxu1  ;;  %v4840_v10 = vadd.f32 %v11088_v47, %v10216_v48  ;;  %v11096_v62 = vld [vmem:[#allocation86_spill] sm:$0xff] }
 0x400   : > { %v5349_v22 = vadd.f32 %v5317_v32, %v11089_v41  ;;  %v5322_v63 = vadd.f32 %v10208_v51, %v5283_v37  ;;  %v5281_v59 = vadd.f32 %v5202_v17, %v5060_v1  ;;  %v5066_v58 = vadd.f32 %v10303_v24, %v4842_v45  ;;  %v10408_v24 = vpop.f32.mrf.mxu0  ;;  %v11098_v17 = vld [vmem:[#allocation109_spill] sm:$0xff] }
 0x401   : > { %v5446_v7 = vsel %vm5381_vm8, %v5348_v2, %v5414_v42  ;;  %vm5384_vm9 = vcmp.ge.f32.partialorder %v5351_v31, 0.0  ;;  %v5417_v29 = vmul.f32 %v10152_v14, %v5351_v31  ;;  %v6928_v40 = vpop.f32.mrf.mxu1  ;;  %v4843_v35 = vadd.f32 %v11091_v46, %v10223_v49  ;;  %v11095_v2 = vld [vmem:[#allocation95_spill] sm:$0xff] }
 0x402   : > { %5478 = vst.msk [vmem:[%s10269_s25 + $0x60] sm:$0xff] %vm535_vm1, %v5446_v7  ;;  %vm5382_vm0 = vcmp.ge.f32.partialorder %v5349_v22, 0.0  ;;  %v5415_v48 = vmul.f32 %v10152_v14, %v5349_v22  ;;  %v5354_v18 = vadd.f32 %v5322_v63, %v11090_v15  ;;  %v5320_v34 = vadd.f32 %v10208_v51, %v5281_v59  ;;  %v11100_v63 = vld [vmem:[#allocation50_spill] sm:$0xff] }
 0x403   : > { %v4841_v8 = vadd.f32 %v11092_v44, %v10227_v0  ;;  %v5449_v26 = vsel %vm5384_vm9, %v5351_v31, %v5417_v29  ;;  %v5284_v54 = vadd.f32 %v6928_v40, %v5063_v60  ;;  %v5205_v38 = vpop.f32.mrf.mxu1  ;;  %v4846_v49 = vadd.f32 %v11094_v55, %v10233_v57  ;;  %v11097_v57 = vld [vmem:[#allocation47_spill] sm:$0xff]  ;;  %v11101_v40 = vld [vmem:[#allocation106_spill] sm:$0xff]  ;;  %v11105_v55 = vld [vmem:[#allocation36_spill] sm:$0xff] }
 0x404   : > { %5481 = vst.msk [vmem:[%s10269_s25 + $0x78] sm:$0xff] %vm535_vm1, %v5449_v26  ;;  %v5447_v36 = vsel %vm5382_vm0, %v5349_v22, %v5415_v48  ;;  %vm5387_vm2 = vcmp.ge.f32.partialorder %v5354_v18, 0.0  ;;  %v5420_v9 = vmul.f32 %v10152_v14, %v5354_v18  ;;  %v5352_v16 = vadd.f32 %v5320_v34, %v11093_v3  ;;  %v11102_v34 = vld [vmem:[#allocation48_spill] sm:$0xff]  ;;  %v11104_v3 = vld [vmem:[#allocation51_spill] sm:$0xff] }
 0x405   : > { %5479 = vst.msk [vmem:[%s10269_s25 + $0x68] sm:$0xff] %vm535_vm1, %v5447_v36  ;;  %v5323_v0 = vadd.f32 %v10208_v51, %v5284_v54  ;;  %v5282_v56 = vadd.f32 %v5205_v38, %v5061_v12  ;;  %v6931_v20 = vpop.f32.mrf.mxu1  ;;  %v5064_v27 = vadd.f32 %v10318_v43, %v4840_v10  ;;  %v10423_v28 = vadd.f32 %v11096_v62, %v11095_v2  ;;  %v5016_v43 = vpop.f32.mrf.mxu0  ;;  %v11099_v10 = vld [vmem:[#allocation43_spill] sm:$0xff] }
 0x406   : > { %v5452_v52 = vsel %vm5387_vm2, %v5354_v18, %v5420_v9  ;;  %vm5385_vm10 = vcmp.ge.f32.partialorder %v5352_v16, 0.0  ;;  %v5418_v45 = vmul.f32 %v10152_v14, %v5352_v16  ;;  %v5287_v53 = vadd.f32 %v6931_v20, %v5066_v58 }
 0x407   : > { %5484 = vst.msk [vmem:[%s10269_s25 + $0x90] sm:$0xff] %vm535_vm1, %v5452_v52  ;;  %v5355_v1 = vadd.f32 %v5323_v0, %v11097_v57  ;;  %v5321_v50 = vadd.f32 %v10208_v51, %v5282_v56  ;;  %v5218_v32 = vpop.f32.mrf.mxu1  ;;  %v5067_v37 = vadd.f32 %v10338_v13, %v4843_v35  ;;  %v5065_v31 = vadd.f32 %v10353_v5, %v4841_v8  ;;  %v6903_v13 = vpop.f32.mrf.mxu0 }
 0x408   : > { %v5450_v60 = vsel %vm5385_vm10, %v5352_v16, %v5418_v45  ;;  %v5326_v42 = vadd.f32 %v10208_v51, %v5287_v53  ;;  %v5285_v11 = vadd.f32 %v5218_v32, %v5064_v27  ;;  %v4844_v12 = vadd.f32 %v11098_v17, %v10240_v25  ;;  %v11106_v45 = vld [vmem:[#allocation75_spill] sm:$0xff]  ;;  %v11107_v53 = vld [vmem:[#allocation93_spill] sm:$0xff]  ;;  %v11109_v17 = vld [vmem:[#allocation54_spill] sm:$0xff] }
 0x409   : > { %5482 = vst.msk [vmem:[%s10269_s25 + $0x80] sm:$0xff] %vm535_vm1, %v5450_v60  ;;  %vm5388_vm11 = vcmp.ge.f32.partialorder %v5355_v1, 0.0  ;;  %v5421_v47 = vmul.f32 %v10152_v14, %v5355_v1  ;;  %v5353_v41 = vadd.f32 %v5321_v50, %v11099_v10  ;;  %v6932_v22 = vpop.f32.mrf.mxu1  ;;  %v5070_v5 = vadd.f32 %v10374_v30, %v4846_v49  ;;  %v11103_v30 = vld [vmem:[#allocation39_spill] sm:$0xff]  ;;  %v5029_v38 = vpop.f32.mrf.mxu0  ;;  %v11110_v10 = vld [vmem:[#allocation52_spill] sm:$0xff] }
 0x40a   : > { %v5358_v59 = vadd.f32 %v5326_v42, %v11100_v63  ;;  %v5324_v7 = vadd.f32 %v10208_v51, %v5285_v11  ;;  %v5288_v29 = vadd.f32 %v6932_v22, %v5067_v37  ;;  %v4847_v25 = vadd.f32 %v11101_v40, %v10244_v21 }
 0x40b   : > { %v5453_v58 = vsel %vm5388_vm11, %v5355_v1, %v5421_v47  ;;  %vm5386_vm12 = vcmp.ge.f32.partialorder %v5353_v41, 0.0  ;;  %v5419_v48 = vmul.f32 %v10152_v14, %v5353_v41  ;;  %v5221_v15 = vpop.f32.mrf.mxu1  ;;  %v4845_v44 = vadd.f32 %v11103_v30, %v10248_v19  ;;  %v6904_v32 = vpop.f32.mrf.mxu0 }
 0x40c   : > { %5485 = vst.msk [vmem:[%s10269_s25 + $0x98] sm:$0xff] %vm535_vm1, %v5453_v58  ;;  %vm5391_vm13 = vcmp.ge.f32.partialorder %v5358_v59, 0.0  ;;  %v5424_v18 = vmul.f32 %v10152_v14, %v5358_v59  ;;  %v5356_v46 = vadd.f32 %v5324_v7, %v11102_v34  ;;  %v5327_v35 = vadd.f32 %v10208_v51, %v5288_v29  ;;  %v11111_v7 = vld [vmem:[#allocation55_spill] sm:$0xff]  ;;  %v11112_v34 = vld [vmem:[#allocation53_spill] sm:$0xff] }
 0x40d   : > { %v5451_v21 = vsel %vm5386_vm12, %v5353_v41, %v5419_v48  ;;  %v5286_v8 = vadd.f32 %v5221_v15, %v5065_v31  ;;  %v6935_v26 = vpop.f32.mrf.mxu1  ;;  %v5068_v54 = vadd.f32 %v10393_v23, %v4844_v12  ;;  %v4850_v49 = vadd.f32 %v11105_v55, %v10253_v61  ;;  %v11108_v61 = vld [vmem:[#allocation49_spill] sm:$0xff] }
 0x40e   : > { %5483 = vst.msk [vmem:[%s10269_s25 + $0x88] sm:$0xff] %vm535_vm1, %v5451_v21  ;;  %v5456_v36 = vsel %vm5391_vm13, %v5358_v59, %v5424_v18  ;;  %vm5389_vm14 = vcmp.ge.f32.partialorder %v5356_v46, 0.0  ;;  %v5422_v9 = vmul.f32 %v10152_v14, %v5356_v46  ;;  %v5359_v16 = vadd.f32 %v5327_v35, %v11104_v3  ;;  %v5032_v59 = vpop.f32.mrf.mxu0 }
 0x40f   : > { %5488 = vst.msk [vmem:[%s10269_s25 + $0xb0] sm:$0xff] %vm535_vm1, %v5456_v36  ;;  %v5325_v19 = vadd.f32 %v10208_v51, %v5286_v8  ;;  %v5291_v0 = vadd.f32 %v6935_v26, %v5070_v5  ;;  %v5234_v56 = vpop.f32.mrf.mxu1  ;;  %v5071_v23 = vadd.f32 %v10408_v24, %v4847_v25  ;;  %v4635_v2 = vadd.f32 %v11107_v53, %v11106_v45 }
 0x410   : > { %v5454_v20 = vsel %vm5389_vm14, %v5356_v46, %v5422_v9  ;;  %vm5392_vm15 = vcmp.ge.f32.partialorder %v5359_v16, 0.0  ;;  %v5425_v27 = vmul.f32 %v10152_v14, %v5359_v16  ;;  %v5289_v52 = vadd.f32 %v5234_v56, %v5068_v54 }
 0x411   : > { %5486 = vst.msk [vmem:[%s10269_s25 + $0xa0] sm:$0xff] %vm535_vm1, %v5454_v20  ;;  %v5357_v62 = vadd.f32 %v5325_v19, %v11108_v61  ;;  %v5330_v57 = vadd.f32 %v10208_v51, %v5291_v0  ;;  %v6936_v1 = vpop.f32.mrf.mxu1  ;;  %v5069_v50 = vadd.f32 %v5016_v43, %v4845_v44  ;;  %v4848_v24 = vadd.f32 %v10134_v39, %v10260_v33  ;;  %v11114_v0 = vld [vmem:[#allocation44_spill] sm:$0xff] }
 0x412   : > { %v5457_v37 = vsel %vm5392_vm15, %v5359_v16, %v5425_v27  ;;  %v5328_v60 = vadd.f32 %v10208_v51, %v5289_v52  ;;  %v5292_v42 = vadd.f32 %v6936_v1, %v5071_v23  ;;  %v4851_v11 = vadd.f32 %v10150_v4, %v10423_v28  ;;  %v11115_v23 = vld [vmem:[#allocation8_spill] sm:$0xff] }
 0x413   : > { %5489 = vst.msk [vmem:[%s10269_s25 + $0xb8] sm:$0xff] %vm535_vm1, %v5457_v37  ;;  %vm5390_vm3 = vcmp.ge.f32.partialorder %v5357_v62, 0.0  ;;  %v5423_v31 = vmul.f32 %v10152_v14, %v5357_v62  ;;  %v5362_v12 = vadd.f32 %v5330_v57, %v11109_v17  ;;  %v5237_v43 = vpop.f32.mrf.mxu1  ;;  %v5074_v47 = vadd.f32 %v6903_v13, %v4850_v49 }
 0x414   : > { %v5360_v39 = vadd.f32 %v5328_v60, %v11110_v10  ;;  %v5331_v33 = vadd.f32 %v10208_v51, %v5292_v42  ;;  %v5290_v41 = vadd.f32 %v5237_v43, %v5069_v50  ;;  %v4849_v22 = vadd.f32 %v10176_v6, %v4635_v2  ;;  %v11116_v2 = vld [vmem:[#allocation6_spill] sm:$0xff] }
 0x415   : > { %v5455_v63 = vsel %vm5390_vm3, %v5357_v62, %v5423_v31  ;;  %vm5395_vm4 = vcmp.ge.f32.partialorder %v5362_v12, 0.0  ;;  %v5428_v4 = vmul.f32 %v10152_v14, %v5362_v12  ;;  %v6939_v28 = vpop.f32.mrf.mxu1  ;;  %v5072_v40 = vadd.f32 %v5029_v38, %v4848_v24  ;;  %v11113_v38 = vld [vmem:[#allocation7_spill] sm:$0xff] }
 0x416   : > { %5487 = vst.msk [vmem:[%s10269_s25 + $0xa8] sm:$0xff] %vm535_vm1, %v5455_v63  ;;  %vm5393_vm5 = vcmp.ge.f32.partialorder %v5360_v39, 0.0  ;;  %v5426_v13 = vmul.f32 %v10152_v14, %v5360_v39  ;;  %v5363_v29 = vadd.f32 %v5331_v33, %v11111_v7  ;;  %v5329_v5 = vadd.f32 %v10208_v51, %v5290_v41 }
 0x417   : > { %v5075_v25 = vadd.f32 %v6904_v32, %v4851_v11  ;;  %v5460_v6 = vsel %vm5395_vm4, %v5362_v12, %v5428_v4  ;;  %v5295_v58 = vadd.f32 %v6939_v28, %v5074_v47  ;;  %v5250_v48 = vpop.f32.mrf.mxu1  ;;  %v5073_v35 = vadd.f32 %v5032_v59, %v4849_v22 }
 0x418   : > { %5492 = vst.msk [vmem:[%s10269_s25 + $0xd0] sm:$0xff] %vm535_vm1, %v5460_v6  ;;  %v5458_v15 = vsel %vm5393_vm5, %v5360_v39, %v5426_v13  ;;  %vm5396_vm6 = vcmp.ge.f32.partialorder %v5363_v29, 0.0  ;;  %v5429_v18 = vmul.f32 %v10152_v14, %v5363_v29  ;;  %v5361_v46 = vadd.f32 %v5329_v5, %v11112_v34 }
 0x419   : > { %5490 = vst.msk [vmem:[%s10269_s25 + $0xc0] sm:$0xff] %vm535_vm1, %v5458_v15  ;;  %v5334_v30 = vadd.f32 %v10208_v51, %v5295_v58  ;;  %v5293_v44 = vadd.f32 %v5250_v48, %v5072_v40  ;;  %v6940_v21 = vpop.f32.mrf.mxu1 }
 0x41a   : > { %v5461_v8 = vsel %vm5396_vm6, %v5363_v29, %v5429_v18  ;;  %vm5394_vm7 = vcmp.ge.f32.partialorder %v5361_v46, 0.0  ;;  %v5427_v26 = vmul.f32 %v10152_v14, %v5361_v46  ;;  %v5296_v54 = vadd.f32 %v6940_v21, %v5075_v25 }
 0x41b   : > { %5493 = vst.msk [vmem:[%s10269_s25 + $0xd8] sm:$0xff] %vm535_vm1, %v5461_v8  ;;  %v5366_v36 = vadd.f32 %v5334_v30, %v11113_v38  ;;  %v5332_v9 = vadd.f32 %v10208_v51, %v5293_v44  ;;  %v5253_v3 = vpop.f32.mrf.mxu1 }
 0x41c   : > { %v5459_v16 = vsel %vm5394_vm7, %v5361_v46, %v5427_v26  ;;  %v5335_v55 = vadd.f32 %v10208_v51, %v5296_v54  ;;  %v5294_v49 = vadd.f32 %v5253_v3, %v5073_v35 }
 0x41d   : > { %5491 = vst.msk [vmem:[%s10269_s25 + $0xc8] sm:$0xff] %vm535_vm1, %v5459_v16  ;;  %vm5399_vm8 = vcmp.ge.f32.partialorder %v5366_v36, 0.0  ;;  %v5432_v19 = vmul.f32 %v10152_v14, %v5366_v36  ;;  %v5364_v56 = vadd.f32 %v5332_v9, %v11114_v0 }
 0x41e   : > { %v5367_v20 = vadd.f32 %v5335_v55, %v11115_v23  ;;  %v5333_v27 = vadd.f32 %v10208_v51, %v5294_v49 }
 0x41f   : > { %v5464_v52 = vsel %vm5399_vm8, %v5366_v36, %v5432_v19  ;;  %vm5397_vm9 = vcmp.ge.f32.partialorder %v5364_v56, 0.0  ;;  %v5430_v45 = vmul.f32 %v10152_v14, %v5364_v56 }
 0x420   : > { %5496 = vst.msk [vmem:[%s10269_s25 + $0xf0] sm:$0xff] %vm535_vm1, %v5464_v52  ;;  %vm5400_vm0 = vcmp.ge.f32.partialorder %v5367_v20, 0.0  ;;  %v5433_v53 = vmul.f32 %v10152_v14, %v5367_v20  ;;  %v5365_v61 = vadd.f32 %v5333_v27, %v11116_v2 }
 0x421   : > { %v5462_v62 = vsel %vm5397_vm9, %v5364_v56, %v5430_v45 }
 0x422   : > { %5494 = vst.msk [vmem:[%s10269_s25 + $0xe0] sm:$0xff] %vm535_vm1, %v5462_v62  ;;  %v5465_v57 = vsel %vm5400_vm0, %v5367_v20, %v5433_v53  ;;  %vm5398_vm2 = vcmp.ge.f32.partialorder %v5365_v61, 0.0  ;;  %v5431_v1 = vmul.f32 %v10152_v14, %v5365_v61 }
 0x423   : > { %5497 = vst.msk [vmem:[%s10269_s25 + $0xf8] sm:$0xff] %vm535_vm1, %v5465_v57 }
 0x424   : > { %v5463_v51 = vsel %vm5398_vm2, %v5365_v61, %v5431_v1 }
 0x425   : > { %5495 = vst.msk [vmem:[%s10269_s25 + $0xe8] sm:$0xff] %vm535_vm1, %v5463_v51 }
 0x426 PF: > { %s17_s21 = sadd.s32 1, %s7023_s21  }
 0x427   : > { %p14_p1 = scmp.ge.s32.totalorder %s17_s21, 4  }
 0x429   :  { %16 = sbr.rel (!%p14_p1) target bundleno = 1 (0x1), region = 96 }
 0x42e   :  { %5519 = vsyncpa [#allocation4], 1 }
 0x42f   :  { %5521 = vsyncpa [#allocation4 + $0x1], 1 }

</bundles_post_ra>
